<compile_context>
chip_gen: v7x
topology: tpu7x:2x2x1
jax: 0.10.0
libtpu: 0.0.40
codegen_flags: <defaults>
</compile_context>

<pallas_src>
import math

import jax
import jax.numpy as jnp
from jax.experimental import pallas as pl
from jax.experimental.pallas import tpu as pltpu

# df_trans.shape[1] is data-dependent in the original script (one-hot width of
# fraud_dataset_v2); we fix it deterministically here but keep it configurable
# via init_decoder_params(out_features=...).
OUT_FEATURES = 618
LANE = 128

LAYER_DIMS = [3, 4, 8, 16, 32, 64, 128, 256, 512, OUT_FEATURES]
N_LAYERS = len(LAYER_DIMS) - 1
# Layers with out_features < 128 run as f32 broadcast-FMA on the VPU; layers
# from 64->128 onward use the bf16-operand MXU path.
MXU_START = 5
NEG_SLOPE = 0.4


def _round_up(n, m):
    return ((n + m - 1) // m) * m


def _cdiv(a, b):
    return (a + b - 1) // b


def _leaky_relu(x):
    # 0 < negative_slope < 1  =>  leaky_relu(x) == max(x, slope * x).
    # Dtype-preserving (works for both f32 and bf16 operands).
    return jnp.maximum(x, NEG_SLOPE * x)


def _small_dense(h, w, b):
    """f32 VPU path for narrow layers: h @ w + b as an unrolled broadcast-FMA.

    h: (TB, fin) f32, w: (fin, fout) f32 with fin, fout < 128, b: (1, fout).
    Keeps tiny layers off the MXU's serial push/pop path.
    """
    fin = w.shape[0]
    acc = h[:, 0:1] * w[0:1, :] + b
    for k in range(1, fin):
        acc = acc + h[:, k:k + 1] * w[k:k + 1, :]
    return acc


def _make_decoder_kernel(bf16_epilogue):
    """Full 9-layer MLP on one (TB, 3) batch tile; weights are VMEM-resident."""

    def kernel(x_ref, *refs):
        out_ref = refs[-1]
        wb = refs[:-1]                       # w1, b1, ..., w9, b9
        h = x_ref[...]                       # (TB, 3) f32
        for li in range(N_LAYERS):
            w_ref, b_ref = wb[2 * li], wb[2 * li + 1]
            if li < MXU_START:
                # Narrow layer: f32 VPU broadcast-FMA (dropout(p=0.0) == id).
                h = _leaky_relu(_small_dense(h, w_ref[...], b_ref[...]))
            else:
                # Wide layer: bf16 MXU operands, f32 accumulation.
                y = jnp.dot(h.astype(jnp.bfloat16), w_ref[...],
                            preferred_element_type=jnp.float32)
                if bf16_epilogue:
                    # v6e/v7x bf16 VALU: halves elementwise vreg traffic and
                    # feeds the next dot without another astype.
                    y = y.astype(jnp.bfloat16) + b_ref[...].astype(jnp.bfloat16)
                else:
                    # v5e has no bf16 VPU: keep bias + activation in f32.
                    y = y + b_ref[...]
                h = _leaky_relu(y)
        out_ref[...] = h.astype(out_ref.dtype)

    return kernel


def _tpu_supports_bf16_vpu():
    """True on chips with a bf16 VALU (v6e, v7x); False on v5e and older/CPU."""
    try:
        kind = jax.devices()[0].device_kind.lower()
    except Exception:
        return False
    if "tpu" not in kind:
        return False
    for old in ("v2", "v3", "v4", "v5"):
        if old in kind:
            return False
    return True


def init_decoder_params(key, out_features=OUT_FEATURES):
    """Parameter init matching the PyTorch module's shapes.

    Weights: Xavier-uniform, stored transposed as (in_features, out_features).
    Biases: PyTorch Linear default U(-1/sqrt(fan_in), 1/sqrt(fan_in)), (1, out).
    """
    dims = LAYER_DIMS[:-1] + [out_features]
    params = []
    for i in range(len(dims) - 1):
        fan_in, fan_out = dims[i], dims[i + 1]
        key, wk, bk = jax.random.split(key, 3)
        w_bound = math.sqrt(6.0 / (fan_in + fan_out))
        w = jax.random.uniform(wk, (fan_in, fan_out), jnp.float32,
                               minval=-w_bound, maxval=w_bound)
        b_bound = 1.0 / math.sqrt(fan_in)
        b = jax.random.uniform(bk, (1, fan_out), jnp.float32,
                               minval=-b_bound, maxval=b_bound)
        params.append((w, b))
    return params


def _prepare_kernel_params(params, out_padded):
    """Narrow layers stay f32 (VPU); wide layers bf16 (MXU); last layer padded."""
    prepped = []
    for idx, (w, b) in enumerate(params):
        if idx == len(params) - 1 and w.shape[1] != out_padded:
            pad = out_padded - w.shape[1]
            w = jnp.pad(w, ((0, 0), (0, pad)))       # zero cols -> zero output
            b = jnp.pad(b, ((0, 0), (0, pad)))
        if idx < MXU_START:
            prepped.append((w.astype(jnp.float32), b.astype(jnp.float32)))
        else:
            prepped.append((w.astype(jnp.bfloat16), b.astype(jnp.float32)))
    return prepped


def _choose_tile(batch, block_batch):
    # Clamp/round caller-supplied block_batch so the block's sublane dim always
    # satisfies the (8,128) BlockSpec divisibility rule.
    block_batch = max(8, _round_up(int(block_batch), 8))
    # At least 2 grid steps when the batch allows, so both v7x TensorCores get
    # work under dimension_semantics=("parallel",); harmless on 1-TC chips.
    tb = max(8, min(block_batch, _round_up(_cdiv(batch, 2), 8)))
    # MXU/bf16-packing friendly M: prefer multiples of 256 / 128 / 16.
    for m in (256, 128, 16):
        if tb >= m:
            tb = (tb // m) * m
            break
    padded_b = _round_up(batch, tb)
    return tb, padded_b


def decoder_forward(x, params, *, block_batch=512, bf16_epilogue=None,
                    return_padded=False):
    """Pallas forward pass. x: (B, 3) float32 -> (B, out_features) float32."""
    batch = x.shape[0]
    out_features = params[-1][0].shape[1]
    out_padded = _round_up(out_features, LANE)
    if bf16_epilogue is None:
        bf16_epilogue = _tpu_supports_bf16_vpu()

    kparams = _prepare_kernel_params(params, out_padded)
    tb, padded_b = _choose_tile(batch, block_batch)
    if padded_b != batch:
        x = jnp.pad(x, ((0, padded_b - batch), (0, 0)))
    grid = (padded_b // tb,)

    flat_args = [x]
    in_specs = [pl.BlockSpec((tb, LAYER_DIMS[0]), lambda i: (i, 0))]
    for w, b in kparams:
        flat_args.extend([w, b])
        # Constant index_map -> weights/biases DMA'd once, stay VMEM-resident.
        in_specs.append(pl.BlockSpec(w.shape, lambda i: (0, 0)))
        in_specs.append(pl.BlockSpec(b.shape, lambda i: (0, 0)))
    out_specs = pl.BlockSpec((tb, out_padded), lambda i: (i, 0))

    dims = LAYER_DIMS[:-1] + [out_padded]
    flops = 2 * padded_b * sum(dims[i] * dims[i + 1] for i in range(len(dims) - 1))
    bytes_accessed = (x.size * x.dtype.itemsize
                      + padded_b * out_padded * 4
                      + sum(w.size * w.dtype.itemsize + b.size * 4
                            for w, b in kparams))

    out = pl.pallas_call(
        _make_decoder_kernel(bf16_epilogue),
        grid=grid,
        in_specs=in_specs,
        out_specs=out_specs,
        out_shape=jax.ShapeDtypeStruct((padded_b, out_padded), jnp.float32),
        compiler_params=pltpu.CompilerParams(
            dimension_semantics=("parallel",),       # v7x megacore split
            vmem_limit_bytes=32 * 1024 * 1024),      # headroom for TB up to 1024
        cost_estimate=pl.CostEstimate(
            flops=flops, transcendentals=0, bytes_accessed=bytes_accessed),
    )(*flat_args)

    if return_padded:
        # Skip the wrapper slice's extra HBM read+rewrite; the consumer slices
        # [:batch, :out_features] (padded cols are exactly zero).
        return out
    return out[:batch, :out_features]


def decoder_reference_matched(x, params, *, bf16_epilogue):
    """Pure-JAX reference mirroring the kernel's exact dtype/compute path."""
    h = x
    for li, (w, b) in enumerate(params):
        if li < MXU_START:
            h = _leaky_relu(_small_dense(h, w, b))
        else:
            y = jnp.dot(h.astype(jnp.bfloat16), w.astype(jnp.bfloat16),
                        preferred_element_type=jnp.float32)
            if bf16_epilogue:
                y = y.astype(jnp.bfloat16) + b.astype(jnp.bfloat16)
            else:
                y = y + b
            h = _leaky_relu(y)
    return h.astype(jnp.float32)


def decoder_reference_f32(x, params):
    """Pure f32 reference (matches the original PyTorch semantics)."""
    h = x
    for w, b in params:
        y = h @ w + b
        h = jnp.maximum(y, NEG_SLOPE * y)
    return h


if __name__ == "__main__":
    key = jax.random.PRNGKey(0)
    pkey, xkey = jax.random.split(key)

    params = init_decoder_params(pkey)

    batch = 16
    x = jax.random.normal(xkey, (batch, LAYER_DIMS[0]), jnp.float32)

    bf16_epi = _tpu_supports_bf16_vpu()

    # Default block_batch=512 -> tile selection yields tb=8 here, so the small
    # test still exercises a multi-step (2-step) grid.
    out = jax.block_until_ready(
        decoder_forward(x, params, bf16_epilogue=bf16_epi))
    assert out.shape == (batch, OUT_FEATURES)

    # Exact-semantics check vs a reference using the kernel's dtype path.
    ref_matched = decoder_reference_matched(x, params, bf16_epilogue=bf16_epi)
    tol = 3e-2 if bf16_epi else 2e-3
    assert jnp.allclose(out, ref_matched, atol=tol, rtol=tol), \
        "mismatch vs matched-semantics reference"

    # Sanity check vs the full-f32 reference (bf16 rounding only).
    ref_f32 = decoder_reference_f32(x, params)
    max_err = float(jnp.max(jnp.abs(out - ref_f32)))
    assert max_err < 0.2, f"unexpectedly large bf16 drift vs f32 ref: {max_err}"

    print("KERNEL_OK")
</pallas_src>

<mosaic_0001>
module attributes {stable_mosaic.version = 11 : i64} {
  func.func @kernel(%arg0: i32, %arg1: memref<8x3xf32, #tpu.memory_space<vmem>>, %arg2: memref<3x4xf32, #tpu.memory_space<vmem>>, %arg3: memref<1x4xf32, #tpu.memory_space<vmem>>, %arg4: memref<4x8xf32, #tpu.memory_space<vmem>>, %arg5: memref<1x8xf32, #tpu.memory_space<vmem>>, %arg6: memref<8x16xf32, #tpu.memory_space<vmem>>, %arg7: memref<1x16xf32, #tpu.memory_space<vmem>>, %arg8: memref<16x32xf32, #tpu.memory_space<vmem>>, %arg9: memref<1x32xf32, #tpu.memory_space<vmem>>, %arg10: memref<32x64xf32, #tpu.memory_space<vmem>>, %arg11: memref<1x64xf32, #tpu.memory_space<vmem>>, %arg12: memref<64x128xbf16, #tpu.memory_space<vmem>>, %arg13: memref<1x128xf32, #tpu.memory_space<vmem>>, %arg14: memref<128x256xbf16, #tpu.memory_space<vmem>>, %arg15: memref<1x256xf32, #tpu.memory_space<vmem>>, %arg16: memref<256x512xbf16, #tpu.memory_space<vmem>>, %arg17: memref<1x512xf32, #tpu.memory_space<vmem>>, %arg18: memref<512x640xbf16, #tpu.memory_space<vmem>>, %arg19: memref<1x640xf32, #tpu.memory_space<vmem>>, %arg20: memref<8x640xf32, #tpu.memory_space<vmem>>) attributes {dimension_semantics = [#tpu.dimension_semantics<parallel>], iteration_bounds = array<i64: 2>, scalar_prefetch = 0 : i64, scratch_operands = 0 : i64, tpu.core_type = #tpu.core_type<tc>, window_params = [{transform_indices = @transform_0, window_bounds = array<i64: 8, 3>}, {pipeline_mode = #tpu.pipeline_mode<synchronous>, transform_indices = @transform_1, window_bounds = array<i64: 3, 4>}, {pipeline_mode = #tpu.pipeline_mode<synchronous>, transform_indices = @transform_2, window_bounds = array<i64: 1, 4>}, {pipeline_mode = #tpu.pipeline_mode<synchronous>, transform_indices = @transform_3, window_bounds = array<i64: 4, 8>}, {pipeline_mode = #tpu.pipeline_mode<synchronous>, transform_indices = @transform_4, window_bounds = array<i64: 1, 8>}, {pipeline_mode = #tpu.pipeline_mode<synchronous>, transform_indices = @transform_5, window_bounds = array<i64: 8, 16>}, {pipeline_mode = #tpu.pipeline_mode<synchronous>, transform_indices = @transform_6, window_bounds = array<i64: 1, 16>}, {pipeline_mode = #tpu.pipeline_mode<synchronous>, transform_indices = @transform_7, window_bounds = array<i64: 16, 32>}, {pipeline_mode = #tpu.pipeline_mode<synchronous>, transform_indices = @transform_8, window_bounds = array<i64: 1, 32>}, {pipeline_mode = #tpu.pipeline_mode<synchronous>, transform_indices = @transform_9, window_bounds = array<i64: 32, 64>}, {pipeline_mode = #tpu.pipeline_mode<synchronous>, transform_indices = @transform_10, window_bounds = array<i64: 1, 64>}, {pipeline_mode = #tpu.pipeline_mode<synchronous>, transform_indices = @transform_11, window_bounds = array<i64: 64, 128>}, {pipeline_mode = #tpu.pipeline_mode<synchronous>, transform_indices = @transform_12, window_bounds = array<i64: 1, 128>}, {pipeline_mode = #tpu.pipeline_mode<synchronous>, transform_indices = @transform_13, window_bounds = array<i64: 128, 256>}, {pipeline_mode = #tpu.pipeline_mode<synchronous>, transform_indices = @transform_14, window_bounds = array<i64: 1, 256>}, {pipeline_mode = #tpu.pipeline_mode<synchronous>, transform_indices = @transform_15, window_bounds = array<i64: 256, 512>}, {pipeline_mode = #tpu.pipeline_mode<synchronous>, transform_indices = @transform_16, window_bounds = array<i64: 1, 512>}, {pipeline_mode = #tpu.pipeline_mode<synchronous>, transform_indices = @transform_17, window_bounds = array<i64: 512, 640>}, {pipeline_mode = #tpu.pipeline_mode<synchronous>, transform_indices = @transform_18, window_bounds = array<i64: 1, 640>}, {transform_indices = @transform_19, window_bounds = array<i64: 8, 640>}]} {
    %c0 = arith.constant 0 : index
    %c0_0 = arith.constant 0 : index
    %0 = vector.load %arg1[%c0, %c0_0] : memref<8x3xf32, #tpu.memory_space<vmem>>, vector<8x3xf32>
    %c0_1 = arith.constant 0 : index
    %c0_2 = arith.constant 0 : index
    %1 = vector.load %arg2[%c0_1, %c0_2] : memref<3x4xf32, #tpu.memory_space<vmem>>, vector<3x4xf32>
    %c0_3 = arith.constant 0 : index
    %c0_4 = arith.constant 0 : index
    %2 = vector.load %arg3[%c0_3, %c0_4] : memref<1x4xf32, #tpu.memory_space<vmem>>, vector<1x4xf32>
    %3 = vector.extract_strided_slice %0 {offsets = [0, 0], sizes = [8, 1], strides = [1, 1]} : vector<8x3xf32> to vector<8x1xf32>
    %4 = vector.extract_strided_slice %1 {offsets = [0, 0], sizes = [1, 4], strides = [1, 1]} : vector<3x4xf32> to vector<1x4xf32>
    %5 = vector.broadcast %3 : vector<8x1xf32> to vector<8x4xf32>
    %6 = vector.broadcast %4 : vector<1x4xf32> to vector<8x4xf32>
    %7 = arith.mulf %5, %6 : vector<8x4xf32>
    %8 = vector.broadcast %2 : vector<1x4xf32> to vector<8x4xf32>
    %9 = arith.addf %7, %8 : vector<8x4xf32>
    %10 = vector.extract_strided_slice %0 {offsets = [0, 1], sizes = [8, 1], strides = [1, 1]} : vector<8x3xf32> to vector<8x1xf32>
    %11 = vector.extract_strided_slice %1 {offsets = [1, 0], sizes = [1, 4], strides = [1, 1]} : vector<3x4xf32> to vector<1x4xf32>
    %12 = vector.broadcast %10 : vector<8x1xf32> to vector<8x4xf32>
    %13 = vector.broadcast %11 : vector<1x4xf32> to vector<8x4xf32>
    %14 = arith.mulf %12, %13 : vector<8x4xf32>
    %15 = arith.addf %9, %14 : vector<8x4xf32>
    %16 = vector.extract_strided_slice %0 {offsets = [0, 2], sizes = [8, 1], strides = [1, 1]} : vector<8x3xf32> to vector<8x1xf32>
    %17 = vector.extract_strided_slice %1 {offsets = [2, 0], sizes = [1, 4], strides = [1, 1]} : vector<3x4xf32> to vector<1x4xf32>
    %18 = vector.broadcast %16 : vector<8x1xf32> to vector<8x4xf32>
    %19 = vector.broadcast %17 : vector<1x4xf32> to vector<8x4xf32>
    %20 = arith.mulf %18, %19 : vector<8x4xf32>
    %21 = arith.addf %15, %20 : vector<8x4xf32>
    %cst = arith.constant 4.000000e-01 : f32
    %22 = vector.broadcast %cst : f32 to vector<8x4xf32>
    %23 = arith.mulf %22, %21 : vector<8x4xf32>
    %24 = arith.maximumf %21, %23 : vector<8x4xf32>
    %c0_5 = arith.constant 0 : index
    %c0_6 = arith.constant 0 : index
    %25 = vector.load %arg4[%c0_5, %c0_6] : memref<4x8xf32, #tpu.memory_space<vmem>>, vector<4x8xf32>
    %c0_7 = arith.constant 0 : index
    %c0_8 = arith.constant 0 : index
    %26 = vector.load %arg5[%c0_7, %c0_8] : memref<1x8xf32, #tpu.memory_space<vmem>>, vector<1x8xf32>
    %27 = vector.extract_strided_slice %24 {offsets = [0, 0], sizes = [8, 1], strides = [1, 1]} : vector<8x4xf32> to vector<8x1xf32>
    %28 = vector.extract_strided_slice %25 {offsets = [0, 0], sizes = [1, 8], strides = [1, 1]} : vector<4x8xf32> to vector<1x8xf32>
    %29 = vector.broadcast %27 : vector<8x1xf32> to vector<8x8xf32>
    %30 = vector.broadcast %28 : vector<1x8xf32> to vector<8x8xf32>
    %31 = arith.mulf %29, %30 : vector<8x8xf32>
    %32 = vector.broadcast %26 : vector<1x8xf32> to vector<8x8xf32>
    %33 = arith.addf %31, %32 : vector<8x8xf32>
    %34 = vector.extract_strided_slice %24 {offsets = [0, 1], sizes = [8, 1], strides = [1, 1]} : vector<8x4xf32> to vector<8x1xf32>
    %35 = vector.extract_strided_slice %25 {offsets = [1, 0], sizes = [1, 8], strides = [1, 1]} : vector<4x8xf32> to vector<1x8xf32>
    %36 = vector.broadcast %34 : vector<8x1xf32> to vector<8x8xf32>
    %37 = vector.broadcast %35 : vector<1x8xf32> to vector<8x8xf32>
    %38 = arith.mulf %36, %37 : vector<8x8xf32>
    %39 = arith.addf %33, %38 : vector<8x8xf32>
    %40 = vector.extract_strided_slice %24 {offsets = [0, 2], sizes = [8, 1], strides = [1, 1]} : vector<8x4xf32> to vector<8x1xf32>
    %41 = vector.extract_strided_slice %25 {offsets = [2, 0], sizes = [1, 8], strides = [1, 1]} : vector<4x8xf32> to vector<1x8xf32>
    %42 = vector.broadcast %40 : vector<8x1xf32> to vector<8x8xf32>
    %43 = vector.broadcast %41 : vector<1x8xf32> to vector<8x8xf32>
    %44 = arith.mulf %42, %43 : vector<8x8xf32>
    %45 = arith.addf %39, %44 : vector<8x8xf32>
    %46 = vector.extract_strided_slice %24 {offsets = [0, 3], sizes = [8, 1], strides = [1, 1]} : vector<8x4xf32> to vector<8x1xf32>
    %47 = vector.extract_strided_slice %25 {offsets = [3, 0], sizes = [1, 8], strides = [1, 1]} : vector<4x8xf32> to vector<1x8xf32>
    %48 = vector.broadcast %46 : vector<8x1xf32> to vector<8x8xf32>
    %49 = vector.broadcast %47 : vector<1x8xf32> to vector<8x8xf32>
    %50 = arith.mulf %48, %49 : vector<8x8xf32>
    %51 = arith.addf %45, %50 : vector<8x8xf32>
    %cst_9 = arith.constant 4.000000e-01 : f32
    %52 = vector.broadcast %cst_9 : f32 to vector<8x8xf32>
    %53 = arith.mulf %52, %51 : vector<8x8xf32>
    %54 = arith.maximumf %51, %53 : vector<8x8xf32>
    %c0_10 = arith.constant 0 : index
    %c0_11 = arith.constant 0 : index
    %55 = vector.load %arg6[%c0_10, %c0_11] : memref<8x16xf32, #tpu.memory_space<vmem>>, vector<8x16xf32>
    %c0_12 = arith.constant 0 : index
    %c0_13 = arith.constant 0 : index
    %56 = vector.load %arg7[%c0_12, %c0_13] : memref<1x16xf32, #tpu.memory_space<vmem>>, vector<1x16xf32>
    %57 = vector.extract_strided_slice %54 {offsets = [0, 0], sizes = [8, 1], strides = [1, 1]} : vector<8x8xf32> to vector<8x1xf32>
    %58 = vector.extract_strided_slice %55 {offsets = [0, 0], sizes = [1, 16], strides = [1, 1]} : vector<8x16xf32> to vector<1x16xf32>
    %59 = vector.broadcast %57 : vector<8x1xf32> to vector<8x16xf32>
    %60 = vector.broadcast %58 : vector<1x16xf32> to vector<8x16xf32>
    %61 = arith.mulf %59, %60 : vector<8x16xf32>
    %62 = vector.broadcast %56 : vector<1x16xf32> to vector<8x16xf32>
    %63 = arith.addf %61, %62 : vector<8x16xf32>
    %64 = vector.extract_strided_slice %54 {offsets = [0, 1], sizes = [8, 1], strides = [1, 1]} : vector<8x8xf32> to vector<8x1xf32>
    %65 = vector.extract_strided_slice %55 {offsets = [1, 0], sizes = [1, 16], strides = [1, 1]} : vector<8x16xf32> to vector<1x16xf32>
    %66 = vector.broadcast %64 : vector<8x1xf32> to vector<8x16xf32>
    %67 = vector.broadcast %65 : vector<1x16xf32> to vector<8x16xf32>
    %68 = arith.mulf %66, %67 : vector<8x16xf32>
    %69 = arith.addf %63, %68 : vector<8x16xf32>
    %70 = vector.extract_strided_slice %54 {offsets = [0, 2], sizes = [8, 1], strides = [1, 1]} : vector<8x8xf32> to vector<8x1xf32>
    %71 = vector.extract_strided_slice %55 {offsets = [2, 0], sizes = [1, 16], strides = [1, 1]} : vector<8x16xf32> to vector<1x16xf32>
    %72 = vector.broadcast %70 : vector<8x1xf32> to vector<8x16xf32>
    %73 = vector.broadcast %71 : vector<1x16xf32> to vector<8x16xf32>
    %74 = arith.mulf %72, %73 : vector<8x16xf32>
    %75 = arith.addf %69, %74 : vector<8x16xf32>
    %76 = vector.extract_strided_slice %54 {offsets = [0, 3], sizes = [8, 1], strides = [1, 1]} : vector<8x8xf32> to vector<8x1xf32>
    %77 = vector.extract_strided_slice %55 {offsets = [3, 0], sizes = [1, 16], strides = [1, 1]} : vector<8x16xf32> to vector<1x16xf32>
    %78 = vector.broadcast %76 : vector<8x1xf32> to vector<8x16xf32>
    %79 = vector.broadcast %77 : vector<1x16xf32> to vector<8x16xf32>
    %80 = arith.mulf %78, %79 : vector<8x16xf32>
    %81 = arith.addf %75, %80 : vector<8x16xf32>
    %82 = vector.extract_strided_slice %54 {offsets = [0, 4], sizes = [8, 1], strides = [1, 1]} : vector<8x8xf32> to vector<8x1xf32>
    %83 = vector.extract_strided_slice %55 {offsets = [4, 0], sizes = [1, 16], strides = [1, 1]} : vector<8x16xf32> to vector<1x16xf32>
    %84 = vector.broadcast %82 : vector<8x1xf32> to vector<8x16xf32>
    %85 = vector.broadcast %83 : vector<1x16xf32> to vector<8x16xf32>
    %86 = arith.mulf %84, %85 : vector<8x16xf32>
    %87 = arith.addf %81, %86 : vector<8x16xf32>
    %88 = vector.extract_strided_slice %54 {offsets = [0, 5], sizes = [8, 1], strides = [1, 1]} : vector<8x8xf32> to vector<8x1xf32>
    %89 = vector.extract_strided_slice %55 {offsets = [5, 0], sizes = [1, 16], strides = [1, 1]} : vector<8x16xf32> to vector<1x16xf32>
    %90 = vector.broadcast %88 : vector<8x1xf32> to vector<8x16xf32>
    %91 = vector.broadcast %89 : vector<1x16xf32> to vector<8x16xf32>
    %92 = arith.mulf %90, %91 : vector<8x16xf32>
    %93 = arith.addf %87, %92 : vector<8x16xf32>
    %94 = vector.extract_strided_slice %54 {offsets = [0, 6], sizes = [8, 1], strides = [1, 1]} : vector<8x8xf32> to vector<8x1xf32>
    %95 = vector.extract_strided_slice %55 {offsets = [6, 0], sizes = [1, 16], strides = [1, 1]} : vector<8x16xf32> to vector<1x16xf32>
    %96 = vector.broadcast %94 : vector<8x1xf32> to vector<8x16xf32>
    %97 = vector.broadcast %95 : vector<1x16xf32> to vector<8x16xf32>
    %98 = arith.mulf %96, %97 : vector<8x16xf32>
    %99 = arith.addf %93, %98 : vector<8x16xf32>
    %100 = vector.extract_strided_slice %54 {offsets = [0, 7], sizes = [8, 1], strides = [1, 1]} : vector<8x8xf32> to vector<8x1xf32>
    %101 = vector.extract_strided_slice %55 {offsets = [7, 0], sizes = [1, 16], strides = [1, 1]} : vector<8x16xf32> to vector<1x16xf32>
    %102 = vector.broadcast %100 : vector<8x1xf32> to vector<8x16xf32>
    %103 = vector.broadcast %101 : vector<1x16xf32> to vector<8x16xf32>
    %104 = arith.mulf %102, %103 : vector<8x16xf32>
    %105 = arith.addf %99, %104 : vector<8x16xf32>
    %cst_14 = arith.constant 4.000000e-01 : f32
    %106 = vector.broadcast %cst_14 : f32 to vector<8x16xf32>
    %107 = arith.mulf %106, %105 : vector<8x16xf32>
    %108 = arith.maximumf %105, %107 : vector<8x16xf32>
    %c0_15 = arith.constant 0 : index
    %c0_16 = arith.constant 0 : index
    %109 = vector.load %arg8[%c0_15, %c0_16] : memref<16x32xf32, #tpu.memory_space<vmem>>, vector<16x32xf32>
    %c0_17 = arith.constant 0 : index
    %c0_18 = arith.constant 0 : index
    %110 = vector.load %arg9[%c0_17, %c0_18] : memref<1x32xf32, #tpu.memory_space<vmem>>, vector<1x32xf32>
    %111 = vector.extract_strided_slice %108 {offsets = [0, 0], sizes = [8, 1], strides = [1, 1]} : vector<8x16xf32> to vector<8x1xf32>
    %112 = vector.extract_strided_slice %109 {offsets = [0, 0], sizes = [1, 32], strides = [1, 1]} : vector<16x32xf32> to vector<1x32xf32>
    %113 = vector.broadcast %111 : vector<8x1xf32> to vector<8x32xf32>
    %114 = vector.broadcast %112 : vector<1x32xf32> to vector<8x32xf32>
    %115 = arith.mulf %113, %114 : vector<8x32xf32>
    %116 = vector.broadcast %110 : vector<1x32xf32> to vector<8x32xf32>
    %117 = arith.addf %115, %116 : vector<8x32xf32>
    %118 = vector.extract_strided_slice %108 {offsets = [0, 1], sizes = [8, 1], strides = [1, 1]} : vector<8x16xf32> to vector<8x1xf32>
    %119 = vector.extract_strided_slice %109 {offsets = [1, 0], sizes = [1, 32], strides = [1, 1]} : vector<16x32xf32> to vector<1x32xf32>
    %120 = vector.broadcast %118 : vector<8x1xf32> to vector<8x32xf32>
    %121 = vector.broadcast %119 : vector<1x32xf32> to vector<8x32xf32>
    %122 = arith.mulf %120, %121 : vector<8x32xf32>
    %123 = arith.addf %117, %122 : vector<8x32xf32>
    %124 = vector.extract_strided_slice %108 {offsets = [0, 2], sizes = [8, 1], strides = [1, 1]} : vector<8x16xf32> to vector<8x1xf32>
    %125 = vector.extract_strided_slice %109 {offsets = [2, 0], sizes = [1, 32], strides = [1, 1]} : vector<16x32xf32> to vector<1x32xf32>
    %126 = vector.broadcast %124 : vector<8x1xf32> to vector<8x32xf32>
    %127 = vector.broadcast %125 : vector<1x32xf32> to vector<8x32xf32>
    %128 = arith.mulf %126, %127 : vector<8x32xf32>
    %129 = arith.addf %123, %128 : vector<8x32xf32>
    %130 = vector.extract_strided_slice %108 {offsets = [0, 3], sizes = [8, 1], strides = [1, 1]} : vector<8x16xf32> to vector<8x1xf32>
    %131 = vector.extract_strided_slice %109 {offsets = [3, 0], sizes = [1, 32], strides = [1, 1]} : vector<16x32xf32> to vector<1x32xf32>
    %132 = vector.broadcast %130 : vector<8x1xf32> to vector<8x32xf32>
    %133 = vector.broadcast %131 : vector<1x32xf32> to vector<8x32xf32>
    %134 = arith.mulf %132, %133 : vector<8x32xf32>
    %135 = arith.addf %129, %134 : vector<8x32xf32>
    %136 = vector.extract_strided_slice %108 {offsets = [0, 4], sizes = [8, 1], strides = [1, 1]} : vector<8x16xf32> to vector<8x1xf32>
    %137 = vector.extract_strided_slice %109 {offsets = [4, 0], sizes = [1, 32], strides = [1, 1]} : vector<16x32xf32> to vector<1x32xf32>
    %138 = vector.broadcast %136 : vector<8x1xf32> to vector<8x32xf32>
    %139 = vector.broadcast %137 : vector<1x32xf32> to vector<8x32xf32>
    %140 = arith.mulf %138, %139 : vector<8x32xf32>
    %141 = arith.addf %135, %140 : vector<8x32xf32>
    %142 = vector.extract_strided_slice %108 {offsets = [0, 5], sizes = [8, 1], strides = [1, 1]} : vector<8x16xf32> to vector<8x1xf32>
    %143 = vector.extract_strided_slice %109 {offsets = [5, 0], sizes = [1, 32], strides = [1, 1]} : vector<16x32xf32> to vector<1x32xf32>
    %144 = vector.broadcast %142 : vector<8x1xf32> to vector<8x32xf32>
    %145 = vector.broadcast %143 : vector<1x32xf32> to vector<8x32xf32>
    %146 = arith.mulf %144, %145 : vector<8x32xf32>
    %147 = arith.addf %141, %146 : vector<8x32xf32>
    %148 = vector.extract_strided_slice %108 {offsets = [0, 6], sizes = [8, 1], strides = [1, 1]} : vector<8x16xf32> to vector<8x1xf32>
    %149 = vector.extract_strided_slice %109 {offsets = [6, 0], sizes = [1, 32], strides = [1, 1]} : vector<16x32xf32> to vector<1x32xf32>
    %150 = vector.broadcast %148 : vector<8x1xf32> to vector<8x32xf32>
    %151 = vector.broadcast %149 : vector<1x32xf32> to vector<8x32xf32>
    %152 = arith.mulf %150, %151 : vector<8x32xf32>
    %153 = arith.addf %147, %152 : vector<8x32xf32>
    %154 = vector.extract_strided_slice %108 {offsets = [0, 7], sizes = [8, 1], strides = [1, 1]} : vector<8x16xf32> to vector<8x1xf32>
    %155 = vector.extract_strided_slice %109 {offsets = [7, 0], sizes = [1, 32], strides = [1, 1]} : vector<16x32xf32> to vector<1x32xf32>
    %156 = vector.broadcast %154 : vector<8x1xf32> to vector<8x32xf32>
    %157 = vector.broadcast %155 : vector<1x32xf32> to vector<8x32xf32>
    %158 = arith.mulf %156, %157 : vector<8x32xf32>
    %159 = arith.addf %153, %158 : vector<8x32xf32>
    %160 = vector.extract_strided_slice %108 {offsets = [0, 8], sizes = [8, 1], strides = [1, 1]} : vector<8x16xf32> to vector<8x1xf32>
    %161 = vector.extract_strided_slice %109 {offsets = [8, 0], sizes = [1, 32], strides = [1, 1]} : vector<16x32xf32> to vector<1x32xf32>
    %162 = vector.broadcast %160 : vector<8x1xf32> to vector<8x32xf32>
    %163 = vector.broadcast %161 : vector<1x32xf32> to vector<8x32xf32>
    %164 = arith.mulf %162, %163 : vector<8x32xf32>
    %165 = arith.addf %159, %164 : vector<8x32xf32>
    %166 = vector.extract_strided_slice %108 {offsets = [0, 9], sizes = [8, 1], strides = [1, 1]} : vector<8x16xf32> to vector<8x1xf32>
    %167 = vector.extract_strided_slice %109 {offsets = [9, 0], sizes = [1, 32], strides = [1, 1]} : vector<16x32xf32> to vector<1x32xf32>
    %168 = vector.broadcast %166 : vector<8x1xf32> to vector<8x32xf32>
    %169 = vector.broadcast %167 : vector<1x32xf32> to vector<8x32xf32>
    %170 = arith.mulf %168, %169 : vector<8x32xf32>
    %171 = arith.addf %165, %170 : vector<8x32xf32>
    %172 = vector.extract_strided_slice %108 {offsets = [0, 10], sizes = [8, 1], strides = [1, 1]} : vector<8x16xf32> to vector<8x1xf32>
    %173 = vector.extract_strided_slice %109 {offsets = [10, 0], sizes = [1, 32], strides = [1, 1]} : vector<16x32xf32> to vector<1x32xf32>
    %174 = vector.broadcast %172 : vector<8x1xf32> to vector<8x32xf32>
    %175 = vector.broadcast %173 : vector<1x32xf32> to vector<8x32xf32>
    %176 = arith.mulf %174, %175 : vector<8x32xf32>
    %177 = arith.addf %171, %176 : vector<8x32xf32>
    %178 = vector.extract_strided_slice %108 {offsets = [0, 11], sizes = [8, 1], strides = [1, 1]} : vector<8x16xf32> to vector<8x1xf32>
    %179 = vector.extract_strided_slice %109 {offsets = [11, 0], sizes = [1, 32], strides = [1, 1]} : vector<16x32xf32> to vector<1x32xf32>
    %180 = vector.broadcast %178 : vector<8x1xf32> to vector<8x32xf32>
    %181 = vector.broadcast %179 : vector<1x32xf32> to vector<8x32xf32>
    %182 = arith.mulf %180, %181 : vector<8x32xf32>
    %183 = arith.addf %177, %182 : vector<8x32xf32>
    %184 = vector.extract_strided_slice %108 {offsets = [0, 12], sizes = [8, 1], strides = [1, 1]} : vector<8x16xf32> to vector<8x1xf32>
    %185 = vector.extract_strided_slice %109 {offsets = [12, 0], sizes = [1, 32], strides = [1, 1]} : vector<16x32xf32> to vector<1x32xf32>
    %186 = vector.broadcast %184 : vector<8x1xf32> to vector<8x32xf32>
    %187 = vector.broadcast %185 : vector<1x32xf32> to vector<8x32xf32>
    %188 = arith.mulf %186, %187 : vector<8x32xf32>
    %189 = arith.addf %183, %188 : vector<8x32xf32>
    %190 = vector.extract_strided_slice %108 {offsets = [0, 13], sizes = [8, 1], strides = [1, 1]} : vector<8x16xf32> to vector<8x1xf32>
    %191 = vector.extract_strided_slice %109 {offsets = [13, 0], sizes = [1, 32], strides = [1, 1]} : vector<16x32xf32> to vector<1x32xf32>
    %192 = vector.broadcast %190 : vector<8x1xf32> to vector<8x32xf32>
    %193 = vector.broadcast %191 : vector<1x32xf32> to vector<8x32xf32>
    %194 = arith.mulf %192, %193 : vector<8x32xf32>
    %195 = arith.addf %189, %194 : vector<8x32xf32>
    %196 = vector.extract_strided_slice %108 {offsets = [0, 14], sizes = [8, 1], strides = [1, 1]} : vector<8x16xf32> to vector<8x1xf32>
    %197 = vector.extract_strided_slice %109 {offsets = [14, 0], sizes = [1, 32], strides = [1, 1]} : vector<16x32xf32> to vector<1x32xf32>
    %198 = vector.broadcast %196 : vector<8x1xf32> to vector<8x32xf32>
    %199 = vector.broadcast %197 : vector<1x32xf32> to vector<8x32xf32>
    %200 = arith.mulf %198, %199 : vector<8x32xf32>
    %201 = arith.addf %195, %200 : vector<8x32xf32>
    %202 = vector.extract_strided_slice %108 {offsets = [0, 15], sizes = [8, 1], strides = [1, 1]} : vector<8x16xf32> to vector<8x1xf32>
    %203 = vector.extract_strided_slice %109 {offsets = [15, 0], sizes = [1, 32], strides = [1, 1]} : vector<16x32xf32> to vector<1x32xf32>
    %204 = vector.broadcast %202 : vector<8x1xf32> to vector<8x32xf32>
    %205 = vector.broadcast %203 : vector<1x32xf32> to vector<8x32xf32>
    %206 = arith.mulf %204, %205 : vector<8x32xf32>
    %207 = arith.addf %201, %206 : vector<8x32xf32>
    %cst_19 = arith.constant 4.000000e-01 : f32
    %208 = vector.broadcast %cst_19 : f32 to vector<8x32xf32>
    %209 = arith.mulf %208, %207 : vector<8x32xf32>
    %210 = arith.maximumf %207, %209 : vector<8x32xf32>
    %c0_20 = arith.constant 0 : index
    %c0_21 = arith.constant 0 : index
    %211 = vector.load %arg10[%c0_20, %c0_21] : memref<32x64xf32, #tpu.memory_space<vmem>>, vector<32x64xf32>
    %c0_22 = arith.constant 0 : index
    %c0_23 = arith.constant 0 : index
    %212 = vector.load %arg11[%c0_22, %c0_23] : memref<1x64xf32, #tpu.memory_space<vmem>>, vector<1x64xf32>
    %213 = vector.extract_strided_slice %210 {offsets = [0, 0], sizes = [8, 1], strides = [1, 1]} : vector<8x32xf32> to vector<8x1xf32>
    %214 = vector.extract_strided_slice %211 {offsets = [0, 0], sizes = [1, 64], strides = [1, 1]} : vector<32x64xf32> to vector<1x64xf32>
    %215 = vector.broadcast %213 : vector<8x1xf32> to vector<8x64xf32>
    %216 = vector.broadcast %214 : vector<1x64xf32> to vector<8x64xf32>
    %217 = arith.mulf %215, %216 : vector<8x64xf32>
    %218 = vector.broadcast %212 : vector<1x64xf32> to vector<8x64xf32>
    %219 = arith.addf %217, %218 : vector<8x64xf32>
    %220 = vector.extract_strided_slice %210 {offsets = [0, 1], sizes = [8, 1], strides = [1, 1]} : vector<8x32xf32> to vector<8x1xf32>
    %221 = vector.extract_strided_slice %211 {offsets = [1, 0], sizes = [1, 64], strides = [1, 1]} : vector<32x64xf32> to vector<1x64xf32>
    %222 = vector.broadcast %220 : vector<8x1xf32> to vector<8x64xf32>
    %223 = vector.broadcast %221 : vector<1x64xf32> to vector<8x64xf32>
    %224 = arith.mulf %222, %223 : vector<8x64xf32>
    %225 = arith.addf %219, %224 : vector<8x64xf32>
    %226 = vector.extract_strided_slice %210 {offsets = [0, 2], sizes = [8, 1], strides = [1, 1]} : vector<8x32xf32> to vector<8x1xf32>
    %227 = vector.extract_strided_slice %211 {offsets = [2, 0], sizes = [1, 64], strides = [1, 1]} : vector<32x64xf32> to vector<1x64xf32>
    %228 = vector.broadcast %226 : vector<8x1xf32> to vector<8x64xf32>
    %229 = vector.broadcast %227 : vector<1x64xf32> to vector<8x64xf32>
    %230 = arith.mulf %228, %229 : vector<8x64xf32>
    %231 = arith.addf %225, %230 : vector<8x64xf32>
    %232 = vector.extract_strided_slice %210 {offsets = [0, 3], sizes = [8, 1], strides = [1, 1]} : vector<8x32xf32> to vector<8x1xf32>
    %233 = vector.extract_strided_slice %211 {offsets = [3, 0], sizes = [1, 64], strides = [1, 1]} : vector<32x64xf32> to vector<1x64xf32>
    %234 = vector.broadcast %232 : vector<8x1xf32> to vector<8x64xf32>
    %235 = vector.broadcast %233 : vector<1x64xf32> to vector<8x64xf32>
    %236 = arith.mulf %234, %235 : vector<8x64xf32>
    %237 = arith.addf %231, %236 : vector<8x64xf32>
    %238 = vector.extract_strided_slice %210 {offsets = [0, 4], sizes = [8, 1], strides = [1, 1]} : vector<8x32xf32> to vector<8x1xf32>
    %239 = vector.extract_strided_slice %211 {offsets = [4, 0], sizes = [1, 64], strides = [1, 1]} : vector<32x64xf32> to vector<1x64xf32>
    %240 = vector.broadcast %238 : vector<8x1xf32> to vector<8x64xf32>
    %241 = vector.broadcast %239 : vector<1x64xf32> to vector<8x64xf32>
    %242 = arith.mulf %240, %241 : vector<8x64xf32>
    %243 = arith.addf %237, %242 : vector<8x64xf32>
    %244 = vector.extract_strided_slice %210 {offsets = [0, 5], sizes = [8, 1], strides = [1, 1]} : vector<8x32xf32> to vector<8x1xf32>
    %245 = vector.extract_strided_slice %211 {offsets = [5, 0], sizes = [1, 64], strides = [1, 1]} : vector<32x64xf32> to vector<1x64xf32>
    %246 = vector.broadcast %244 : vector<8x1xf32> to vector<8x64xf32>
    %247 = vector.broadcast %245 : vector<1x64xf32> to vector<8x64xf32>
    %248 = arith.mulf %246, %247 : vector<8x64xf32>
    %249 = arith.addf %243, %248 : vector<8x64xf32>
    %250 = vector.extract_strided_slice %210 {offsets = [0, 6], sizes = [8, 1], strides = [1, 1]} : vector<8x32xf32> to vector<8x1xf32>
    %251 = vector.extract_strided_slice %211 {offsets = [6, 0], sizes = [1, 64], strides = [1, 1]} : vector<32x64xf32> to vector<1x64xf32>
    %252 = vector.broadcast %250 : vector<8x1xf32> to vector<8x64xf32>
    %253 = vector.broadcast %251 : vector<1x64xf32> to vector<8x64xf32>
    %254 = arith.mulf %252, %253 : vector<8x64xf32>
    %255 = arith.addf %249, %254 : vector<8x64xf32>
    %256 = vector.extract_strided_slice %210 {offsets = [0, 7], sizes = [8, 1], strides = [1, 1]} : vector<8x32xf32> to vector<8x1xf32>
    %257 = vector.extract_strided_slice %211 {offsets = [7, 0], sizes = [1, 64], strides = [1, 1]} : vector<32x64xf32> to vector<1x64xf32>
    %258 = vector.broadcast %256 : vector<8x1xf32> to vector<8x64xf32>
    %259 = vector.broadcast %257 : vector<1x64xf32> to vector<8x64xf32>
    %260 = arith.mulf %258, %259 : vector<8x64xf32>
    %261 = arith.addf %255, %260 : vector<8x64xf32>
    %262 = vector.extract_strided_slice %210 {offsets = [0, 8], sizes = [8, 1], strides = [1, 1]} : vector<8x32xf32> to vector<8x1xf32>
    %263 = vector.extract_strided_slice %211 {offsets = [8, 0], sizes = [1, 64], strides = [1, 1]} : vector<32x64xf32> to vector<1x64xf32>
    %264 = vector.broadcast %262 : vector<8x1xf32> to vector<8x64xf32>
    %265 = vector.broadcast %263 : vector<1x64xf32> to vector<8x64xf32>
    %266 = arith.mulf %264, %265 : vector<8x64xf32>
    %267 = arith.addf %261, %266 : vector<8x64xf32>
    %268 = vector.extract_strided_slice %210 {offsets = [0, 9], sizes = [8, 1], strides = [1, 1]} : vector<8x32xf32> to vector<8x1xf32>
    %269 = vector.extract_strided_slice %211 {offsets = [9, 0], sizes = [1, 64], strides = [1, 1]} : vector<32x64xf32> to vector<1x64xf32>
    %270 = vector.broadcast %268 : vector<8x1xf32> to vector<8x64xf32>
    %271 = vector.broadcast %269 : vector<1x64xf32> to vector<8x64xf32>
    %272 = arith.mulf %270, %271 : vector<8x64xf32>
    %273 = arith.addf %267, %272 : vector<8x64xf32>
    %274 = vector.extract_strided_slice %210 {offsets = [0, 10], sizes = [8, 1], strides = [1, 1]} : vector<8x32xf32> to vector<8x1xf32>
    %275 = vector.extract_strided_slice %211 {offsets = [10, 0], sizes = [1, 64], strides = [1, 1]} : vector<32x64xf32> to vector<1x64xf32>
    %276 = vector.broadcast %274 : vector<8x1xf32> to vector<8x64xf32>
    %277 = vector.broadcast %275 : vector<1x64xf32> to vector<8x64xf32>
    %278 = arith.mulf %276, %277 : vector<8x64xf32>
    %279 = arith.addf %273, %278 : vector<8x64xf32>
    %280 = vector.extract_strided_slice %210 {offsets = [0, 11], sizes = [8, 1], strides = [1, 1]} : vector<8x32xf32> to vector<8x1xf32>
    %281 = vector.extract_strided_slice %211 {offsets = [11, 0], sizes = [1, 64], strides = [1, 1]} : vector<32x64xf32> to vector<1x64xf32>
    %282 = vector.broadcast %280 : vector<8x1xf32> to vector<8x64xf32>
    %283 = vector.broadcast %281 : vector<1x64xf32> to vector<8x64xf32>
    %284 = arith.mulf %282, %283 : vector<8x64xf32>
    %285 = arith.addf %279, %284 : vector<8x64xf32>
    %286 = vector.extract_strided_slice %210 {offsets = [0, 12], sizes = [8, 1], strides = [1, 1]} : vector<8x32xf32> to vector<8x1xf32>
    %287 = vector.extract_strided_slice %211 {offsets = [12, 0], sizes = [1, 64], strides = [1, 1]} : vector<32x64xf32> to vector<1x64xf32>
    %288 = vector.broadcast %286 : vector<8x1xf32> to vector<8x64xf32>
    %289 = vector.broadcast %287 : vector<1x64xf32> to vector<8x64xf32>
    %290 = arith.mulf %288, %289 : vector<8x64xf32>
    %291 = arith.addf %285, %290 : vector<8x64xf32>
    %292 = vector.extract_strided_slice %210 {offsets = [0, 13], sizes = [8, 1], strides = [1, 1]} : vector<8x32xf32> to vector<8x1xf32>
    %293 = vector.extract_strided_slice %211 {offsets = [13, 0], sizes = [1, 64], strides = [1, 1]} : vector<32x64xf32> to vector<1x64xf32>
    %294 = vector.broadcast %292 : vector<8x1xf32> to vector<8x64xf32>
    %295 = vector.broadcast %293 : vector<1x64xf32> to vector<8x64xf32>
    %296 = arith.mulf %294, %295 : vector<8x64xf32>
    %297 = arith.addf %291, %296 : vector<8x64xf32>
    %298 = vector.extract_strided_slice %210 {offsets = [0, 14], sizes = [8, 1], strides = [1, 1]} : vector<8x32xf32> to vector<8x1xf32>
    %299 = vector.extract_strided_slice %211 {offsets = [14, 0], sizes = [1, 64], strides = [1, 1]} : vector<32x64xf32> to vector<1x64xf32>
    %300 = vector.broadcast %298 : vector<8x1xf32> to vector<8x64xf32>
    %301 = vector.broadcast %299 : vector<1x64xf32> to vector<8x64xf32>
    %302 = arith.mulf %300, %301 : vector<8x64xf32>
    %303 = arith.addf %297, %302 : vector<8x64xf32>
    %304 = vector.extract_strided_slice %210 {offsets = [0, 15], sizes = [8, 1], strides = [1, 1]} : vector<8x32xf32> to vector<8x1xf32>
    %305 = vector.extract_strided_slice %211 {offsets = [15, 0], sizes = [1, 64], strides = [1, 1]} : vector<32x64xf32> to vector<1x64xf32>
    %306 = vector.broadcast %304 : vector<8x1xf32> to vector<8x64xf32>
    %307 = vector.broadcast %305 : vector<1x64xf32> to vector<8x64xf32>
    %308 = arith.mulf %306, %307 : vector<8x64xf32>
    %309 = arith.addf %303, %308 : vector<8x64xf32>
    %310 = vector.extract_strided_slice %210 {offsets = [0, 16], sizes = [8, 1], strides = [1, 1]} : vector<8x32xf32> to vector<8x1xf32>
    %311 = vector.extract_strided_slice %211 {offsets = [16, 0], sizes = [1, 64], strides = [1, 1]} : vector<32x64xf32> to vector<1x64xf32>
    %312 = vector.broadcast %310 : vector<8x1xf32> to vector<8x64xf32>
    %313 = vector.broadcast %311 : vector<1x64xf32> to vector<8x64xf32>
    %314 = arith.mulf %312, %313 : vector<8x64xf32>
    %315 = arith.addf %309, %314 : vector<8x64xf32>
    %316 = vector.extract_strided_slice %210 {offsets = [0, 17], sizes = [8, 1], strides = [1, 1]} : vector<8x32xf32> to vector<8x1xf32>
    %317 = vector.extract_strided_slice %211 {offsets = [17, 0], sizes = [1, 64], strides = [1, 1]} : vector<32x64xf32> to vector<1x64xf32>
    %318 = vector.broadcast %316 : vector<8x1xf32> to vector<8x64xf32>
    %319 = vector.broadcast %317 : vector<1x64xf32> to vector<8x64xf32>
    %320 = arith.mulf %318, %319 : vector<8x64xf32>
    %321 = arith.addf %315, %320 : vector<8x64xf32>
    %322 = vector.extract_strided_slice %210 {offsets = [0, 18], sizes = [8, 1], strides = [1, 1]} : vector<8x32xf32> to vector<8x1xf32>
    %323 = vector.extract_strided_slice %211 {offsets = [18, 0], sizes = [1, 64], strides = [1, 1]} : vector<32x64xf32> to vector<1x64xf32>
    %324 = vector.broadcast %322 : vector<8x1xf32> to vector<8x64xf32>
    %325 = vector.broadcast %323 : vector<1x64xf32> to vector<8x64xf32>
    %326 = arith.mulf %324, %325 : vector<8x64xf32>
    %327 = arith.addf %321, %326 : vector<8x64xf32>
    %328 = vector.extract_strided_slice %210 {offsets = [0, 19], sizes = [8, 1], strides = [1, 1]} : vector<8x32xf32> to vector<8x1xf32>
    %329 = vector.extract_strided_slice %211 {offsets = [19, 0], sizes = [1, 64], strides = [1, 1]} : vector<32x64xf32> to vector<1x64xf32>
    %330 = vector.broadcast %328 : vector<8x1xf32> to vector<8x64xf32>
    %331 = vector.broadcast %329 : vector<1x64xf32> to vector<8x64xf32>
    %332 = arith.mulf %330, %331 : vector<8x64xf32>
    %333 = arith.addf %327, %332 : vector<8x64xf32>
    %334 = vector.extract_strided_slice %210 {offsets = [0, 20], sizes = [8, 1], strides = [1, 1]} : vector<8x32xf32> to vector<8x1xf32>
    %335 = vector.extract_strided_slice %211 {offsets = [20, 0], sizes = [1, 64], strides = [1, 1]} : vector<32x64xf32> to vector<1x64xf32>
    %336 = vector.broadcast %334 : vector<8x1xf32> to vector<8x64xf32>
    %337 = vector.broadcast %335 : vector<1x64xf32> to vector<8x64xf32>
    %338 = arith.mulf %336, %337 : vector<8x64xf32>
    %339 = arith.addf %333, %338 : vector<8x64xf32>
    %340 = vector.extract_strided_slice %210 {offsets = [0, 21], sizes = [8, 1], strides = [1, 1]} : vector<8x32xf32> to vector<8x1xf32>
    %341 = vector.extract_strided_slice %211 {offsets = [21, 0], sizes = [1, 64], strides = [1, 1]} : vector<32x64xf32> to vector<1x64xf32>
    %342 = vector.broadcast %340 : vector<8x1xf32> to vector<8x64xf32>
    %343 = vector.broadcast %341 : vector<1x64xf32> to vector<8x64xf32>
    %344 = arith.mulf %342, %343 : vector<8x64xf32>
    %345 = arith.addf %339, %344 : vector<8x64xf32>
    %346 = vector.extract_strided_slice %210 {offsets = [0, 22], sizes = [8, 1], strides = [1, 1]} : vector<8x32xf32> to vector<8x1xf32>
    %347 = vector.extract_strided_slice %211 {offsets = [22, 0], sizes = [1, 64], strides = [1, 1]} : vector<32x64xf32> to vector<1x64xf32>
    %348 = vector.broadcast %346 : vector<8x1xf32> to vector<8x64xf32>
    %349 = vector.broadcast %347 : vector<1x64xf32> to vector<8x64xf32>
    %350 = arith.mulf %348, %349 : vector<8x64xf32>
    %351 = arith.addf %345, %350 : vector<8x64xf32>
    %352 = vector.extract_strided_slice %210 {offsets = [0, 23], sizes = [8, 1], strides = [1, 1]} : vector<8x32xf32> to vector<8x1xf32>
    %353 = vector.extract_strided_slice %211 {offsets = [23, 0], sizes = [1, 64], strides = [1, 1]} : vector<32x64xf32> to vector<1x64xf32>
    %354 = vector.broadcast %352 : vector<8x1xf32> to vector<8x64xf32>
    %355 = vector.broadcast %353 : vector<1x64xf32> to vector<8x64xf32>
    %356 = arith.mulf %354, %355 : vector<8x64xf32>
    %357 = arith.addf %351, %356 : vector<8x64xf32>
    %358 = vector.extract_strided_slice %210 {offsets = [0, 24], sizes = [8, 1], strides = [1, 1]} : vector<8x32xf32> to vector<8x1xf32>
    %359 = vector.extract_strided_slice %211 {offsets = [24, 0], sizes = [1, 64], strides = [1, 1]} : vector<32x64xf32> to vector<1x64xf32>
    %360 = vector.broadcast %358 : vector<8x1xf32> to vector<8x64xf32>
    %361 = vector.broadcast %359 : vector<1x64xf32> to vector<8x64xf32>
    %362 = arith.mulf %360, %361 : vector<8x64xf32>
    %363 = arith.addf %357, %362 : vector<8x64xf32>
    %364 = vector.extract_strided_slice %210 {offsets = [0, 25], sizes = [8, 1], strides = [1, 1]} : vector<8x32xf32> to vector<8x1xf32>
    %365 = vector.extract_strided_slice %211 {offsets = [25, 0], sizes = [1, 64], strides = [1, 1]} : vector<32x64xf32> to vector<1x64xf32>
    %366 = vector.broadcast %364 : vector<8x1xf32> to vector<8x64xf32>
    %367 = vector.broadcast %365 : vector<1x64xf32> to vector<8x64xf32>
    %368 = arith.mulf %366, %367 : vector<8x64xf32>
    %369 = arith.addf %363, %368 : vector<8x64xf32>
    %370 = vector.extract_strided_slice %210 {offsets = [0, 26], sizes = [8, 1], strides = [1, 1]} : vector<8x32xf32> to vector<8x1xf32>
    %371 = vector.extract_strided_slice %211 {offsets = [26, 0], sizes = [1, 64], strides = [1, 1]} : vector<32x64xf32> to vector<1x64xf32>
    %372 = vector.broadcast %370 : vector<8x1xf32> to vector<8x64xf32>
    %373 = vector.broadcast %371 : vector<1x64xf32> to vector<8x64xf32>
    %374 = arith.mulf %372, %373 : vector<8x64xf32>
    %375 = arith.addf %369, %374 : vector<8x64xf32>
    %376 = vector.extract_strided_slice %210 {offsets = [0, 27], sizes = [8, 1], strides = [1, 1]} : vector<8x32xf32> to vector<8x1xf32>
    %377 = vector.extract_strided_slice %211 {offsets = [27, 0], sizes = [1, 64], strides = [1, 1]} : vector<32x64xf32> to vector<1x64xf32>
    %378 = vector.broadcast %376 : vector<8x1xf32> to vector<8x64xf32>
    %379 = vector.broadcast %377 : vector<1x64xf32> to vector<8x64xf32>
    %380 = arith.mulf %378, %379 : vector<8x64xf32>
    %381 = arith.addf %375, %380 : vector<8x64xf32>
    %382 = vector.extract_strided_slice %210 {offsets = [0, 28], sizes = [8, 1], strides = [1, 1]} : vector<8x32xf32> to vector<8x1xf32>
    %383 = vector.extract_strided_slice %211 {offsets = [28, 0], sizes = [1, 64], strides = [1, 1]} : vector<32x64xf32> to vector<1x64xf32>
    %384 = vector.broadcast %382 : vector<8x1xf32> to vector<8x64xf32>
    %385 = vector.broadcast %383 : vector<1x64xf32> to vector<8x64xf32>
    %386 = arith.mulf %384, %385 : vector<8x64xf32>
    %387 = arith.addf %381, %386 : vector<8x64xf32>
    %388 = vector.extract_strided_slice %210 {offsets = [0, 29], sizes = [8, 1], strides = [1, 1]} : vector<8x32xf32> to vector<8x1xf32>
    %389 = vector.extract_strided_slice %211 {offsets = [29, 0], sizes = [1, 64], strides = [1, 1]} : vector<32x64xf32> to vector<1x64xf32>
    %390 = vector.broadcast %388 : vector<8x1xf32> to vector<8x64xf32>
    %391 = vector.broadcast %389 : vector<1x64xf32> to vector<8x64xf32>
    %392 = arith.mulf %390, %391 : vector<8x64xf32>
    %393 = arith.addf %387, %392 : vector<8x64xf32>
    %394 = vector.extract_strided_slice %210 {offsets = [0, 30], sizes = [8, 1], strides = [1, 1]} : vector<8x32xf32> to vector<8x1xf32>
    %395 = vector.extract_strided_slice %211 {offsets = [30, 0], sizes = [1, 64], strides = [1, 1]} : vector<32x64xf32> to vector<1x64xf32>
    %396 = vector.broadcast %394 : vector<8x1xf32> to vector<8x64xf32>
    %397 = vector.broadcast %395 : vector<1x64xf32> to vector<8x64xf32>
    %398 = arith.mulf %396, %397 : vector<8x64xf32>
    %399 = arith.addf %393, %398 : vector<8x64xf32>
    %400 = vector.extract_strided_slice %210 {offsets = [0, 31], sizes = [8, 1], strides = [1, 1]} : vector<8x32xf32> to vector<8x1xf32>
    %401 = vector.extract_strided_slice %211 {offsets = [31, 0], sizes = [1, 64], strides = [1, 1]} : vector<32x64xf32> to vector<1x64xf32>
    %402 = vector.broadcast %400 : vector<8x1xf32> to vector<8x64xf32>
    %403 = vector.broadcast %401 : vector<1x64xf32> to vector<8x64xf32>
    %404 = arith.mulf %402, %403 : vector<8x64xf32>
    %405 = arith.addf %399, %404 : vector<8x64xf32>
    %cst_24 = arith.constant 4.000000e-01 : f32
    %406 = vector.broadcast %cst_24 : f32 to vector<8x64xf32>
    %407 = arith.mulf %406, %405 : vector<8x64xf32>
    %408 = arith.maximumf %405, %407 : vector<8x64xf32>
    %409 = arith.truncf %408 : vector<8x64xf32> to vector<8x64xbf16>
    %c0_25 = arith.constant 0 : index
    %c0_26 = arith.constant 0 : index
    %410 = vector.load %arg12[%c0_25, %c0_26] : memref<64x128xbf16, #tpu.memory_space<vmem>>, vector<64x128xbf16>
    %cst_27 = arith.constant dense<0.000000e+00> : vector<8x128xf32>
    %411 = tpu.matmul %409, %410, %cst_27 {dimension_numbers = #tpu.dot_dimension_numbers<[1], [0], [0], [1], [0, 0, 1, 1], [], []>} : vector<8x64xbf16>, vector<64x128xbf16>, vector<8x128xf32> -> vector<8x128xf32>
    %c0_28 = arith.constant 0 : index
    %c0_29 = arith.constant 0 : index
    %412 = vector.load %arg13[%c0_28, %c0_29] : memref<1x128xf32, #tpu.memory_space<vmem>>, vector<1x128xf32>
    %413 = vector.broadcast %412 : vector<1x128xf32> to vector<8x128xf32>
    %414 = arith.addf %411, %413 : vector<8x128xf32>
    %cst_30 = arith.constant 4.000000e-01 : f32
    %415 = vector.broadcast %cst_30 : f32 to vector<8x128xf32>
    %416 = arith.mulf %415, %414 : vector<8x128xf32>
    %417 = arith.maximumf %414, %416 : vector<8x128xf32>
    %418 = arith.truncf %417 : vector<8x128xf32> to vector<8x128xbf16>
    %c0_31 = arith.constant 0 : index
    %c0_32 = arith.constant 0 : index
    %419 = vector.load %arg14[%c0_31, %c0_32] : memref<128x256xbf16, #tpu.memory_space<vmem>>, vector<128x256xbf16>
    %cst_33 = arith.constant dense<0.000000e+00> : vector<8x256xf32>
    %420 = tpu.matmul %418, %419, %cst_33 {dimension_numbers = #tpu.dot_dimension_numbers<[1], [0], [0], [1], [0, 0, 1, 1], [], []>} : vector<8x128xbf16>, vector<128x256xbf16>, vector<8x256xf32> -> vector<8x256xf32>
    %c0_34 = arith.constant 0 : index
    %c0_35 = arith.constant 0 : index
    %421 = vector.load %arg15[%c0_34, %c0_35] : memref<1x256xf32, #tpu.memory_space<vmem>>, vector<1x256xf32>
    %422 = vector.broadcast %421 : vector<1x256xf32> to vector<8x256xf32>
    %423 = arith.addf %420, %422 : vector<8x256xf32>
    %cst_36 = arith.constant 4.000000e-01 : f32
    %424 = vector.broadcast %cst_36 : f32 to vector<8x256xf32>
    %425 = arith.mulf %424, %423 : vector<8x256xf32>
    %426 = arith.maximumf %423, %425 : vector<8x256xf32>
    %427 = arith.truncf %426 : vector<8x256xf32> to vector<8x256xbf16>
    %c0_37 = arith.constant 0 : index
    %c0_38 = arith.constant 0 : index
    %428 = vector.load %arg16[%c0_37, %c0_38] : memref<256x512xbf16, #tpu.memory_space<vmem>>, vector<256x512xbf16>
    %cst_39 = arith.constant dense<0.000000e+00> : vector<8x512xf32>
    %429 = tpu.matmul %427, %428, %cst_39 {dimension_numbers = #tpu.dot_dimension_numbers<[1], [0], [0], [1], [0, 0, 1, 1], [], []>} : vector<8x256xbf16>, vector<256x512xbf16>, vector<8x512xf32> -> vector<8x512xf32>
    %c0_40 = arith.constant 0 : index
    %c0_41 = arith.constant 0 : index
    %430 = vector.load %arg17[%c0_40, %c0_41] : memref<1x512xf32, #tpu.memory_space<vmem>>, vector<1x512xf32>
    %431 = vector.broadcast %430 : vector<1x512xf32> to vector<8x512xf32>
    %432 = arith.addf %429, %431 : vector<8x512xf32>
    %cst_42 = arith.constant 4.000000e-01 : f32
    %433 = vector.broadcast %cst_42 : f32 to vector<8x512xf32>
    %434 = arith.mulf %433, %432 : vector<8x512xf32>
    %435 = arith.maximumf %432, %434 : vector<8x512xf32>
    %436 = arith.truncf %435 : vector<8x512xf32> to vector<8x512xbf16>
    %c0_43 = arith.constant 0 : index
    %c0_44 = arith.constant 0 : index
    %437 = vector.load %arg18[%c0_43, %c0_44] : memref<512x640xbf16, #tpu.memory_space<vmem>>, vector<512x640xbf16>
    %cst_45 = arith.constant dense<0.000000e+00> : vector<8x640xf32>
    %438 = tpu.matmul %436, %437, %cst_45 {dimension_numbers = #tpu.dot_dimension_numbers<[1], [0], [0], [1], [0, 0, 1, 1], [], []>} : vector<8x512xbf16>, vector<512x640xbf16>, vector<8x640xf32> -> vector<8x640xf32>
    %c0_46 = arith.constant 0 : index
    %c0_47 = arith.constant 0 : index
    %439 = vector.load %arg19[%c0_46, %c0_47] : memref<1x640xf32, #tpu.memory_space<vmem>>, vector<1x640xf32>
    %440 = vector.broadcast %439 : vector<1x640xf32> to vector<8x640xf32>
    %441 = arith.addf %438, %440 : vector<8x640xf32>
    %cst_48 = arith.constant 4.000000e-01 : f32
    %442 = vector.broadcast %cst_48 : f32 to vector<8x640xf32>
    %443 = arith.mulf %442, %441 : vector<8x640xf32>
    %444 = arith.maximumf %441, %443 : vector<8x640xf32>
    %c0_49 = arith.constant 0 : index
    %c0_50 = arith.constant 0 : index
    %445 = vector.load %arg20[%c0_49, %c0_50] : memref<8x640xf32, #tpu.memory_space<vmem>>, vector<8x640xf32>
    tpu.vector_store %arg20[%c0_49, %c0_50], %444 {strides = array<i32>} : memref<8x640xf32, #tpu.memory_space<vmem>>, vector<8x640xf32>,
    return
  }
  func.func @transform_0(%arg0: i32) -> (i32, i32) {
    %c0_i32 = arith.constant 0 : i32
    %c0_i32_0 = arith.constant 0 : i32
    return %arg0, %c0_i32 : i32, i32
  }
  func.func @transform_1(%arg0: i32) -> (i32, i32) {
    %c0_i32 = arith.constant 0 : i32
    %c0_i32_0 = arith.constant 0 : i32
    %c0_i32_1 = arith.constant 0 : i32
    return %c0_i32, %c0_i32_0 : i32, i32
  }
  func.func @transform_2(%arg0: i32) -> (i32, i32) {
    %c0_i32 = arith.constant 0 : i32
    %c0_i32_0 = arith.constant 0 : i32
    %c0_i32_1 = arith.constant 0 : i32
    return %c0_i32, %c0_i32_0 : i32, i32
  }
  func.func @transform_3(%arg0: i32) -> (i32, i32) {
    %c0_i32 = arith.constant 0 : i32
    %c0_i32_0 = arith.constant 0 : i32
    %c0_i32_1 = arith.constant 0 : i32
    return %c0_i32, %c0_i32_0 : i32, i32
  }
  func.func @transform_4(%arg0: i32) -> (i32, i32) {
    %c0_i32 = arith.constant 0 : i32
    %c0_i32_0 = arith.constant 0 : i32
    %c0_i32_1 = arith.constant 0 : i32
    return %c0_i32, %c0_i32_0 : i32, i32
  }
  func.func @transform_5(%arg0: i32) -> (i32, i32) {
    %c0_i32 = arith.constant 0 : i32
    %c0_i32_0 = arith.constant 0 : i32
    %c0_i32_1 = arith.constant 0 : i32
    return %c0_i32, %c0_i32_0 : i32, i32
  }
  func.func @transform_6(%arg0: i32) -> (i32, i32) {
    %c0_i32 = arith.constant 0 : i32
    %c0_i32_0 = arith.constant 0 : i32
    %c0_i32_1 = arith.constant 0 : i32
    return %c0_i32, %c0_i32_0 : i32, i32
  }
  func.func @transform_7(%arg0: i32) -> (i32, i32) {
    %c0_i32 = arith.constant 0 : i32
    %c0_i32_0 = arith.constant 0 : i32
    %c0_i32_1 = arith.constant 0 : i32
    return %c0_i32, %c0_i32_0 : i32, i32
  }
  func.func @transform_8(%arg0: i32) -> (i32, i32) {
    %c0_i32 = arith.constant 0 : i32
    %c0_i32_0 = arith.constant 0 : i32
    %c0_i32_1 = arith.constant 0 : i32
    return %c0_i32, %c0_i32_0 : i32, i32
  }
  func.func @transform_9(%arg0: i32) -> (i32, i32) {
    %c0_i32 = arith.constant 0 : i32
    %c0_i32_0 = arith.constant 0 : i32
    %c0_i32_1 = arith.constant 0 : i32
    return %c0_i32, %c0_i32_0 : i32, i32
  }
  func.func @transform_10(%arg0: i32) -> (i32, i32) {
    %c0_i32 = arith.constant 0 : i32
    %c0_i32_0 = arith.constant 0 : i32
    %c0_i32_1 = arith.constant 0 : i32
    return %c0_i32, %c0_i32_0 : i32, i32
  }
  func.func @transform_11(%arg0: i32) -> (i32, i32) {
    %c0_i32 = arith.constant 0 : i32
    %c0_i32_0 = arith.constant 0 : i32
    %c0_i32_1 = arith.constant 0 : i32
    return %c0_i32, %c0_i32_0 : i32, i32
  }
  func.func @transform_12(%arg0: i32) -> (i32, i32) {
    %c0_i32 = arith.constant 0 : i32
    %c0_i32_0 = arith.constant 0 : i32
    %c0_i32_1 = arith.constant 0 : i32
    return %c0_i32, %c0_i32_0 : i32, i32
  }
  func.func @transform_13(%arg0: i32) -> (i32, i32) {
    %c0_i32 = arith.constant 0 : i32
    %c0_i32_0 = arith.constant 0 : i32
    %c0_i32_1 = arith.constant 0 : i32
    return %c0_i32, %c0_i32_0 : i32, i32
  }
  func.func @transform_14(%arg0: i32) -> (i32, i32) {
    %c0_i32 = arith.constant 0 : i32
    %c0_i32_0 = arith.constant 0 : i32
    %c0_i32_1 = arith.constant 0 : i32
    return %c0_i32, %c0_i32_0 : i32, i32
  }
  func.func @transform_15(%arg0: i32) -> (i32, i32) {
    %c0_i32 = arith.constant 0 : i32
    %c0_i32_0 = arith.constant 0 : i32
    %c0_i32_1 = arith.constant 0 : i32
    return %c0_i32, %c0_i32_0 : i32, i32
  }
  func.func @transform_16(%arg0: i32) -> (i32, i32) {
    %c0_i32 = arith.constant 0 : i32
    %c0_i32_0 = arith.constant 0 : i32
    %c0_i32_1 = arith.constant 0 : i32
    return %c0_i32, %c0_i32_0 : i32, i32
  }
  func.func @transform_17(%arg0: i32) -> (i32, i32) {
    %c0_i32 = arith.constant 0 : i32
    %c0_i32_0 = arith.constant 0 : i32
    %c0_i32_1 = arith.constant 0 : i32
    return %c0_i32, %c0_i32_0 : i32, i32
  }
  func.func @transform_18(%arg0: i32) -> (i32, i32) {
    %c0_i32 = arith.constant 0 : i32
    %c0_i32_0 = arith.constant 0 : i32
    %c0_i32_1 = arith.constant 0 : i32
    return %c0_i32, %c0_i32_0 : i32, i32
  }
  func.func @transform_19(%arg0: i32) -> (i32, i32) {
    %c0_i32 = arith.constant 0 : i32
    %c0_i32_0 = arith.constant 0 : i32
    return %arg0, %c0_i32 : i32, i32
  }
}

</mosaic_0001>

<bundles_post_ra>
// kernel: tpu_custom_call.1
= control target key start
LH: loop header
LB: loop body
LE: loop exit
PB: predicated region body
PF: predicated region fallthrough
CT: control target
= control target key end

     0   :  { %s5871_s0 = inlined_call_operand.vmem [shape: f32[16,3], index: 0, kind: input, shape index: {}]   ;;  %s5872_s1 = inlined_call_operand.hbm [shape: f32[3,4], index: 1, kind: input, shape index: {}]   ;;  %s5873_s2 = inlined_call_operand.hbm [shape: f32[1,4], index: 2, kind: input, shape index: {}]   ;;  %s5874_s3 = inlined_call_operand.hbm [shape: f32[4,8], index: 3, kind: input, shape index: {}]   ;;  %s5875_s4 = inlined_call_operand.hbm [shape: f32[1,8], index: 4, kind: input, shape index: {}]   ;;  %s5876_s5 = inlined_call_operand.hbm [shape: f32[8,16], index: 5, kind: input, shape index: {}]   ;;  %s5877_s6 = inlined_call_operand.hbm [shape: f32[1,16], index: 6, kind: input, shape index: {}]   ;;  %s5878_s7 = inlined_call_operand.vmem [shape: f32[16,32], index: 7, kind: input, shape index: {}]   ;;  %s5879_s8 = inlined_call_operand.hbm [shape: f32[1,32], index: 8, kind: input, shape index: {}]   ;;  %s5880_s9 = inlined_call_operand.vmem [shape: f32[32,64], index: 9, kind: input, shape index: {}]   ;;  %s5881_s10 = inlined_call_operand.hbm [shape: f32[1,64], index: 10, kind: input, shape index: {}]   ;;  %s5882_s11 = inlined_call_operand.hbm [shape: bf16[64,128], index: 11, kind: input, shape index: {}]   ;;  %s5883_s12 = inlined_call_operand.vmem [shape: f32[1,128], index: 12, kind: input, shape index: {}]   ;;  %s5884_s13 = inlined_call_operand.hbm [shape: bf16[128,256], index: 13, kind: input, shape index: {}]   ;;  %s5885_s14 = inlined_call_operand.vmem [shape: f32[1,256], index: 14, kind: input, shape index: {}]   ;;  %s5886_s15 = inlined_call_operand.hbm [shape: bf16[256,512], index: 15, kind: input, shape index: {}]   ;;  %s5887_s16 = inlined_call_operand.vmem [shape: f32[1,512], index: 16, kind: input, shape index: {}]   ;;  %s5888_s17 = inlined_call_operand.hbm [shape: bf16[512,640], index: 17, kind: input, shape index: {}]   ;;  %s5889_s18 = inlined_call_operand.vmem [shape: f32[1,640], index: 18, kind: input, shape index: {}]   ;;  %s5890_s19 = inlined_call_operand.hbm [shape: f32[16,640], index: 19, kind: output, shape index: {}]  }
   0x1   :  { %5909 = sst [smem:[#allocation39_spill]] %s5871_s0 }
   0x2   :  { %5910 = sst [smem:[#allocation40_spill]] %s5872_s1 }
   0x3   :  { %5911 = sst [smem:[#allocation41_spill]] %s5873_s2 }
   0x4   :  { %5912 = sst [smem:[#allocation42_spill]] %s5874_s3 }
   0x5   :  { %5913 = sst [smem:[#allocation43_spill]] %s5875_s4 }
   0x6   :  { %5914 = sst [smem:[#allocation44_spill]] %s5877_s6 }
   0x7   :  { %5915 = sst [smem:[#allocation45_spill]] %s5881_s10 }
   0x8   :  { %5916 = sst [smem:[#allocation46_spill]] %s5885_s14 }
   0x9   :  { %5917 = sst [smem:[#allocation47_spill]] %s5887_s16 }
   0xa   :  { %5918 = sst [smem:[#allocation48_spill]] %s5889_s18 }
   0xb   :  { %5919 = sst [smem:[#allocation49_spill]] %s5890_s19 }
   0xc   :  { %24 = vsyncpa [#allocation3], 0 }
   0xd   :  { %25 = vsyncpa [#allocation6], 0 }
   0xe   :  { %26 = vsyncpa [#allocation9], 0 }
   0xf   :  { %27 = vsyncpa [#allocation12], 0 }
  0x10   :  { %28 = vsyncpa [#allocation15], 0 }
  0x11   :  { %29 = vsyncpa [#allocation18], 0 }
  0x12   :  { %30 = vsyncpa [#allocation21], 0 }
  0x13   :  { %31 = vsyncpa [#allocation4], 0 }
  0x14   :  { %33 = vsyncpa [#allocation4 + $0x1], 0  ;;  %s5245_s0 = smov 0   ;;  %s5247_s30 = smov 0  }
  0x15   :  { %s5249_s20 = smov 0   ;;  %s5251_s21 = smov 0  }
  0x16 LB: > { %5920 = sst [smem:[#allocation31_spill]] %s5076_s0  ;;  %s5266_s1 = sadd.s32 4294967295, %s5088_s21   ;;  %s5088_s21 = sphi %s5251_s21, %s5968_s21   ;;  %s5084_s20 = sphi %s5249_s20, %s5971_s20   ;;  %s5080_s30 = sphi %s5247_s30, %s5970_s30   ;;  %s5076_s0 = sphi %s5245_s0, %s5969_s0  }
  0x17   : > { %5921 = sst [smem:[#allocation32_spill]] %s5080_s30  ;;  %s3691_s22 = sadd.s32 4294967294, %s5088_s21  }
  0x18   : > { %5922 = sst [smem:[#allocation33_spill]] %s5084_s20  ;;  %s5270_s2 = sadd.s32 1, %s5088_s21  }
  0x19   : > { %5923 = sst [smem:[#allocation34_spill]] %s5088_s21  ;;  %s450_s23 = sadd.s32 1, %s5084_s20 }
  0x1a   : > { %5924 = sst [smem:[#allocation35_spill]] %s5270_s2  ;;  %s447_s24 = ssub.s32 %s5088_s21, %s5270_s2 }
  0x1b   : > { %p460_p0 = scmp.ne.s32.totalorder %s5084_s20, %s5080_s30  ;;  %p448_p1 = scmp.eq.s32.totalorder %s447_s24, 0 }
  0x1c   : > { %p461_p2 = scmp.eq.s32.totalorder %s5266_s1, 1  ;;  %p466_p3 = scmp.ne.s32.totalorder %s5080_s30, %s5076_s0 }
  0x1d   : > { %p467_p4 = scmp.eq.s32.totalorder %s3691_s22, 1  ;;  %p3692_p7 = scmp.ge.s32.totalorder %s5088_s21, 1 }
  0x1e   : > { %s5281_s25 = scalar_select %p448_p1, %s5084_s20, %s450_s23  }
  0x1f   : > { %p5283_p5 = por %p461_p2, %p460_p0  ;;  %p5287_p6 = por %p467_p4, %p466_p3 }
  0x20   : > { %5925 = sst [smem:[#allocation36_spill]] %s5281_s25  ;;  %p474_p8 = scmp.lt.s32.totalorder %s5088_s21, 3 }
  0x21   : > { %s5926_s3 = scalar_select %p5283_p5, 1, 0 }
  0x22   : > { %s5928_s26 = scalar_select %p5287_p6, 1, 0 }
  0x23   : > { %5927 = sst [smem:[#allocation37_spill]] %s5926_s3  ;;  %p5903_p9 = scmp.eq.s32.totalorder %s5266_s1, 0 }
  0x24   : > { %5929 = sst [smem:[#allocation38_spill]] %s5928_s26  ;;  %p5294_p10 = pnand %p3692_p7, %p474_p8 }
  0x25   : > { %s5090_s28 = smov [#allocation5]   ;;  %s5091_s22 = smov [#allocation8]  }
  0x26   : > { %s5930_s27 = scalar_select %p5294_p10, 1, 0 }
  0x27   : > { %s498_s29 = sshll.u32 %s5090_s28, 4  ;;  %p4099_p11 = pneg %p5294_p10  ;;  %s499_s29 = int_to_ptr.vmem [resolvable:$true] %s498_s29 }
  0x28   : > { %s520_s23 = sshll.u32 %s5091_s22, 4  ;;  %s5092_s25 = smov [#allocation11]   ;;  %s5306_s23 = int_to_ptr.vmem [resolvable:$true] %s520_s23 }
  0x29   : > { %p5302_p12 = pnand %p5903_p9, %p4099_p11  ;;  %s542_s20 = sshll.u32 %s5092_s25, 4  ;;  %s5308_s20 = int_to_ptr.vmem [resolvable:$true] %s542_s20 }
  0x2a   : > { %s5932_s28 = sld [smem:[#allocation41_spill]] }
  0x2b   : > { %p5318_p0 = pneg %p5302_p12 }
  0x30   : > { %s4662_s0 = scalar_lea.hbm %s5932_s28, 16 }
  0x31   : > { %p4663_p13 = scmp.ne.s32.totalorder %s5932_s28, %s4662_s0  ;;  %p4669_p3 = scmp.lt.u32.totalorder %s4662_s0, %s5932_s28 }
  0x33   : > { %p4665_p1 = pnand %p5318_p0, %p4663_p13 }
  0x35   : > { %p4666_p2 = pneg %p4665_p1 }
  0x37   : > { %p4671_p4 = pnand %p4669_p3, %p4666_p2 }
  0x39   : > { %4674 = shalt.err (!%p4671_p4)
}
  0x3a   : > { %s4675_s2 = scalar_lea.vmem %s499_s29, 16  ;;  %s4682_s19 = scalar_lea.vmem %s499_s29, 32 }
  0x3b   : > { %p4676_p7 = scmp.ne.s32.totalorder %s499_s29, %s4675_s2  ;;  %p4683_p9 = scmp.lt.s32.totalorder %s499_s29, %s499_s29 }
  0x3c   : > { %p4684_p6 = scmp.lt.s32.totalorder %s4682_s19, %s4675_s2 }
  0x3d   : > { %p4678_p8 = pnand %p4676_p7, %p5318_p0 }
  0x3e   : > { %p4685_p5 = por %p4684_p6, %p4683_p9 }
  0x3f   : > { %p4679_p11 = pneg %p4678_p8 }
  0x41   : > { %p4686_p10 = pnand %p4685_p5, %p4679_p11 }
  0x43   : > { %4689 = shalt.err (!%p4686_p10)
}
  0x44   : > { %4105 = dma.hbm_to_vmem [thread:$0]  (!%p5302_p12), %s5932_s28, 16, %s499_s29, [#allocation6]  }
  0x45   : > { %s5934_s4 = sld [smem:[#allocation43_spill]] }
  0x4b   : > { %s4690_s25 = scalar_lea.hbm %s5934_s4, 16 }
  0x4c   : > { %p4691_p13 = scmp.ne.s32.totalorder %s5934_s4, %s4690_s25  ;;  %p4697_p5 = scmp.lt.u32.totalorder %s4690_s25, %s5934_s4 }
  0x4e   : > { %p4693_p1 = pnand %p4691_p13, %p5318_p0 }
  0x50   : > { %p4694_p6 = pneg %p4693_p1 }
  0x52   : > { %p4699_p9 = pnand %p4697_p5, %p4694_p6 }
  0x54   : > { %4702 = shalt.err (!%p4699_p9)
}
  0x55   : > { %s4703_s29 = scalar_lea.vmem %s5306_s23, 16  ;;  %s4710_s18 = scalar_lea.vmem %s5306_s23, 32 }
  0x56   : > { %p4704_p10 = scmp.ne.s32.totalorder %s5306_s23, %s4703_s29  ;;  %p4711_p4 = scmp.lt.s32.totalorder %s5306_s23, %s5306_s23 }
  0x57   : > { %p4712_p7 = scmp.lt.s32.totalorder %s4710_s18, %s4703_s29 }
  0x58   : > { %p4706_p2 = pnand %p4704_p10, %p5318_p0 }
  0x59   : > { %p4713_p8 = por %p4712_p7, %p4711_p4 }
  0x5a   : > { %p4707_p3 = pneg %p4706_p2 }
  0x5c   : > { %p4714_p11 = pnand %p4713_p8, %p4707_p3 }
  0x5e   : > { %4717 = shalt.err (!%p4714_p11)
}
  0x5f   : > { %4111 = dma.hbm_to_vmem [thread:$0]  (!%p5302_p12), %s5934_s4, 16, %s5306_s23, [#allocation9]  }
  0x60   : > { %s5935_s6 = sld [smem:[#allocation44_spill]] }
  0x66   : > { %s4718_s3 = scalar_lea.hbm %s5935_s6, 16 }
  0x67   : > { %p4719_p13 = scmp.ne.s32.totalorder %s5935_s6, %s4718_s3  ;;  %p4725_p5 = scmp.lt.u32.totalorder %s4718_s3, %s5935_s6 }
  0x69   : > { %p4721_p1 = pnand %p4719_p13, %p5318_p0 }
  0x6b   : > { %p4722_p6 = pneg %p4721_p1 }
  0x6d   : > { %p4727_p9 = pnand %p4725_p5, %p4722_p6 }
  0x6f   : > { %4730 = shalt.err (!%p4727_p9)
}
  0x70   : > { %s4731_s23 = scalar_lea.vmem %s5308_s20, 16  ;;  %s4738_s18 = scalar_lea.vmem %s5308_s20, 32 }
  0x71   : > { %p4732_p10 = scmp.ne.s32.totalorder %s5308_s20, %s4731_s23  ;;  %p4739_p4 = scmp.lt.s32.totalorder %s5308_s20, %s5308_s20 }
  0x72   : > { %p4740_p7 = scmp.lt.s32.totalorder %s4738_s18, %s4731_s23 }
  0x73   : > { %p4734_p2 = pnand %p4732_p10, %p5318_p0 }
  0x74   : > { %p4741_p8 = por %p4740_p7, %p4739_p4 }
  0x75   : > { %p4735_p3 = pneg %p4734_p2 }
  0x77   : > { %p4742_p11 = pnand %p4741_p8, %p4735_p3 }
  0x79   : > { %4745 = shalt.err (!%p4742_p11)
}
  0x7a   : > { %4117 = dma.hbm_to_vmem [thread:$0]  (!%p5302_p12), %s5935_s6, 16, %s5308_s20, [#allocation12]  }
  0x7b   : > { %s5093_s26 = smov [#allocation14]   ;;  %s5094_s3 = smov [#allocation17]  }
  0x7c   : > { %s570_s0 = sshll.u32 %s5093_s26, 4  ;;  %s596_s25 = sshll.u32 %s5094_s3, 4  ;;  %s571_s0 = int_to_ptr.vmem [resolvable:$true] %s570_s0  ;;  %s597_s25 = int_to_ptr.vmem [resolvable:$true] %s596_s25 }
  0x7d   : > { %s5936_s10 = sld [smem:[#allocation45_spill]] }
  0x83   : > { %s4746_s29 = scalar_lea.hbm %s5936_s10, 16 }
  0x84   : > { %p4747_p13 = scmp.ne.s32.totalorder %s5936_s10, %s4746_s29  ;;  %p4753_p5 = scmp.lt.u32.totalorder %s4746_s29, %s5936_s10 }
  0x86   : > { %p4749_p1 = pnand %p4747_p13, %p5318_p0 }
  0x88   : > { %p4750_p6 = pneg %p4749_p1 }
  0x8a   : > { %p4755_p9 = pnand %p4753_p5, %p4750_p6 }
  0x8c   : > { %4758 = shalt.err (!%p4755_p9)
}
  0x8d   : > { %s4759_s20 = scalar_lea.vmem %s571_s0, 16  ;;  %s4766_s21 = scalar_lea.vmem %s571_s0, 32 }
  0x8e   : > { %p4760_p10 = scmp.ne.s32.totalorder %s571_s0, %s4759_s20  ;;  %p4767_p4 = scmp.lt.s32.totalorder %s571_s0, %s571_s0 }
  0x8f   : > { %p4768_p7 = scmp.lt.s32.totalorder %s4766_s21, %s4759_s20 }
  0x90   : > { %p4762_p2 = pnand %p4760_p10, %p5318_p0 }
  0x91   : > { %p4769_p8 = por %p4768_p7, %p4767_p4 }
  0x92   : > { %p4763_p3 = pneg %p4762_p2 }
  0x94   : > { %p4770_p11 = pnand %p4769_p8, %p4763_p3 }
  0x96   : > { %4773 = shalt.err (!%p4770_p11)
}
  0x97   : > { %4123 = dma.hbm_to_vmem [thread:$0]  (!%p5302_p12), %s5936_s10, 16, %s571_s0, [#allocation15]  }
  0x98   : > { %s4774_s19 = scalar_lea.hbm %s5884_s13, 2048 }
  0x99   : > { %p4775_p13 = scmp.ne.s32.totalorder %s5884_s13, %s4774_s19  ;;  %p4781_p5 = scmp.lt.u32.totalorder %s4774_s19, %s5884_s13 }
  0x9b   : > { %p4777_p1 = pnand %p4775_p13, %p5318_p0 }
  0x9d   : > { %p4778_p6 = pneg %p4777_p1 }
  0x9f   : > { %p4783_p9 = pnand %p4781_p5, %p4778_p6 }
  0xa1   : > { %4786 = shalt.err (!%p4783_p9)
}
  0xa2   : > { %s4787_s20 = scalar_lea.vmem %s597_s25, 2048  ;;  %p4795_p4 = scmp.lt.s32.totalorder %s597_s25, %s597_s25 }
  0xa3   : > { %p4788_p10 = scmp.ne.s32.totalorder %s597_s25, %s4787_s20  ;;  %p4796_p7 = scmp.lt.s32.totalorder %s4787_s20, %s4787_s20 }
  0xa5   : > { %p4790_p2 = pnand %p4788_p10, %p5318_p0  ;;  %p4797_p8 = por %p4796_p7, %p4795_p4 }
  0xa7   : > { %p4791_p3 = pneg %p4790_p2 }
  0xa9   : > { %p4798_p11 = pnand %p4797_p8, %p4791_p3 }
  0xab   : > { %4801 = shalt.err (!%p4798_p11)
}
  0xac   : > { %s5095_s0 = smov 128   ;;  %s5096_s21 = smov 8  }
  0xad   : > { %4129 = dma.hbm_to_vmem [thread:$0]  (!%p5302_p12), %s5884_s13, 2048, %s597_s25, [#allocation18], %s5095_s0, %s5095_s0, %s5096_s21  }
  0xae   : > { %s5097_s4 = smov [#allocation2]   ;;  %s5098_s19 = smov [#allocation7]  }
  0xaf   : > { %s487_s2 = sshll.u32 %s5097_s4, 4  ;;  %s509_s29 = sshll.u32 %s5098_s19, 4  ;;  %s488_s2 = int_to_ptr.vmem [resolvable:$true] %s487_s2  ;;  %s510_s29 = int_to_ptr.vmem [resolvable:$true] %s509_s29 }
  0xb0   : > { %s5937_s30 = sld [smem:[#allocation40_spill]] }
  0xb6   : > { %s5938_s6 = smov %s5937_s30  ;;  %s4802_s20 = scalar_lea.hbm %s5937_s30, 64 }
  0xb7   : > { %p4803_p13 = scmp.ne.s32.totalorder %s5938_s6, %s4802_s20  ;;  %p4809_p5 = scmp.lt.u32.totalorder %s4802_s20, %s5938_s6 }
  0xb9   : > { %p4805_p1 = pnand %p4803_p13, %p5318_p0 }
  0xbb   : > { %p4806_p6 = pneg %p4805_p1 }
  0xbd   : > { %p4811_p9 = pnand %p4809_p5, %p4806_p6 }
  0xbf   : > { %4814 = shalt.err (!%p4811_p9)
}
  0xc0   : > { %s4815_s25 = scalar_lea.vmem %s488_s2, 64  ;;  %p4823_p4 = scmp.lt.s32.totalorder %s488_s2, %s488_s2 }
  0xc1   : > { %p4816_p10 = scmp.ne.s32.totalorder %s488_s2, %s4815_s25  ;;  %p4824_p7 = scmp.lt.s32.totalorder %s4815_s25, %s4815_s25 }
  0xc3   : > { %p4818_p2 = pnand %p4816_p10, %p5318_p0  ;;  %p4825_p8 = por %p4824_p7, %p4823_p4 }
  0xc5   : > { %p4819_p3 = pneg %p4818_p2 }
  0xc7   : > { %p4826_p11 = pnand %p4825_p8, %p4819_p3 }
  0xc9   : > { %4829 = shalt.err (!%p4826_p11)
}
  0xca   : > { %4102 = dma.hbm_to_vmem [thread:$0]  (!%p5302_p12), %s5938_s6, 64, %s488_s2, [#allocation3]  }
  0xcb   : > { %s5939_s0 = sld [smem:[#allocation42_spill]] }
  0xd1   : > { %s5940_s26 = smov %s5939_s0  ;;  %s4830_s21 = scalar_lea.hbm %s5939_s0, 64 }
  0xd2   : > { %p4831_p13 = scmp.ne.s32.totalorder %s5940_s26, %s4830_s21  ;;  %p4837_p5 = scmp.lt.u32.totalorder %s4830_s21, %s5940_s26 }
  0xd4   : > { %p4833_p1 = pnand %p4831_p13, %p5318_p0 }
  0xd6   : > { %p4834_p6 = pneg %p4833_p1 }
  0xd8   : > { %p4839_p9 = pnand %p4837_p5, %p4834_p6 }
  0xda   : > { %4842 = shalt.err (!%p4839_p9)
}
  0xdb   : > { %s4843_s18 = scalar_lea.vmem %s510_s29, 64  ;;  %p4851_p4 = scmp.lt.s32.totalorder %s510_s29, %s510_s29 }
  0xdc   : > { %p4844_p10 = scmp.ne.s32.totalorder %s510_s29, %s4843_s18  ;;  %p4852_p7 = scmp.lt.s32.totalorder %s4843_s18, %s4843_s18 }
  0xde   : > { %p4846_p2 = pnand %p4844_p10, %p5318_p0  ;;  %p4853_p8 = por %p4852_p7, %p4851_p4 }
  0xe0   : > { %p4847_p3 = pneg %p4846_p2 }
  0xe2   : > { %p4854_p11 = pnand %p4853_p8, %p4847_p3 }
  0xe4   : > { %4857 = shalt.err (!%p4854_p11)
}
  0xe5   : > { %4108 = dma.hbm_to_vmem [thread:$0]  (!%p5302_p12), %s5940_s26, 64, %s510_s29, [#allocation6]  }
  0xe6   : > { %s5099_s20 = smov [#allocation10]   ;;  %s5100_s10 = smov [#allocation13]  }
  0xe7   : > { %s531_s25 = sshll.u32 %s5099_s20, 4  ;;  %s556_s28 = sshll.u32 %s5100_s10, 4  ;;  %s532_s25 = int_to_ptr.vmem [resolvable:$true] %s531_s25  ;;  %s557_s28 = int_to_ptr.vmem [resolvable:$true] %s556_s28 }
  0xe8   : > { %s4858_s0 = scalar_lea.hbm %s5876_s5, 128 }
  0xe9   : > { %p4859_p13 = scmp.ne.s32.totalorder %s5876_s5, %s4858_s0  ;;  %p4865_p5 = scmp.lt.u32.totalorder %s4858_s0, %s5876_s5 }
  0xeb   : > { %p4861_p1 = pnand %p4859_p13, %p5318_p0 }
  0xed   : > { %p4862_p6 = pneg %p4861_p1 }
  0xef   : > { %p4867_p9 = pnand %p4865_p5, %p4862_p6 }
  0xf1   : > { %4870 = shalt.err (!%p4867_p9)
}
  0xf2   : > { %s4871_s29 = scalar_lea.vmem %s532_s25, 128  ;;  %p4879_p4 = scmp.lt.s32.totalorder %s532_s25, %s532_s25 }
  0xf3   : > { %p4872_p10 = scmp.ne.s32.totalorder %s532_s25, %s4871_s29  ;;  %p4880_p7 = scmp.lt.s32.totalorder %s4871_s29, %s4871_s29 }
  0xf5   : > { %p4874_p2 = pnand %p4872_p10, %p5318_p0  ;;  %p4881_p8 = por %p4880_p7, %p4879_p4 }
  0xf7   : > { %p4875_p3 = pneg %p4874_p2 }
  0xf9   : > { %p4882_p11 = pnand %p4881_p8, %p4875_p3 }
  0xfb   : > { %4885 = shalt.err (!%p4882_p11)
}
  0xfc   : > { %4114 = dma.hbm_to_vmem [thread:$0]  (!%p5302_p12), %s5876_s5, 128, %s532_s25, [#allocation9]  }
  0xfd   : > { %s4886_s20 = scalar_lea.hbm %s5879_s8, 16 }
  0xfe   : > { %p4887_p13 = scmp.ne.s32.totalorder %s5879_s8, %s4886_s20  ;;  %p4893_p5 = scmp.lt.u32.totalorder %s4886_s20, %s5879_s8 }
 0x100   : > { %p4889_p1 = pnand %p4887_p13, %p5318_p0 }
 0x102   : > { %p4890_p6 = pneg %p4889_p1 }
 0x104   : > { %p4895_p9 = pnand %p4893_p5, %p4890_p6 }
 0x106   : > { %4898 = shalt.err (!%p4895_p9)
}
 0x107   : > { %s4899_s21 = scalar_lea.vmem %s557_s28, 16  ;;  %s4906_s25 = scalar_lea.vmem %s557_s28, 32 }
 0x108   : > { %p4900_p10 = scmp.ne.s32.totalorder %s557_s28, %s4899_s21  ;;  %p4907_p4 = scmp.lt.s32.totalorder %s557_s28, %s557_s28 }
 0x109   : > { %p4908_p7 = scmp.lt.s32.totalorder %s4906_s25, %s4899_s21 }
 0x10a   : > { %p4902_p2 = pnand %p4900_p10, %p5318_p0 }
 0x10b   : > { %p4909_p8 = por %p4908_p7, %p4907_p4 }
 0x10c   : > { %p4903_p3 = pneg %p4902_p2 }
 0x10e   : > { %p4910_p11 = pnand %p4909_p8, %p4903_p3 }
 0x110   : > { %4913 = shalt.err (!%p4910_p11)
}
 0x111   : > { %4120 = dma.hbm_to_vmem [thread:$0]  (!%p5302_p12), %s5879_s8, 16, %s557_s28, [#allocation12]  }
 0x112   : > { %s5101_s19 = smov [#allocation16]   ;;  %s4914_s2 = scalar_lea.hbm %s5882_s11, 512 }
 0x113   : > { %s580_s29 = sshll.u32 %s5101_s19, 4  ;;  %p4915_p13 = scmp.ne.s32.totalorder %s5882_s11, %s4914_s2  ;;  %s581_s29 = int_to_ptr.vmem [resolvable:$true] %s580_s29 }
 0x114   : > { %p4921_p5 = scmp.lt.u32.totalorder %s4914_s2, %s5882_s11 }
 0x115   : > { %p4917_p1 = pnand %p4915_p13, %p5318_p0 }
 0x117   : > { %p4918_p6 = pneg %p4917_p1 }
 0x119   : > { %p4923_p9 = pnand %p4921_p5, %p4918_p6 }
 0x11b   : > { %4926 = shalt.err (!%p4923_p9)
}
 0x11c   : > { %s4927_s28 = scalar_lea.vmem %s581_s29, 512  ;;  %p4935_p4 = scmp.lt.s32.totalorder %s581_s29, %s581_s29 }
 0x11d   : > { %p4928_p10 = scmp.ne.s32.totalorder %s581_s29, %s4927_s28  ;;  %p4936_p7 = scmp.lt.s32.totalorder %s4927_s28, %s4927_s28 }
 0x11f   : > { %p4930_p2 = pnand %p4928_p10, %p5318_p0  ;;  %p4937_p8 = por %p4936_p7, %p4935_p4 }
 0x121   : > { %p4931_p3 = pneg %p4930_p2 }
 0x123   : > { %p4938_p11 = pnand %p4937_p8, %p4931_p3 }
 0x125   : > { %4941 = shalt.err (!%p4938_p11)
}
 0x126   : > { %s5102_s16 = smov 64   ;;  %s5103_s0 = smov 4  }
 0x127   : > { %4126 = dma.hbm_to_vmem [thread:$0]  (!%p5302_p12), %s5882_s11, 512, %s581_s29, [#allocation15], %s5102_s16, %s5102_s16, %s5103_s0  }
 0x128   : > { %s5104_s3 = smov [#allocation19]   ;;  %s4942_s18 = scalar_lea.hbm %s5886_s15, 8192 }
 0x129   : > { %s612_s4 = sshll.u32 %s5104_s3, 4  ;;  %p4943_p13 = scmp.ne.s32.totalorder %s5886_s15, %s4942_s18  ;;  %s613_s4 = int_to_ptr.vmem [resolvable:$true] %s612_s4 }
 0x12a   : > { %p4949_p5 = scmp.lt.u32.totalorder %s4942_s18, %s5886_s15 }
 0x12b   : > { %p4945_p1 = pnand %p4943_p13, %p5318_p0 }
 0x12d   : > { %p4946_p6 = pneg %p4945_p1 }
 0x12f   : > { %p4951_p9 = pnand %p4949_p5, %p4946_p6 }
 0x131   : > { %4954 = shalt.err (!%p4951_p9)
}
 0x132   : > { %s4955_s29 = scalar_lea.vmem %s613_s4, 8192  ;;  %p4963_p4 = scmp.lt.s32.totalorder %s613_s4, %s613_s4 }
 0x133   : > { %p4956_p10 = scmp.ne.s32.totalorder %s613_s4, %s4955_s29  ;;  %p4964_p7 = scmp.lt.s32.totalorder %s4955_s29, %s4955_s29 }
 0x135   : > { %p4958_p2 = pnand %p4956_p10, %p5318_p0  ;;  %p4965_p8 = por %p4964_p7, %p4963_p4 }
 0x137   : > { %p4959_p3 = pneg %p4958_p2 }
 0x139   : > { %p4966_p11 = pnand %p4965_p8, %p4959_p3 }
 0x13b   : > { %4969 = shalt.err (!%p4966_p11)
}
 0x13c   : > { %s5105_s14 = smov 256   ;;  %s5106_s28 = smov 16  }
 0x13d   : > { %4132 = dma.hbm_to_vmem [thread:$0]  (!%p5302_p12), %s5886_s15, 8192, %s613_s4, [#allocation18], %s5105_s14, %s5105_s14, %s5106_s28  }
 0x13e   : > { %s5107_s21 = smov [#allocation20]   ;;  %s4970_s23 = scalar_lea.hbm %s5888_s17, 20480 }
 0x13f   : > { %s628_s25 = sshll.u32 %s5107_s21, 4  ;;  %p4971_p13 = scmp.ne.s32.totalorder %s5888_s17, %s4970_s23  ;;  %s629_s25 = int_to_ptr.vmem [resolvable:$true] %s628_s25 }
 0x140   : > { %p4977_p5 = scmp.lt.u32.totalorder %s4970_s23, %s5888_s17 }
 0x141   : > { %p4973_p1 = pnand %p4971_p13, %p5318_p0 }
 0x143   : > { %p4974_p6 = pneg %p4973_p1 }
 0x145   : > { %p4979_p9 = pnand %p4977_p5, %p4974_p6 }
 0x147   : > { %4982 = shalt.err (!%p4979_p9)
}
 0x148   : > { %s4983_s4 = scalar_lea.vmem %s629_s25, 20480  ;;  %p4991_p4 = scmp.lt.s32.totalorder %s629_s25, %s629_s25 }
 0x149   : > { %p4984_p10 = scmp.ne.s32.totalorder %s629_s25, %s4983_s4  ;;  %p4992_p7 = scmp.lt.s32.totalorder %s4983_s4, %s4983_s4 }
 0x14b   : > { %p4986_p2 = pnand %p4984_p10, %p5318_p0  ;;  %p4993_p8 = por %p4992_p7, %p4991_p4 }
 0x14d   : > { %p4987_p3 = pneg %p4986_p2 }
 0x14f   : > { %p4994_p11 = pnand %p4993_p8, %p4987_p3 }
 0x151   : > { %4997 = shalt.err (!%p4994_p11)
}
 0x152   : > { %s5108_s10 = smov 320   ;;  %s5109_s29 = smov 20  }
 0x153   : > { %4135 = dma.hbm_to_vmem [thread:$0]  (!%p5302_p12), %s5888_s17, 20480, %s629_s25, [#allocation21], %s5108_s10, %s5108_s10, %s5109_s29  }
 0x154   : > { %p5941_p13 = scmp.ne.s32.totalorder %s5930_s27, 0 }
 0x155   : > { %p5942_p1 = scmp.eq.s32.totalorder (!%p5941_p13), %s5266_s1, 0 }
 0x156   : > { %654 = sbr.rel (%p5941_p13) target bundleno = 2247 (0x8c7), region = 96 }
 0x15d   : > { %5043 = dma.done.wait (%p5942_p1), [#allocation3], 64   ;;  %p5943_p0 = pmov %p5942_p1 }
 0x15f   : > { %5045 = vsyncadd (%p5943_p0), [#allocation3], 4294967232  ;;  %p5944_p6 = pmov %p5943_p0 }
 0x160   : > { %p5945_p5 = pmov %p5943_p0 }
 0x161   : > { %5047 = dma.done.wait (%p5944_p6), [#allocation6], 80  }
 0x162   : > { %5049 = vsyncadd (%p5945_p5), [#allocation6], 4294967216  ;;  %p5946_p9 = pmov %p5943_p0 }
 0x163   : > { %p5947_p12 = pmov %p5943_p0 }
 0x164   : > { %5051 = dma.done.wait (%p5946_p9), [#allocation9], 144  }
 0x165   : > { %5053 = vsyncadd (%p5947_p12), [#allocation9], 4294967152  ;;  %p5948_p10 = pmov %p5943_p0 }
 0x166   : > { %p5949_p2 = pmov %p5943_p0 }
 0x167   : > { %5055 = dma.done.wait (%p5948_p10), [#allocation12], 32  }
 0x168   : > { %5057 = vsyncadd (%p5949_p2), [#allocation12], 4294967264  ;;  %p5950_p3 = pmov %p5943_p0 }
 0x169   : > { %p5951_p4 = pmov %p5943_p0 }
 0x16a   : > { %5059 = dma.done.wait (%p5950_p3), [#allocation15], 528  }
 0x16b   : > { %5061 = vsyncadd (%p5951_p4), [#allocation15], 4294966768  ;;  %p5952_p7 = pmov %p5943_p0 }
 0x16c   : > { %p5953_p8 = pmov %p5943_p0 }
 0x16d   : > { %5063 = dma.done.wait (%p5952_p7), [#allocation18], 10240  }
 0x16e   : > { %5065 = vsyncadd (%p5953_p8), [#allocation18], 4294957056  ;;  %p5954_p11 = pmov %p5943_p0 }
 0x16f   : > { %p5955_p13 = pmov %p5943_p0 }
 0x170   : > { %5067 = dma.done.wait (%p5954_p11), [#allocation21], 20480  }
 0x171   : > { %5069 = vsyncadd (%p5955_p13), [#allocation21], 4294946816  ;;  %p753_p1 = scmp.lt.s32.totalorder %s5266_s1, 1  ;;  %v5110_v0 = vmov 0   ;;  %v5111_v1 = vmov 2   ;;  %s5956_s0 = sld [smem:[#allocation39_spill]]  ;;  %v766_v4 = vlaneseq }
 0x172   : > { %4251 = vset.pattern.permute.xlu0 %v5110_v0  ;;  %4253 = vset.pattern.permute.xlu1 %v5111_v1  ;;  %v5112_v3 = vmov 1   ;;  %v759_v7 = vld [vmem:[#allocation2] sm:$0x7]  ;;  %v3720_v15 = vld [vmem:[#allocation5] ss:$0 sm:$0xff]  ;;  %v5113_v25 = vmov 3  }
 0x173   : > { %s754_s27 = scalar_select %p753_p1, %s5266_s1, 1  ;;  %1675 = vmatprep.mubr.bf16.mxu1 %v5110_v0  ;;  %v5585_v5 = vshrl.u32 %v766_v4, 7  ;;  %v800_v26 = vld [vmem:[#allocation7] sm:$0xf]  ;;  %v3721_v31 = vld [vmem:[#allocation8] ss:$0 sm:$0xff] }
 0x174   : > { %v5114_v47 = vmov 4   ;;  %v5115_v48 = vmov 7   ;;  %v5116_v49 = vmov 5   ;;  %v5117_v50 = vmov 6   ;;  %v851_v51 = vld [vmem:[#allocation10] sm:$0xff]  ;;  %s5957_s16 = sld [smem:[#allocation46_spill]] }
 0x175   : > { %s3719_s24 = sshll.u32 %s754_s27, 3  ;;  %v5588_v6 = vsub.s32 0, %v5585_v5  ;;  %v5592_v9 = vsub.s32 1, %v5585_v5  ;;  %v5595_v10 = vsub.s32 2, %v5585_v5  ;;  %v5606_v32 = vsub.s32 3, %v5585_v5  ;;  %s5958_s25 = sld [smem:[#allocation47_spill]] }
 0x176   : > { %v3722_v53 = vld [vmem:[#allocation11] ss:$0 sm:$0xff]  ;;  %v5622_v62 = vsub.s32 4, %v5585_v5  ;;  %vm5143_vm0 = vmmov 0   ;;  %vm1488_vm1 = vcmask 523264   ;;  %s5959_s3 = sld [smem:[#allocation32_spill]] }
 0x177   : > { %s756_s21 = scalar_lea.vmem %s5956_s0, %s3719_s24  ;;  %v769_v8 = vrot.slane %v759_v7, %v5588_v6  ;;  %v785_v13 = vrot.slane %v759_v7, %v5592_v9  ;;  %v795_v14 = vrot.slane %v759_v7, %v5595_v10  ;;  %v810_v27 = vrot.slane %v800_v26, %v5588_v6  ;;  %s5960_s18 = sld [smem:[#allocation48_spill]] }
 0x178   : > { %v758_v2 = vld [vmem:[%s756_s21] sm:$0xff]  ;;  %v826_v30 = vrot.slane %v800_v26, %v5592_v9  ;;  %v836_v33 = vrot.slane %v800_v26, %v5595_v10  ;;  %v846_v38 = vrot.slane %v800_v26, %v5606_v32  ;;  %v861_v52 = vrot.slane %v851_v51, %v5588_v6  ;;  %s5961_s4 = sld [smem:[#allocation37_spill]]  ;;  %s4048_s10 = smul.u32 640, %s5266_s1 }
 0x179   : > { %763 = vperm.xlu0 %4251, %v758_v2   ;;  %789 = vperm.xlu1 %4253, %v758_v2   ;;  %v877_v55 = vrot.slane %v851_v51, %v5592_v9  ;;  %v887_v59 = vrot.slane %v851_v51, %v5595_v10  ;;  %v897_v4 = vrot.slane %v851_v51, %v5606_v32  ;;  %v5626_v7 = vsub.s32 5, %v5585_v5  ;;  %s5962_s27 = sld [smem:[#allocation49_spill]]  ;;  %s5144_s1 = smov [#allocation22]  }
 0x17a   : > { %s5002_s0 = sshll.u32 %s5144_s1, 4  ;;  %s5003_s0 = int_to_ptr.vmem [resolvable:$false] %s5002_s0 }
 0x17b   : > { %s5004_s21 = scalar_lea.vmem %s5003_s0, 1280 }
 0x17c   : > { %s750_s2 = sand.u32 1, %s5959_s3  }
 0x17d   : > { %4252 = vset.pattern.permute.xlu0 %v5112_v3  ;;  %4254 = vset.pattern.permute.xlu1 %v5110_v0  ;;  %s4047_s30 = smul.u32 40, %s750_s2  ;;  %s3501_s22 = scalar_lea.sflag [#allocation4], %s750_s2 }
 0x17e   : > { %779 = vperm.xlu0 %4252, %v758_v2   ;;  %p5963_p6 = scmp.ne.s32.totalorder %s5961_s4, 0 }
 0x17f   : > { %s752_s20 = scalar_lea.vmem [#allocation22], %s4047_s30  ;;  %s5827_s24 = scalar_lea.hbm %s5962_s27, %s4048_s10 }
 0x180   : > { %s3515_s29 = sshll.u32 %s752_s20, 4  ;;  %s5829_s29 = int_to_ptr.vmem [resolvable:$true] %s3515_s29 }
 0x181   : > { %p5005_p12 = scmp.lt.s32.totalorder %s5829_s29, %s5003_s0 }
 0x182   : > { %4256 = vset.pattern.permute.xlu0 %v5111_v1 }
 0x1f8   : > { %v764_v11 = vpop.permute.xlu0 %763  ;;  %v790_v16 = vpop.permute.xlu1 %789 }
 0x1f9   : > { %v770_v12 = vmul.f32 %v769_v8, %v764_v11  ;;  %v796_v20 = vmul.f32 %v795_v14, %v790_v16  ;;  %v907_v11 = vrot.slane %v851_v51, %v5622_v62  ;;  %v917_v16 = vrot.slane %v851_v51, %v5626_v7 }
 0x1fb   : > { %v777_v18 = vadd.f32 %v3720_v15, %v770_v12 }
 0x1fd   : > { %v780_v17 = vpop.permute.xlu0 %779 }
 0x1fe   : > { %v786_v19 = vmul.f32 %v785_v13, %v780_v17  ;;  %v5631_v17 = vsub.s32 6, %v5585_v5 }
 0x200   : > { %v787_v21 = vadd.f32 %v786_v19, %v777_v18  ;;  %v5634_v19 = vsub.s32 7, %v5585_v5  ;;  %v5118_v5 = vmov 8  }
 0x202   : > { %v797_v22 = vadd.f32 %v796_v20, %v787_v21 }
 0x204   : > { %v798_v23 = vmul.f32 0.4, %v797_v22 }
 0x206   : > { %v799_v24 = vmax.f32 %v797_v22, %v798_v23  ;;  %v927_v23 = vrot.slane %v851_v51, %v5631_v17 }
 0x208   : > { %830 = vperm.xlu0 %4256, %v799_v24   ;;  %804 = vperm.xlu1 %4254, %v799_v24  }
 0x20c   : > { %4255 = vset.pattern.permute.xlu1 %v5112_v3  ;;  %4259 = vset.pattern.permute.xlu0 %v5112_v3 }
 0x20d   : > { %820 = vperm.xlu1 %4255, %v799_v24  }
 0x211   : > { %4257 = vset.pattern.permute.xlu1 %v5113_v25 }
 0x212   : > { %840 = vperm.xlu1 %4257, %v799_v24   ;;  %v937_v24 = vrot.slane %v851_v51, %v5634_v19  ;;  %v3723_v51 = vld [vmem:[#allocation13] ss:$0 sm:$0xff] }
 0x216   : > { %4258 = vset.pattern.permute.xlu1 %v5110_v0 }
 0x287   : > { %v805_v28 = vpop.permute.xlu1 %804  ;;  %v831_v34 = vpop.permute.xlu0 %830 }
 0x288   : > { %v811_v29 = vmul.f32 %v810_v27, %v805_v28  ;;  %v837_v39 = vmul.f32 %v836_v33, %v831_v34 }
 0x28a   : > { %v818_v36 = vadd.f32 %v3721_v31, %v811_v29 }
 0x28c   : > { %v821_v35 = vpop.permute.xlu1 %820 }
 0x28d   : > { %v827_v37 = vmul.f32 %v826_v30, %v821_v35 }
 0x28f   : > { %v828_v40 = vadd.f32 %v827_v37, %v818_v36  ;;  %v5119_v36 = vmov 11   ;;  %v5120_v37 = vmov 14  }
 0x291   : > { %v838_v41 = vadd.f32 %v837_v39, %v828_v40  ;;  %v841_v42 = vpop.permute.xlu1 %840  ;;  %v5122_v39 = vmov 10   ;;  %v5123_v40 = vmov 12  }
 0x292   : > { %v847_v43 = vmul.f32 %v846_v38, %v841_v42  ;;  %v5121_v38 = vmov 9   ;;  %v5125_v42 = vmov 15  }
 0x294   : > { %v848_v44 = vadd.f32 %v847_v43, %v838_v41  ;;  %v5124_v41 = vmov 13  }
 0x296   : > { %v849_v45 = vmul.f32 0.4, %v848_v44 }
 0x298   : > { %v850_v46 = vmax.f32 %v848_v44, %v849_v45 }
 0x29a   : > { %871 = vperm.xlu0 %4259, %v850_v46   ;;  %855 = vperm.xlu1 %4258, %v850_v46  }
 0x29e   : > { %4262 = vset.pattern.permute.xlu0 %v5114_v47  ;;  %4260 = vset.pattern.permute.xlu1 %v5111_v1 }
 0x29f   : > { %901 = vperm.xlu0 %4262, %v850_v46   ;;  %881 = vperm.xlu1 %4260, %v850_v46  }
 0x2a3   : > { %4265 = vset.pattern.permute.xlu0 %v5115_v48  ;;  %4261 = vset.pattern.permute.xlu1 %v5113_v25 }
 0x2a4   : > { %931 = vperm.xlu0 %4265, %v850_v46   ;;  %891 = vperm.xlu1 %4261, %v850_v46  }
 0x2a8   : > { %4263 = vset.pattern.permute.xlu1 %v5116_v49  ;;  %4268 = vset.pattern.permute.xlu0 %v5111_v1 }
 0x2a9   : > { %911 = vperm.xlu1 %4263, %v850_v46  }
 0x2ad   : > { %4264 = vset.pattern.permute.xlu1 %v5117_v50 }
 0x2ae   : > { %921 = vperm.xlu1 %4264, %v850_v46  }
 0x2b2   : > { %4266 = vset.pattern.permute.xlu1 %v5110_v0 }
 0x319   : > { %v856_v54 = vpop.permute.xlu1 %855  ;;  %v872_v57 = vpop.permute.xlu0 %871 }
 0x31a   : > { %v862_v56 = vmul.f32 %v861_v52, %v856_v54  ;;  %v878_v60 = vmul.f32 %v877_v55, %v872_v57 }
 0x31c   : > { %v869_v58 = vadd.f32 %v3722_v53, %v862_v56 }
 0x31e   : > { %v882_v61 = vpop.permute.xlu1 %881  ;;  %v879_v63 = vadd.f32 %v878_v60, %v869_v58  ;;  %v902_v14 = vpop.permute.xlu0 %901 }
 0x31f   : > { %v888_v2 = vmul.f32 %v887_v59, %v882_v61  ;;  %v908_v18 = vmul.f32 %v907_v11, %v902_v14 }
 0x321   : > { %v889_v12 = vadd.f32 %v888_v2, %v879_v63 }
 0x323   : > { %v892_v8 = vpop.permute.xlu1 %891  ;;  %v932_v26 = vpop.permute.xlu0 %931 }
 0x324   : > { %v898_v13 = vmul.f32 %v897_v4, %v892_v8  ;;  %v938_v30 = vmul.f32 %v937_v24, %v932_v26 }
 0x326   : > { %v899_v15 = vadd.f32 %v898_v13, %v889_v12 }
 0x328   : > { %v912_v20 = vpop.permute.xlu1 %911  ;;  %v909_v21 = vadd.f32 %v908_v18, %v899_v15 }
 0x329   : > { %v918_v22 = vmul.f32 %v917_v16, %v912_v20 }
 0x32b   : > { %v919_v28 = vadd.f32 %v918_v22, %v909_v21  ;;  %v943_v22 = vld [vmem:[%s5878_s7 + $0x8] sm:$0xff] }
 0x32c   : > { %v1039_v24 = vrot.slane %v943_v22, %v5588_v6 }
 0x32d   : > { %v922_v27 = vpop.permute.xlu1 %921 }
 0x32e   : > { %v928_v29 = vmul.f32 %v927_v23, %v922_v27 }
 0x330   : > { %v929_v31 = vadd.f32 %v928_v29, %v919_v28 }
 0x332   : > { %v939_v33 = vadd.f32 %v938_v30, %v929_v31  ;;  %v1049_v30 = vrot.slane %v943_v22, %v5592_v9 }
 0x334   : > { %v940_v34 = vmul.f32 0.4, %v939_v33 }
 0x336   : > { %v941_v35 = vmax.f32 %v939_v33, %v940_v34 }
 0x338   : > { %973 = vperm.xlu0 %4268, %v941_v35   ;;  %947 = vperm.xlu1 %4266, %v941_v35  }
 0x33c   : > { %4271 = vset.pattern.permute.xlu0 %v5116_v49  ;;  %4267 = vset.pattern.permute.xlu1 %v5112_v3 }
 0x33d   : > { %1003 = vperm.xlu0 %4271, %v941_v35   ;;  %963 = vperm.xlu1 %4267, %v941_v35  }
 0x341   : > { %4274 = vset.pattern.permute.xlu0 %v5118_v5  ;;  %4269 = vset.pattern.permute.xlu1 %v5113_v25 }
 0x342   : > { %1033 = vperm.xlu0 %4274, %v941_v35   ;;  %983 = vperm.xlu1 %4269, %v941_v35  }
 0x346   : > { %4277 = vset.pattern.permute.xlu0 %v5119_v36  ;;  %4270 = vset.pattern.permute.xlu1 %v5114_v47 }
 0x347   : > { %1063 = vperm.xlu0 %4277, %v941_v35   ;;  %993 = vperm.xlu1 %4270, %v941_v35  }
 0x34b   : > { %4280 = vset.pattern.permute.xlu0 %v5120_v37  ;;  %4272 = vset.pattern.permute.xlu1 %v5117_v50 }
 0x34c   : > { %1093 = vperm.xlu0 %4280, %v941_v35   ;;  %1013 = vperm.xlu1 %4272, %v941_v35  }
 0x350   : > { %4273 = vset.pattern.permute.xlu1 %v5115_v48  ;;  %4283 = vset.pattern.permute.xlu0 %v5112_v3  ;;  %v942_v3 = vld [vmem:[%s5878_s7] sm:$0xff] }
 0x351   : > { %1023 = vperm.xlu1 %4273, %v941_v35   ;;  %v953_v43 = vrot.slane %v942_v3, %v5588_v6  ;;  %v969_v46 = vrot.slane %v942_v3, %v5592_v9  ;;  %v979_v53 = vrot.slane %v942_v3, %v5595_v10  ;;  %v999_v63 = vrot.slane %v942_v3, %v5622_v62 }
 0x352   : > { %v1009_v4 = vrot.slane %v942_v3, %v5626_v7  ;;  %v1019_v14 = vrot.slane %v942_v3, %v5631_v17  ;;  %v1029_v21 = vrot.slane %v942_v3, %v5634_v19 }
 0x355   : > { %4275 = vset.pattern.permute.xlu1 %v5121_v38 }
 0x356   : > { %1043 = vperm.xlu1 %4275, %v941_v35  }
 0x35a   : > { %4276 = vset.pattern.permute.xlu1 %v5122_v39 }
 0x35b   : > { %1053 = vperm.xlu1 %4276, %v941_v35  }
 0x35f   : > { %4278 = vset.pattern.permute.xlu1 %v5123_v40 }
 0x360   : > { %1073 = vperm.xlu1 %4278, %v941_v35  }
 0x364   : > { %4279 = vset.pattern.permute.xlu1 %v5124_v41 }
 0x365   : > { %1083 = vperm.xlu1 %4279, %v941_v35  }
 0x369   : > { %4281 = vset.pattern.permute.xlu1 %v5125_v42 }
 0x36a   : > { %1103 = vperm.xlu1 %4281, %v941_v35  }
 0x36e   : > { %4282 = vset.pattern.permute.xlu1 %v5110_v0  ;;  %v989_v0 = vrot.slane %v942_v3, %v5606_v32 }
 0x3b7   : > { %v948_v44 = vpop.permute.xlu1 %947  ;;  %v974_v56 = vpop.permute.xlu0 %973 }
 0x3b8   : > { %v954_v45 = vmul.f32 %v953_v43, %v948_v44  ;;  %v980_v58 = vmul.f32 %v979_v53, %v974_v56  ;;  %v1059_v43 = vrot.slane %v943_v22, %v5595_v10  ;;  %v1069_v44 = vrot.slane %v943_v22, %v5606_v32 }
 0x3b9   : > { %v1079_v53 = vrot.slane %v943_v22, %v5622_v62 }
 0x3ba   : > { %v961_v54 = vadd.f32 %v3723_v51, %v954_v45 }
 0x3bc   : > { %v964_v52 = vpop.permute.xlu1 %963  ;;  %v1004_v12 = vpop.permute.xlu0 %1003 }
 0x3bd   : > { %v970_v55 = vmul.f32 %v969_v46, %v964_v52  ;;  %v1010_v15 = vmul.f32 %v1009_v4, %v1004_v12 }
 0x3bf   : > { %v971_v57 = vadd.f32 %v970_v55, %v961_v54 }
 0x3c1   : > { %v984_v59 = vpop.permute.xlu1 %983  ;;  %v981_v60 = vadd.f32 %v980_v58, %v971_v57  ;;  %v1034_v28 = vpop.permute.xlu0 %1033  ;;  %v1099_v58 = vrot.slane %v943_v22, %v5631_v17 }
 0x3c2   : > { %v990_v61 = vmul.f32 %v989_v0, %v984_v59  ;;  %v1040_v31 = vmul.f32 %v1039_v24, %v1034_v28  ;;  %v1089_v0 = vrot.slane %v943_v22, %v5626_v7  ;;  %v4316_v24 = vld [vmem:[#allocation16 + $0x10] sm:$0xff]   ;;  %v4320_v28 = vld [vmem:[#allocation17] ss:$8 sps:$4 sm:$0xff]  }
 0x3c4   : > { %v991_v8 = vadd.f32 %v990_v61, %v981_v60 }
 0x3c6   : > { %v994_v2 = vpop.permute.xlu1 %993  ;;  %v1064_v51 = vpop.permute.xlu0 %1063 }
 0x3c7   : > { %v1000_v11 = vmul.f32 %v999_v63, %v994_v2  ;;  %v1070_v54 = vmul.f32 %v1069_v44, %v1064_v51  ;;  %v1109_v2 = vrot.slane %v943_v22, %v5634_v19  ;;  %v5142_v22 = vmov 30   ;;  %v4330_v44 = vld [vmem:[#allocation17 + $0x44] ss:$8 sps:$4 sm:$0xff]   ;;  %v4332_v51 = vld [vmem:[#allocation17 + $0x40] ss:$8 sps:$4 sm:$0xff]  }
 0x3c9   : > { %v1001_v13 = vadd.f32 %v1000_v11, %v991_v8 }
 0x3cb   : > { %v1014_v16 = vpop.permute.xlu1 %1013  ;;  %v1011_v18 = vadd.f32 %v1010_v15, %v1001_v13  ;;  %v1094_v59 = vpop.permute.xlu0 %1093 }
 0x3cc   : > { %v1020_v20 = vmul.f32 %v1019_v14, %v1014_v16  ;;  %v1100_v4 = vmul.f32 %v1099_v58, %v1094_v59 }
 0x3ce   : > { %v1021_v26 = vadd.f32 %v1020_v20, %v1011_v18  ;;  %v5140_v18 = vmov 29   ;;  %v4314_v20 = vld [vmem:[#allocation16] sm:$0xff]  }
 0x3d0   : > { %v1024_v23 = vpop.permute.xlu1 %1023 }
 0x3d1   : > { %v1030_v27 = vmul.f32 %v1029_v21, %v1024_v23  ;;  %v5141_v21 = vmov 0.0   ;;  %v4315_v23 = vld [vmem:[#allocation16 + $0x8] sm:$0xff]  }
 0x3d2   : > { %4023 = vmatprep.subr.bf16.mxu0 %v5141_v21  ;;  %4031 = vmatprep.mubr.msk.bf16.mxu0 %vm5143_vm0, %v5141_v21 }
 0x3d3   : > { %v1031_v29 = vadd.f32 %v1030_v27, %v1021_v26  ;;  %4024 = vmatpush3.bf16.msra.mxu0 %v4314_v20  ;;  %v4317_v26 = vld [vmem:[#allocation16 + $0x18] sm:$0xff]   ;;  %v4318_v27 = vld [vmem:[#allocation17 + $0x4] ss:$8 sps:$4 sm:$0xff]  }
 0x3d4   : > { %4025 = vmatprep.subr.bf16.mxu0 %v5141_v21  ;;  %1643 = vmatprep.subr.bf16.mxu1 %v4318_v27 }
 0x3d5   : > { %v1044_v33 = vpop.permute.xlu1 %1043  ;;  %v1041_v34 = vadd.f32 %v1040_v31, %v1031_v29  ;;  %v4321_v29 = vld [vmem:[#allocation17 + $0x14] ss:$8 sps:$4 sm:$0xff]   ;;  %1644 = vmatpush1.bf16.msra.mxu1 %v4320_v28  ;;  %v4324_v31 = vld [vmem:[#allocation17 + $0x24] ss:$8 sps:$4 sm:$0xff]  }
 0x3d6   : > { %v1050_v35 = vmul.f32 %v1049_v30, %v1044_v33  ;;  %v4323_v30 = vld [vmem:[#allocation17 + $0x10] ss:$8 sps:$4 sm:$0xff]   ;;  %1645 = vmatprep.subr.bf16.mxu1 %v4321_v29  ;;  %v4326_v33 = vld [vmem:[#allocation17 + $0x20] ss:$8 sps:$4 sm:$0xff]  }
 0x3d7   : > { %4026 = vmatpush3.bf16.msra.mxu0 %v4315_v23 }
 0x3d8   : > { %v1051_v45 = vadd.f32 %v1050_v35, %v1041_v34  ;;  %4027 = vmatprep.subr.bf16.mxu0 %v5141_v21  ;;  %v4327_v34 = vld [vmem:[#allocation17 + $0x34] ss:$8 sps:$4 sm:$0xff]  }
 0x3d9   : > { %1646 = vmatpush1.bf16.msra.mxu1 %v4323_v30  ;;  %v1114_v35 = vld [vmem:[%s5880_s9] sm:$0xff] }
 0x3da   : > { %v1054_v3 = vpop.permute.xlu1 %1053  ;;  %1647 = vmatprep.subr.bf16.mxu1 %v4324_v31 }
 0x3db   : > { %v1060_v46 = vmul.f32 %v1059_v43, %v1054_v3  ;;  %4028 = vmatpush3.bf16.msra.mxu0 %v4316_v24  ;;  %v4329_v43 = vld [vmem:[#allocation17 + $0x30] ss:$8 sps:$4 sm:$0xff]   ;;  %v1127_v3 = vrot.slane %v1114_v35, %v5588_v6 }
 0x3dc   : > { %4029 = vmatprep.subr.bf16.mxu0 %v5141_v21 }
 0x3dd   : > { %v1061_v52 = vadd.f32 %v1060_v46, %v1051_v45  ;;  %1648 = vmatpush1.bf16.msra.mxu1 %v4326_v33  ;;  %v3724_v45 = vld [vmem:[#allocation14] ss:$0 sm:$0xff] }
 0x3de   : > { %1649 = vmatprep.subr.bf16.mxu1 %v4327_v34 }
 0x3df   : > { %v1074_v55 = vpop.permute.xlu1 %1073  ;;  %v1071_v56 = vadd.f32 %v1070_v54, %v1061_v52  ;;  %4030 = vmatpush3.bf16.msra.mxu0 %v4317_v26  ;;  %v1143_v52 = vrot.slane %v1114_v35, %v5592_v9  ;;  %v4333_v54 = vld [vmem:[#allocation17 + $0x54] ss:$8 sps:$4 sm:$0xff]  }
 0x3e0   : > { %v1080_v57 = vmul.f32 %v1079_v53, %v1074_v55 }
 0x3e1   : > { %1650 = vmatpush1.bf16.msra.mxu1 %v4329_v43 }
 0x3e2   : > { %v1081_v61 = vadd.f32 %v1080_v57, %v1071_v56  ;;  %1651 = vmatprep.subr.bf16.mxu1 %v4330_v44  ;;  %v1153_v57 = vrot.slane %v1114_v35, %v5595_v10 }
 0x3e4   : > { %v1084_v60 = vpop.permute.xlu1 %1083 }
 0x3e5   : > { %v1090_v63 = vmul.f32 %v1089_v0, %v1084_v60  ;;  %1652 = vmatpush1.bf16.msra.mxu1 %v4332_v51  ;;  %v4335_v0 = vld [vmem:[#allocation17 + $0x50] ss:$8 sps:$4 sm:$0xff]  }
 0x3e6   : > { %1653 = vmatprep.subr.bf16.mxu1 %v4333_v54 }
 0x3e7   : > { %v1091_v8 = vadd.f32 %v1090_v63, %v1081_v61  ;;  %v1163_v63 = vrot.slane %v1114_v35, %v5606_v32 }
 0x3e9   : > { %v1101_v11 = vadd.f32 %v1100_v4, %v1091_v8  ;;  %v1104_v12 = vpop.permute.xlu1 %1103  ;;  %1654 = vmatpush1.bf16.msra.mxu1 %v4335_v0  ;;  %v1173_v4 = vrot.slane %v1114_v35, %v5622_v62 }
 0x3ea   : > { %v1110_v13 = vmul.f32 %v1109_v2, %v1104_v12 }
 0x3ec   : > { %v1111_v14 = vadd.f32 %v1110_v13, %v1101_v11 }
 0x3ee   : > { %v1112_v15 = vmul.f32 0.4, %v1111_v14 }
 0x3f0   : > { %v5676_v16 = vmax.f32 %v1111_v14, %v1112_v15  ;;  %v1183_v14 = vrot.slane %v1114_v35, %v5626_v7 }
 0x3f2   : > { %1137 = vperm.xlu0 %4283, %v5676_v16   ;;  %1121 = vperm.xlu1 %4282, %v5676_v16  }
 0x3f6   : > { %4286 = vset.pattern.permute.xlu0 %v5114_v47  ;;  %4284 = vset.pattern.permute.xlu1 %v5111_v1  ;;  %v5126_v1 = vmov 16   ;;  %v5128_v47 = vmov 22  }
 0x3f7   : > { %1167 = vperm.xlu0 %4286, %v5676_v16   ;;  %1147 = vperm.xlu1 %4284, %v5676_v16  }
 0x3fb   : > { %4289 = vset.pattern.permute.xlu0 %v5115_v48  ;;  %4285 = vset.pattern.permute.xlu1 %v5113_v25  ;;  %v5127_v25 = vmov 19   ;;  %v5129_v48 = vmov 25  }
 0x3fc   : > { %1197 = vperm.xlu0 %4289, %v5676_v16   ;;  %1157 = vperm.xlu1 %4285, %v5676_v16  }
 0x400   : > { %4292 = vset.pattern.permute.xlu0 %v5122_v39  ;;  %4287 = vset.pattern.permute.xlu1 %v5116_v49  ;;  %v5130_v49 = vmov 28   ;;  %v5136_v39 = vmov 23  }
 0x401   : > { %1227 = vperm.xlu0 %4292, %v5676_v16   ;;  %1177 = vperm.xlu1 %4287, %v5676_v16  }
 0x405   : > { %4295 = vset.pattern.permute.xlu0 %v5124_v41  ;;  %4288 = vset.pattern.permute.xlu1 %v5117_v50  ;;  %v5131_v50 = vmov 31   ;;  %v5138_v41 = vmov 26  }
 0x406   : > { %1257 = vperm.xlu0 %4295, %v5676_v16   ;;  %1187 = vperm.xlu1 %4288, %v5676_v16  }
 0x40a   : > { %4298 = vset.pattern.permute.xlu0 %v5126_v1  ;;  %4290 = vset.pattern.permute.xlu1 %v5118_v5  ;;  %v5132_v5 = vmov 17  }
 0x40b   : > { %1287 = vperm.xlu0 %4298, %v5676_v16   ;;  %1207 = vperm.xlu1 %4290, %v5676_v16  }
 0x40f   : > { %4301 = vset.pattern.permute.xlu0 %v5127_v25  ;;  %4291 = vset.pattern.permute.xlu1 %v5121_v38  ;;  %v5135_v38 = vmov 21  }
 0x410   : > { %1317 = vperm.xlu0 %4301, %v5676_v16   ;;  %1217 = vperm.xlu1 %4291, %v5676_v16  }
 0x414   : > { %4304 = vset.pattern.permute.xlu0 %v5128_v47  ;;  %4293 = vset.pattern.permute.xlu1 %v5119_v36  ;;  %v5133_v36 = vmov 18   ;;  %v1193_v47 = vrot.slane %v1114_v35, %v5631_v17 }
 0x415   : > { %1347 = vperm.xlu0 %4304, %v5676_v16   ;;  %1237 = vperm.xlu1 %4293, %v5676_v16  }
 0x419   : > { %4307 = vset.pattern.permute.xlu0 %v5129_v48  ;;  %4294 = vset.pattern.permute.xlu1 %v5123_v40  ;;  %v5137_v40 = vmov 24  }
 0x41a   : > { %1377 = vperm.xlu0 %4307, %v5676_v16   ;;  %1247 = vperm.xlu1 %4294, %v5676_v16  }
 0x41e   : > { %4310 = vset.pattern.permute.xlu0 %v5130_v49  ;;  %4296 = vset.pattern.permute.xlu1 %v5120_v37  ;;  %v5134_v37 = vmov 20   ;;  %v1203_v49 = vrot.slane %v1114_v35, %v5634_v19 }
 0x41f   : > { %1407 = vperm.xlu0 %4310, %v5676_v16   ;;  %1267 = vperm.xlu1 %4296, %v5676_v16  }
 0x423   : > { %4313 = vset.pattern.permute.xlu0 %v5131_v50  ;;  %4297 = vset.pattern.permute.xlu1 %v5125_v42  ;;  %v5139_v42 = vmov 27  }
 0x424   : > { %1437 = vperm.xlu0 %4313, %v5676_v16   ;;  %1277 = vperm.xlu1 %4297, %v5676_v16  }
 0x428   : > { %4299 = vset.pattern.permute.xlu1 %v5132_v5 }
 0x429   : > { %1297 = vperm.xlu1 %4299, %v5676_v16  }
 0x42d   : > { %4300 = vset.pattern.permute.xlu1 %v5133_v36 }
 0x42e   : > { %1307 = vperm.xlu1 %4300, %v5676_v16  }
 0x432   : > { %4302 = vset.pattern.permute.xlu1 %v5134_v37  ;;  %v1115_v37 = vld [vmem:[%s5880_s9 + $0x8] sm:$0xff] }
 0x433   : > { %1327 = vperm.xlu1 %4302, %v5676_v16   ;;  %v1223_v20 = vrot.slane %v1115_v37, %v5592_v9  ;;  %v1243_v28 = vrot.slane %v1115_v37, %v5606_v32  ;;  %v1253_v34 = vrot.slane %v1115_v37, %v5622_v62  ;;  %v1263_v43 = vrot.slane %v1115_v37, %v5626_v7 }
 0x434   : > { %v1273_v51 = vrot.slane %v1115_v37, %v5631_v17 }
 0x437   : > { %4303 = vset.pattern.permute.xlu1 %v5135_v38 }
 0x438   : > { %1337 = vperm.xlu1 %4303, %v5676_v16  }
 0x43c   : > { %4305 = vset.pattern.permute.xlu1 %v5136_v39  ;;  %v1213_v39 = vrot.slane %v1115_v37, %v5588_v6 }
 0x43d   : > { %1357 = vperm.xlu1 %4305, %v5676_v16  }
 0x441   : > { %4306 = vset.pattern.permute.xlu1 %v5137_v40 }
 0x442   : > { %1367 = vperm.xlu1 %4306, %v5676_v16  }
 0x446   : > { %4308 = vset.pattern.permute.xlu1 %v5138_v41 }
 0x447   : > { %1387 = vperm.xlu1 %4308, %v5676_v16  }
 0x44b   : > { %4309 = vset.pattern.permute.xlu1 %v5139_v42 }
 0x44c   : > { %1397 = vperm.xlu1 %4309, %v5676_v16  }
 0x450   : > { %4311 = vset.pattern.permute.xlu1 %v5140_v18 }
 0x451   : > { %1417 = vperm.xlu1 %4311, %v5676_v16  }
 0x455   : > { %4312 = vset.pattern.permute.xlu1 %v5142_v22  ;;  %v1233_v22 = vrot.slane %v1115_v37, %v5595_v10 }
 0x456   : > { %1427 = vperm.xlu1 %4312, %v5676_v16  }
 0x471   : > { %v1122_v46 = vpop.permute.xlu1 %1121  ;;  %v1138_v55 = vpop.permute.xlu0 %1137 }
 0x472   : > { %v1128_v53 = vmul.f32 %v1127_v3, %v1122_v46  ;;  %v1144_v58 = vmul.f32 %v1143_v52, %v1138_v55 }
 0x474   : > { %v1135_v56 = vadd.f32 %v3724_v45, %v1128_v53 }
 0x476   : > { %v1148_v59 = vpop.permute.xlu1 %1147  ;;  %v1145_v60 = vadd.f32 %v1144_v58, %v1135_v56  ;;  %v1168_v12 = vpop.permute.xlu0 %1167  ;;  %v1283_v56 = vrot.slane %v1115_v37, %v5634_v19 }
 0x477   : > { %v1154_v61 = vmul.f32 %v1153_v57, %v1148_v59  ;;  %v1174_v15 = vmul.f32 %v1173_v4, %v1168_v12  ;;  %v1116_v57 = vld [vmem:[%s5880_s9 + $0x10] sm:$0xff] }
 0x478   : > { %v1293_v58 = vrot.slane %v1116_v57, %v5588_v6  ;;  %v1343_v37 = vrot.slane %v1116_v57, %v5626_v7 }
 0x479   : > { %v1155_v8 = vadd.f32 %v1154_v61, %v1145_v60 }
 0x47b   : > { %v1158_v2 = vpop.permute.xlu1 %1157  ;;  %v1198_v36 = vpop.permute.xlu0 %1197 }
 0x47c   : > { %v1164_v11 = vmul.f32 %v1163_v63, %v1158_v2  ;;  %v1204_v40 = vmul.f32 %v1203_v49, %v1198_v36  ;;  %v1303_v2 = vrot.slane %v1116_v57, %v5592_v9 }
 0x47e   : > { %v1165_v13 = vadd.f32 %v1164_v11, %v1155_v8 }
 0x480   : > { %v1178_v16 = vpop.permute.xlu1 %1177  ;;  %v1175_v1 = vadd.f32 %v1174_v15, %v1165_v13  ;;  %v1228_v26 = vpop.permute.xlu0 %1227  ;;  %v1313_v13 = vrot.slane %v1116_v57, %v5595_v10  ;;  %v1323_v15 = vrot.slane %v1116_v57, %v5606_v32 }
 0x481   : > { %v1184_v25 = vmul.f32 %v1183_v14, %v1178_v16  ;;  %v1234_v29 = vmul.f32 %v1233_v22, %v1228_v26 }
 0x483   : > { %v1185_v50 = vadd.f32 %v1184_v25, %v1175_v1 }
 0x485   : > { %v1188_v48 = vpop.permute.xlu1 %1187  ;;  %v1258_v45 = vpop.permute.xlu0 %1257 }
 0x486   : > { %v1194_v5 = vmul.f32 %v1193_v47, %v1188_v48  ;;  %v1264_v52 = vmul.f32 %v1263_v43, %v1258_v45  ;;  %v1333_v48 = vrot.slane %v1116_v57, %v5622_v62 }
 0x488   : > { %v1195_v38 = vadd.f32 %v1194_v5, %v1185_v50 }
 0x48a   : > { %v1208_v41 = vpop.permute.xlu1 %1207  ;;  %v1205_v42 = vadd.f32 %v1204_v40, %v1195_v38  ;;  %v1288_v61 = vpop.permute.xlu0 %1287 }
 0x48b   : > { %v1214_v18 = vmul.f32 %v1213_v39, %v1208_v41  ;;  %v1294_v4 = vmul.f32 %v1293_v58, %v1288_v61  ;;  %v1353_v39 = vrot.slane %v1116_v57, %v5631_v17 }
 0x48d   : > { %v1215_v23 = vadd.f32 %v1214_v18, %v1205_v42 }
 0x48f   : > { %v1218_v21 = vpop.permute.xlu1 %1217  ;;  %v1318_v25 = vpop.permute.xlu0 %1317 }
 0x490   : > { %v1224_v24 = vmul.f32 %v1223_v20, %v1218_v21  ;;  %v1324_v49 = vmul.f32 %v1323_v15, %v1318_v25  ;;  %v1363_v20 = vrot.slane %v1116_v57, %v5634_v19  ;;  %v4338_v25 = vld [vmem:[#allocation17 + $0x60] ss:$8 sps:$4 sm:$0xff]  }
 0x492   : > { %v1225_v27 = vadd.f32 %v1224_v24, %v1215_v23  ;;  %v1117_v23 = vld [vmem:[%s5880_s9 + $0x18] sm:$0xff] }
 0x493   : > { %v1423_v57 = vrot.slane %v1117_v23, %v5626_v7  ;;  %v1433_v61 = vrot.slane %v1117_v23, %v5631_v17  ;;  %v4336_v7 = vld [vmem:[#allocation17 + $0x64] ss:$8 sps:$4 sm:$0xff]   ;;  %v4341_v17 = vld [vmem:[#allocation17 + $0x70] ss:$8 sps:$4 sm:$0xff]  }
 0x494   : > { %v1238_v30 = vpop.permute.xlu1 %1237  ;;  %v1235_v31 = vadd.f32 %v1234_v29, %v1225_v27  ;;  %v1348_v42 = vpop.permute.xlu0 %1347  ;;  %v1373_v27 = vrot.slane %v1117_v23, %v5588_v6  ;;  %v1383_v29 = vrot.slane %v1117_v23, %v5592_v9  ;;  %1655 = vmatprep.subr.bf16.mxu1 %v4336_v7  ;;  %v4401_v7 = vld [vmem:[#allocation19 + $0x12c] ss:$16 sps:$4 sm:$0xff]  }
 0x495   : > { %v1244_v33 = vmul.f32 %v1243_v28, %v1238_v30  ;;  %v1354_v21 = vmul.f32 %v1353_v39, %v1348_v42  ;;  %1656 = vmatpush1.bf16.msra.mxu1 %v4338_v25  ;;  %v4360_v39 = vld [vmem:[#allocation19 + $0x60] ss:$16 sps:$4 sm:$0xff]   ;;  %v4374_v42 = vld [vmem:[#allocation19 + $0xa4] ss:$16 sps:$4 sm:$0xff]   ;;  %v4399_v25 = vld [vmem:[#allocation19 + $0x128] ss:$16 sps:$4 sm:$0xff]  }
 0x497   : > { %v1245_v3 = vadd.f32 %v1244_v33, %v1235_v31 }
 0x499   : > { %v1248_v35 = vpop.permute.xlu1 %1247  ;;  %v1378_v33 = vpop.permute.xlu0 %1377 }
 0x49a   : > { %v1254_v44 = vmul.f32 %v1253_v34, %v1248_v35  ;;  %v1393_v35 = vrot.slane %v1117_v23, %v5595_v10  ;;  %v1384_v43 = vmul.f32 %v1383_v29, %v1378_v33  ;;  %v4404_v29 = vld [vmem:[#allocation19 + $0x144] ss:$16 sps:$4 sm:$0xff]   ;;  %v4408_v33 = vld [vmem:[#allocation19 + $0x160] ss:$16 sps:$4 sm:$0xff]  }
 0x49c   : > { %v1255_v46 = vadd.f32 %v1254_v44, %v1245_v3 }
 0x49e   : > { %v1268_v53 = vpop.permute.xlu1 %1267  ;;  %v1265_v54 = vadd.f32 %v1264_v52, %v1255_v46  ;;  %v1403_v46 = vrot.slane %v1117_v23, %v5606_v32  ;;  %v1413_v52 = vrot.slane %v1117_v23, %v5622_v62 }
 0x49f   : > { %v1274_v55 = vmul.f32 %v1273_v51, %v1268_v53 }
 0x4a1   : > { %v1275_v59 = vadd.f32 %v1274_v55, %v1265_v54  ;;  %v1408_v55 = vpop.permute.xlu0 %1407 }
 0x4a3   : > { %v1278_v0 = vpop.permute.xlu1 %1277 }
 0x4a4   : > { %v1284_v60 = vmul.f32 %v1283_v56, %v1278_v0  ;;  %v1414_v0 = vmul.f32 %v1413_v52, %v1408_v55 }
 0x4a6   : > { %v1285_v63 = vadd.f32 %v1284_v60, %v1275_v59 }
 0x4a8   : > { %v1298_v8 = vpop.permute.xlu1 %1297  ;;  %v1295_v11 = vadd.f32 %v1294_v4, %v1285_v63  ;;  %v1443_v63 = vrot.slane %v1117_v23, %v5634_v19  ;;  %v4342_v19 = vld [vmem:[#allocation19] ss:$16 sps:$4 sm:$0xff]  }
 0x4a9   : > { %v1304_v12 = vmul.f32 %v1303_v2, %v1298_v8  ;;  %v1438_v2 = vpop.permute.xlu0 %1437  ;;  %v4384_v23 = vld [vmem:[#allocation19 + $0xe0] ss:$16 sps:$4 sm:$0xff]  }
 0x4ab   : > { %v1305_v16 = vadd.f32 %v1304_v12, %v1295_v11  ;;  %v1444_v12 = vmul.f32 %v1443_v63, %v1438_v2  ;;  %v4363_v63 = vld [vmem:[#allocation19 + $0x68] ss:$16 sps:$4 sm:$0xff]   ;;  %v4371_v2 = vld [vmem:[#allocation19 + $0x8c] ss:$16 sps:$4 sm:$0xff]  }
 0x4ad   : > { %v1308_v14 = vpop.permute.xlu1 %1307 }
 0x4ae   : > { %v1314_v1 = vmul.f32 %v1313_v13, %v1308_v14 }
 0x4b0   : > { %v1315_v47 = vadd.f32 %v1314_v1, %v1305_v16 }
 0x4b2   : > { %v1328_v50 = vpop.permute.xlu1 %1327  ;;  %v1325_v5 = vadd.f32 %v1324_v49, %v1315_v47  ;;  %v4339_v47 = vld [vmem:[#allocation17 + $0x74] ss:$8 sps:$4 sm:$0xff]  }
 0x4b3   : > { %v1334_v36 = vmul.f32 %v1333_v48, %v1328_v50  ;;  %1657 = vmatprep.subr.bf16.mxu1 %v4339_v47  ;;  %v4344_v48 = vld [vmem:[#allocation19 + $0x4] ss:$16 sps:$4 sm:$0xff]   ;;  %v4347_v49 = vld [vmem:[#allocation19 + $0xc] ss:$16 sps:$4 sm:$0xff]  }
 0x4b4   : > { %1658 = vmatpush1.bf16.msra.mxu1 %v4341_v17  ;;  %v4350_v50 = vld [vmem:[#allocation19 + $0x24] ss:$16 sps:$4 sm:$0xff]   ;;  %2096 = vmatprep.subr.bf16.mxu0 %v4344_v48  ;;  %v4407_v47 = vld [vmem:[#allocation19 + $0x14c] ss:$16 sps:$4 sm:$0xff]   ;;  %v4405_v17 = vld [vmem:[#allocation19 + $0x148] ss:$16 sps:$4 sm:$0xff]  }
 0x4b5   : > { %v1335_v40 = vadd.f32 %v1334_v36, %v1325_v5  ;;  %2137 = vmatprep.subr.bf16.mxu1 %v4347_v49  ;;  %v4348_v5 = vld [vmem:[#allocation19 + $0x20] ss:$16 sps:$4 sm:$0xff]   ;;  %v4356_v36 = vld [vmem:[#allocation19 + $0x44] ss:$16 sps:$4 sm:$0xff]   ;;  %v4411_v48 = vld [vmem:[#allocation19 + $0x168] ss:$16 sps:$4 sm:$0xff]  }
 0x4b6   : > { %v4419_v49 = vld [vmem:[#allocation19 + $0x18c] ss:$16 sps:$4 sm:$0xff]  }
 0x4b7   : > { %v1338_v38 = vpop.permute.xlu1 %1337 }
 0x4b8   : > { %v1344_v41 = vmul.f32 %v1343_v37, %v1338_v38  ;;  %v4354_v37 = vld [vmem:[#allocation19 + $0x40] ss:$16 sps:$4 sm:$0xff]   ;;  %v4362_v38 = vld [vmem:[#allocation19 + $0x64] ss:$16 sps:$4 sm:$0xff]  }
 0x4ba   : > { %v1345_v18 = vadd.f32 %v1344_v41, %v1335_v40  ;;  %v4368_v40 = vld [vmem:[#allocation19 + $0x84] ss:$16 sps:$4 sm:$0xff]   ;;  %v4366_v41 = vld [vmem:[#allocation19 + $0x80] ss:$16 sps:$4 sm:$0xff]  }
 0x4bc   : > { %v1358_v22 = vpop.permute.xlu1 %1357  ;;  %v1355_v24 = vadd.f32 %v1354_v21, %v1345_v18  ;;  %v4372_v18 = vld [vmem:[#allocation19 + $0xa0] ss:$16 sps:$4 sm:$0xff]  }
 0x4bd   : > { %v1364_v26 = vmul.f32 %v1363_v20, %v1358_v22  ;;  %v4380_v20 = vld [vmem:[#allocation19 + $0xc4] ss:$16 sps:$4 sm:$0xff]   ;;  %v4378_v21 = vld [vmem:[#allocation19 + $0xc0] ss:$16 sps:$4 sm:$0xff]  }
 0x4be   : > { %v4386_v22 = vld [vmem:[#allocation19 + $0xe4] ss:$16 sps:$4 sm:$0xff]  }
 0x4bf   : > { %v1365_v30 = vadd.f32 %v1364_v26, %v1355_v24  ;;  %v4392_v24 = vld [vmem:[#allocation19 + $0x104] ss:$16 sps:$4 sm:$0xff]   ;;  %v4390_v26 = vld [vmem:[#allocation19 + $0x100] ss:$16 sps:$4 sm:$0xff]  }
 0x4c1   : > { %v1368_v28 = vpop.permute.xlu1 %1367 }
 0x4c2   : > { %v1374_v31 = vmul.f32 %v1373_v27, %v1368_v28  ;;  %v4398_v27 = vld [vmem:[#allocation19 + $0x124] ss:$16 sps:$4 sm:$0xff]   ;;  %v4396_v28 = vld [vmem:[#allocation19 + $0x120] ss:$16 sps:$4 sm:$0xff]  }
 0x4c4   : > { %v1375_v34 = vadd.f32 %v1374_v31, %v1365_v30  ;;  %v4402_v30 = vld [vmem:[#allocation19 + $0x140] ss:$16 sps:$4 sm:$0xff]   ;;  %v4410_v31 = vld [vmem:[#allocation19 + $0x164] ss:$16 sps:$4 sm:$0xff]  }
 0x4c6   : > { %v1388_v3 = vpop.permute.xlu1 %1387  ;;  %v1385_v44 = vadd.f32 %v1384_v43, %v1375_v34  ;;  %v4416_v34 = vld [vmem:[#allocation19 + $0x184] ss:$16 sps:$4 sm:$0xff]  }
 0x4c7   : > { %v1394_v45 = vmul.f32 %v1393_v35, %v1388_v3  ;;  %v4414_v35 = vld [vmem:[#allocation19 + $0x180] ss:$16 sps:$4 sm:$0xff]   ;;  %v4422_v43 = vld [vmem:[#allocation19 + $0x1a4] ss:$16 sps:$4 sm:$0xff]  }
 0x4c8   : > { %v4420_v3 = vld [vmem:[#allocation19 + $0x1a0] ss:$16 sps:$4 sm:$0xff]  }
 0x4c9   : > { %v1395_v53 = vadd.f32 %v1394_v45, %v1385_v44  ;;  %v3725_v44 = vld [vmem:[%s5883_s12] ss:$0 sm:$0xff] }
 0x4cb   : > { %v1398_v51 = vpop.permute.xlu1 %1397 }
 0x4cc   : > { %v1404_v54 = vmul.f32 %v1403_v46, %v1398_v51 }
 0x4ce   : > { %v1405_v56 = vadd.f32 %v1404_v54, %v1395_v53 }
 0x4d0   : > { %v1418_v58 = vpop.permute.xlu1 %1417  ;;  %v1415_v59 = vadd.f32 %v1414_v0, %v1405_v56  ;;  %v4345_v56 = vld [vmem:[#allocation19 + $0x8] ss:$16 sps:$4 sm:$0xff]   ;;  %v4353_v0 = vld [vmem:[#allocation19 + $0x2c] ss:$16 sps:$4 sm:$0xff]  }
 0x4d1   : > { %v1424_v60 = vmul.f32 %v1423_v57, %v1418_v58  ;;  %v4351_v58 = vld [vmem:[#allocation19 + $0x28] ss:$16 sps:$4 sm:$0xff]  }
 0x4d3   : > { %v1425_v8 = vadd.f32 %v1424_v60, %v1415_v59  ;;  %v4359_v59 = vld [vmem:[#allocation19 + $0x4c] ss:$16 sps:$4 sm:$0xff]   ;;  %v4357_v60 = vld [vmem:[#allocation19 + $0x48] ss:$16 sps:$4 sm:$0xff]  }
 0x4d5   : > { %v1428_v4 = vpop.permute.xlu1 %1427 }
 0x4d6   : > { %v1434_v11 = vmul.f32 %v1433_v61, %v1428_v4  ;;  %v4365_v61 = vld [vmem:[#allocation19 + $0x6c] ss:$16 sps:$4 sm:$0xff]   ;;  %v4369_v4 = vld [vmem:[#allocation19 + $0x88] ss:$16 sps:$4 sm:$0xff]  }
 0x4d8   : > { %v1435_v13 = vadd.f32 %v1434_v11, %v1425_v8  ;;  %v4377_v8 = vld [vmem:[#allocation19 + $0xac] ss:$16 sps:$4 sm:$0xff]   ;;  %v4375_v11 = vld [vmem:[#allocation19 + $0xa8] ss:$16 sps:$4 sm:$0xff]  }
 0x4da   : > { %v1445_v14 = vadd.f32 %v1444_v12, %v1435_v13  ;;  %v4383_v12 = vld [vmem:[#allocation19 + $0xcc] ss:$16 sps:$4 sm:$0xff]   ;;  %v4381_v13 = vld [vmem:[#allocation19 + $0xc8] ss:$16 sps:$4 sm:$0xff]  }
 0x4dc   : > { %v1446_v15 = vmul.f32 0.4, %v1445_v14 }
 0x4de   : > { %v1447_v16 = vmax.f32 %v1445_v14, %v1446_v15  ;;  %v4389_v14 = vld [vmem:[#allocation19 + $0xec] ss:$16 sps:$4 sm:$0xff]   ;;  %v4387_v15 = vld [vmem:[#allocation19 + $0xe8] ss:$16 sps:$4 sm:$0xff]  }
 0x4e0   : > { %v1448_v1 = vpack.c.bf16 %v1447_v16, %v1447_v16  ;;  %v4395_v16 = vld [vmem:[#allocation19 + $0x10c] ss:$16 sps:$4 sm:$0xff]  }
 0x4e2   : > { %4032 = vmatmul.mubr.msk.bf16.vlgmr.msra.gmra.mrb[0].mxu0 %vm1488_vm1, %v1448_v1  ;;  %v4393_v1 = vld [vmem:[#allocation19 + $0x108] ss:$16 sps:$4 sm:$0xff]  }
 0x4e3   : > { %2097 = vmatpush1.bf16.msra.mxu0 %v4342_v19  ;;  %v4413_v19 = vld [vmem:[#allocation19 + $0x16c] ss:$16 sps:$4 sm:$0xff]  }
 0x4e4   : > { %2098 = vmatprep.subr.bf16.mxu0 %v4350_v50  ;;  %v4417_v50 = vld [vmem:[#allocation19 + $0x188] ss:$16 sps:$4 sm:$0xff]  }
 0x4e7   : > { %2099 = vmatpush1.bf16.msra.mxu0 %v4348_v5  ;;  %v4425_v5 = vld [vmem:[#allocation19 + $0x1ac] ss:$16 sps:$4 sm:$0xff]  }
 0x4e8   : > { %2100 = vmatprep.subr.bf16.mxu0 %v4356_v36  ;;  %v4423_v36 = vld [vmem:[#allocation19 + $0x1a8] ss:$16 sps:$4 sm:$0xff]  }
 0x4eb   : > { %2101 = vmatpush1.bf16.msra.mxu0 %v4354_v37  ;;  %v4428_v37 = vld [vmem:[#allocation19 + $0x1c4] ss:$16 sps:$4 sm:$0xff]  }
 0x4ec   : > { %2102 = vmatprep.subr.bf16.mxu0 %v4362_v38  ;;  %v4431_v38 = vld [vmem:[#allocation19 + $0x1cc] ss:$16 sps:$4 sm:$0xff]  }
 0x4ef   : > { %2103 = vmatpush1.bf16.msra.mxu0 %v4360_v39  ;;  %v4426_v39 = vld [vmem:[#allocation19 + $0x1c0] ss:$16 sps:$4 sm:$0xff]  }
 0x4f0   : > { %2104 = vmatprep.subr.bf16.mxu0 %v4368_v40  ;;  %v4429_v40 = vld [vmem:[#allocation19 + $0x1c8] ss:$16 sps:$4 sm:$0xff]  }
 0x4f3   : > { %2105 = vmatpush1.bf16.msra.mxu0 %v4366_v41  ;;  %v4434_v41 = vld [vmem:[#allocation19 + $0x1e4] ss:$16 sps:$4 sm:$0xff]  }
 0x4f4   : > { %2106 = vmatprep.subr.bf16.mxu0 %v4374_v42  ;;  %v4437_v42 = vld [vmem:[#allocation19 + $0x1ec] ss:$16 sps:$4 sm:$0xff]  }
 0x4f7   : > { %2107 = vmatpush1.bf16.msra.mxu0 %v4372_v18  ;;  %v4432_v18 = vld [vmem:[#allocation19 + $0x1e0] ss:$16 sps:$4 sm:$0xff]  }
 0x4f8   : > { %2108 = vmatprep.subr.bf16.mxu0 %v4380_v20  ;;  %v4435_v20 = vld [vmem:[#allocation19 + $0x1e8] ss:$16 sps:$4 sm:$0xff]  }
 0x4fb   : > { %2109 = vmatpush1.bf16.msra.mxu0 %v4378_v21  ;;  %v4440_v21 = vld [vmem:[#allocation20 + $0x4] ss:$20 sps:$4 sm:$0xff]  }
 0x4fc   : > { %2110 = vmatprep.subr.bf16.mxu0 %v4386_v22  ;;  %v4443_v22 = vld [vmem:[#allocation20 + $0xc] ss:$20 sps:$4 sm:$0xff]  }
 0x4ff   : > { %2111 = vmatpush1.bf16.msra.mxu0 %v4384_v23  ;;  %v1551_v23 = vld [vmem:[%s5957_s16] sm:$0x3]  ;;  %s4998_s16 = scalar_lea.vmem %s5829_s29, 640 }
 0x500   : > { %2112 = vmatprep.subr.bf16.mxu0 %v4392_v24  ;;  %v1556_v24 = vrot.slane %v1551_v23, %v5588_v6  ;;  %p4999_p0 = scmp.ne.s32.totalorder %s5829_s29, %s4998_s16  ;;  %p5006_p10 = scmp.lt.s32.totalorder %s5004_s21, %s4998_s16 }
 0x502   : > { %p5000_p5 = pnand %p4999_p0, %p5963_p6  ;;  %p5007_p2 = por %p5006_p10, %p5005_p12 }
 0x503   : > { %2113 = vmatpush1.bf16.msra.mxu0 %v4390_v26  ;;  %v1560_v26 = vrot.slane %v1551_v23, %v5592_v9  ;;  %v4504_v23 = vld [vmem:[#allocation20 + $0x1b8] ss:$20 sps:$4 sm:$0xff]  }
 0x504   : > { %2114 = vmatprep.subr.bf16.mxu0 %v4398_v27  ;;  %p5001_p9 = pneg %p5000_p5 }
 0x506   : > { %p5008_p3 = pnand %p5007_p2, %p5001_p9 }
 0x507   : > { %2115 = vmatpush1.bf16.msra.mxu0 %v4396_v28 }
 0x508   : > { %2116 = vmatprep.subr.bf16.mxu0 %v4404_v29 }
 0x50b   : > { %2117 = vmatpush1.bf16.msra.mxu0 %v4402_v30 }
 0x50c   : > { %2118 = vmatprep.subr.bf16.mxu0 %v4410_v31 }
 0x50f   : > { %2119 = vmatpush1.bf16.msra.mxu0 %v4408_v33 }
 0x510   : > { %2120 = vmatprep.subr.bf16.mxu0 %v4416_v34 }
 0x513   : > { %2121 = vmatpush1.bf16.msra.mxu0 %v4414_v35 }
 0x514   : > { %2122 = vmatprep.subr.bf16.mxu0 %v4422_v43 }
 0x517   : > { %2123 = vmatpush1.bf16.msra.mxu0 %v4420_v3 }
 0x518   : > { %2124 = vmatprep.subr.bf16.mxu0 %v4428_v37  ;;  %v4494_v37 = vld [vmem:[#allocation20 + $0x16c] ss:$20 sps:$4 sm:$0xff]  }
 0x51b   : > { %2125 = vmatpush1.bf16.msra.mxu0 %v4426_v39  ;;  %v4492_v39 = vld [vmem:[#allocation20 + $0x168] ss:$20 sps:$4 sm:$0xff]  }
 0x51c   : > { %2126 = vmatprep.subr.bf16.mxu0 %v4434_v41  ;;  %v4500_v41 = vld [vmem:[#allocation20 + $0x194] ss:$20 sps:$4 sm:$0xff]  }
 0x51f   : > { %2127 = vmatpush1.bf16.msra.mxu0 %v4432_v18  ;;  %v4498_v18 = vld [vmem:[#allocation20 + $0x190] ss:$20 sps:$4 sm:$0xff]  }
 0x520   : > { %3241 = vmatprep.subr.bf16.mxu0 %v4440_v21  ;;  %v4506_v21 = vld [vmem:[#allocation20 + $0x1bc] ss:$20 sps:$4 sm:$0xff]  }
 0x5b5   : > { %v1526_v45 = vpop.f32.mrb[0].mxu0 }
 0x5b6   : > { %v1527_v46 = vadd.f32 %v3725_v44, %v1526_v45  ;;  %v4033_v51 = vpop.f32.mrb[1].mxu0  ;;  %v4438_v45 = vld [vmem:[#allocation20] ss:$20 sps:$4 sm:$0xff]  }
 0x5b7   : > { %v1529_v52 = vpop.f32.mrb[2].mxu0 }
 0x5b8   : > { %v1532_v53 = vmul.f32 0.4, %v1527_v46  ;;  %v4034_v54 = vpop.f32.mrb[3].mxu0  ;;  %v4446_v52 = vld [vmem:[#allocation20 + $0x2c] ss:$20 sps:$4 sm:$0xff]  }
 0x5b9   : > { %v4444_v54 = vld [vmem:[#allocation20 + $0x28] ss:$20 sps:$4 sm:$0xff]  }
 0x5ba   : > { %v1533_v55 = vmax.f32 %v1527_v46, %v1532_v53  ;;  %v4441_v46 = vld [vmem:[#allocation20 + $0x8] ss:$20 sps:$4 sm:$0xff]  }
 0x5bb   : > { %v4449_v53 = vld [vmem:[#allocation20 + $0x34] ss:$20 sps:$4 sm:$0xff]  }
 0x5bc   : > { %v1534_v57 = vpack.c.bf16 %v1533_v55, %v1533_v55  ;;  %v4447_v55 = vld [vmem:[#allocation20 + $0x30] ss:$20 sps:$4 sm:$0xff]  }
 0x5be   : > { %1676 = vmatmul.mubr.bf16.vlgmr.msra.gmra.mrb[0].mxu1 %v1534_v57  ;;  %v4455_v57 = vld [vmem:[#allocation20 + $0x5c] ss:$20 sps:$4 sm:$0xff]  }
 0x5bf   : > { %2138 = vmatpush1.bf16.msra.mxu1 %v4345_v56  ;;  %v4452_v56 = vld [vmem:[#allocation20 + $0x54] ss:$20 sps:$4 sm:$0xff]  }
 0x5c0   : > { %2139 = vmatprep.subr.bf16.mxu1 %v4353_v0  ;;  %v4450_v0 = vld [vmem:[#allocation20 + $0x50] ss:$20 sps:$4 sm:$0xff]  }
 0x5c3   : > { %2140 = vmatpush1.bf16.msra.mxu1 %v4351_v58  ;;  %v4453_v58 = vld [vmem:[#allocation20 + $0x58] ss:$20 sps:$4 sm:$0xff]  }
 0x5c4   : > { %2141 = vmatprep.subr.bf16.mxu1 %v4359_v59  ;;  %v4458_v59 = vld [vmem:[#allocation20 + $0x7c] ss:$20 sps:$4 sm:$0xff]  }
 0x5c7   : > { %2142 = vmatpush1.bf16.msra.mxu1 %v4357_v60  ;;  %v4461_v60 = vld [vmem:[#allocation20 + $0x84] ss:$20 sps:$4 sm:$0xff]  }
 0x5c8   : > { %2143 = vmatprep.subr.bf16.mxu1 %v4365_v61  ;;  %v4456_v61 = vld [vmem:[#allocation20 + $0x78] ss:$20 sps:$4 sm:$0xff]  }
 0x5cb   : > { %2144 = vmatpush1.bf16.msra.mxu1 %v4363_v63  ;;  %v4459_v63 = vld [vmem:[#allocation20 + $0x80] ss:$20 sps:$4 sm:$0xff]  }
 0x5cc   : > { %2145 = vmatprep.subr.bf16.mxu1 %v4371_v2  ;;  %v4464_v2 = vld [vmem:[#allocation20 + $0xa4] ss:$20 sps:$4 sm:$0xff]  }
 0x5cf   : > { %2146 = vmatpush1.bf16.msra.mxu1 %v4369_v4  ;;  %v4467_v4 = vld [vmem:[#allocation20 + $0xac] ss:$20 sps:$4 sm:$0xff]  }
 0x5d0   : > { %2147 = vmatprep.subr.bf16.mxu1 %v4377_v8  ;;  %v4462_v8 = vld [vmem:[#allocation20 + $0xa0] ss:$20 sps:$4 sm:$0xff]  }
 0x5d3   : > { %2148 = vmatpush1.bf16.msra.mxu1 %v4375_v11  ;;  %v4465_v11 = vld [vmem:[#allocation20 + $0xa8] ss:$20 sps:$4 sm:$0xff]  }
 0x5d4   : > { %2149 = vmatprep.subr.bf16.mxu1 %v4383_v12  ;;  %v4470_v12 = vld [vmem:[#allocation20 + $0xcc] ss:$20 sps:$4 sm:$0xff]  }
 0x5d7   : > { %2150 = vmatpush1.bf16.msra.mxu1 %v4381_v13  ;;  %v4473_v13 = vld [vmem:[#allocation20 + $0xd4] ss:$20 sps:$4 sm:$0xff]  }
 0x5d8   : > { %2151 = vmatprep.subr.bf16.mxu1 %v4389_v14  ;;  %v4468_v14 = vld [vmem:[#allocation20 + $0xc8] ss:$20 sps:$4 sm:$0xff]  }
 0x5db   : > { %2152 = vmatpush1.bf16.msra.mxu1 %v4387_v15  ;;  %v4471_v15 = vld [vmem:[#allocation20 + $0xd0] ss:$20 sps:$4 sm:$0xff]  }
 0x5dc   : > { %2153 = vmatprep.subr.bf16.mxu1 %v4395_v16  ;;  %v4476_v16 = vld [vmem:[#allocation20 + $0xf4] ss:$20 sps:$4 sm:$0xff]  }
 0x5df   : > { %2154 = vmatpush1.bf16.msra.mxu1 %v4393_v1  ;;  %v4479_v1 = vld [vmem:[#allocation20 + $0xfc] ss:$20 sps:$4 sm:$0xff]  }
 0x5e0   : > { %2155 = vmatprep.subr.bf16.mxu1 %v4401_v7  ;;  %v4474_v7 = vld [vmem:[#allocation20 + $0xf0] ss:$20 sps:$4 sm:$0xff]  }
 0x5e3   : > { %2156 = vmatpush1.bf16.msra.mxu1 %v4399_v25  ;;  %v4477_v25 = vld [vmem:[#allocation20 + $0xf8] ss:$20 sps:$4 sm:$0xff]  }
 0x5e4   : > { %2157 = vmatprep.subr.bf16.mxu1 %v4407_v47  ;;  %v4482_v47 = vld [vmem:[#allocation20 + $0x11c] ss:$20 sps:$4 sm:$0xff]  }
 0x5e7   : > { %2158 = vmatpush1.bf16.msra.mxu1 %v4405_v17  ;;  %v4485_v17 = vld [vmem:[#allocation20 + $0x124] ss:$20 sps:$4 sm:$0xff]  }
 0x5e8   : > { %2159 = vmatprep.subr.bf16.mxu1 %v4413_v19  ;;  %v4480_v19 = vld [vmem:[#allocation20 + $0x118] ss:$20 sps:$4 sm:$0xff]  }
 0x5eb   : > { %2160 = vmatpush1.bf16.msra.mxu1 %v4411_v48  ;;  %v4483_v48 = vld [vmem:[#allocation20 + $0x120] ss:$20 sps:$4 sm:$0xff]  }
 0x5ec   : > { %2161 = vmatprep.subr.bf16.mxu1 %v4419_v49  ;;  %v4488_v49 = vld [vmem:[#allocation20 + $0x144] ss:$20 sps:$4 sm:$0xff]  }
 0x5ef   : > { %2162 = vmatpush1.bf16.msra.mxu1 %v4417_v50  ;;  %v4491_v50 = vld [vmem:[#allocation20 + $0x14c] ss:$20 sps:$4 sm:$0xff]  }
 0x5f0   : > { %2163 = vmatprep.subr.bf16.mxu1 %v4425_v5  ;;  %v4486_v5 = vld [vmem:[#allocation20 + $0x140] ss:$20 sps:$4 sm:$0xff]  }
 0x5f3   : > { %2164 = vmatpush1.bf16.msra.mxu1 %v4423_v36  ;;  %v4489_v36 = vld [vmem:[#allocation20 + $0x148] ss:$20 sps:$4 sm:$0xff]  }
 0x5f4   : > { %2165 = vmatprep.subr.bf16.mxu1 %v4431_v38  ;;  %v4497_v38 = vld [vmem:[#allocation20 + $0x174] ss:$20 sps:$4 sm:$0xff]  }
 0x5f7   : > { %2166 = vmatpush1.bf16.msra.mxu1 %v4429_v40  ;;  %v4495_v40 = vld [vmem:[#allocation20 + $0x170] ss:$20 sps:$4 sm:$0xff]  }
 0x5f8   : > { %2167 = vmatprep.subr.bf16.mxu1 %v4437_v42  ;;  %v4503_v42 = vld [vmem:[#allocation20 + $0x19c] ss:$20 sps:$4 sm:$0xff]  }
 0x5fb   : > { %2168 = vmatpush1.bf16.msra.mxu1 %v4435_v20  ;;  %v4501_v20 = vld [vmem:[#allocation20 + $0x198] ss:$20 sps:$4 sm:$0xff]  }
 0x5fc   : > { %3323 = vmatprep.subr.bf16.mxu1 %v4443_v22  ;;  %v4509_v22 = vld [vmem:[#allocation20 + $0x1c4] ss:$20 sps:$4 sm:$0xff]  }
 0x691   : > { %v1677_v27 = vpop.f32.mrb[0].mxu1 }
 0x692   : > { %v1678_v28 = vadd.f32 %v1677_v27, %v1556_v24  ;;  %v1679_v29 = vpop.f32.mrb[1].mxu1  ;;  %v4507_v24 = vld [vmem:[#allocation20 + $0x1c0] ss:$20 sps:$4 sm:$0xff]  }
 0x693   : > { %v1680_v30 = vadd.f32 %v1679_v29, %v1560_v26  ;;  %v1681_v31 = vpop.f32.mrb[2].mxu1  ;;  %v4512_v26 = vld [vmem:[#allocation20 + $0x1e4] ss:$20 sps:$4 sm:$0xff]   ;;  %v4515_v27 = vld [vmem:[#allocation20 + $0x1ec] ss:$20 sps:$4 sm:$0xff]  }
 0x694   : > { %v1684_v33 = vmul.f32 0.4, %v1678_v28  ;;  %v1682_v34 = vpop.f32.mrb[3].mxu1  ;;  %v4513_v29 = vld [vmem:[#allocation20 + $0x1e8] ss:$20 sps:$4 sm:$0xff]  }
 0x695   : > { %v1685_v35 = vmul.f32 0.4, %v1680_v30  ;;  %v4521_v31 = vld [vmem:[#allocation20 + $0x214] ss:$20 sps:$4 sm:$0xff]   ;;  %v4519_v34 = vld [vmem:[#allocation20 + $0x210] ss:$20 sps:$4 sm:$0xff]  }
 0x696   : > { %v1686_v43 = vmax.f32 %v1678_v28, %v1684_v33  ;;  %v4510_v28 = vld [vmem:[#allocation20 + $0x1e0] ss:$20 sps:$4 sm:$0xff]   ;;  %v4516_v33 = vld [vmem:[#allocation20 + $0x208] ss:$20 sps:$4 sm:$0xff]  }
 0x697   : > { %v1687_v3 = vmax.f32 %v1680_v30, %v1685_v35  ;;  %v4518_v30 = vld [vmem:[#allocation20 + $0x20c] ss:$20 sps:$4 sm:$0xff]   ;;  %v4524_v35 = vld [vmem:[#allocation20 + $0x234] ss:$20 sps:$4 sm:$0xff]  }
 0x698   : > { %v1688_v51 = vpack.c.bf16 %v1686_v43, %v1686_v43  ;;  %v4527_v43 = vld [vmem:[#allocation20 + $0x23c] ss:$20 sps:$4 sm:$0xff]  }
 0x699   : > { %v1689_v44 = vpack.c.bf16 %v1687_v3, %v1687_v3  ;;  %v4522_v3 = vld [vmem:[#allocation20 + $0x230] ss:$20 sps:$4 sm:$0xff]  }
 0x69b   : > { %2128 = vmatprep.mubr.bf16.mxu0 %v1689_v44  ;;  %2169 = vmatprep.mubr.bf16.mxu1 %v1689_v44  ;;  %v4525_v44 = vld [vmem:[#allocation20 + $0x238] ss:$20 sps:$4 sm:$0xff]  }
 0x69c   : > { %2129 = vmatmul.mubr.bf16.vlgmr.msra.gmra.mrb[4].mxu0 %v1688_v51  ;;  %2170 = vmatmul.mubr.bf16.vlgmr.msra.gmra.mrb[4].mxu1 %v1688_v51  ;;  %v4528_v51 = vld [vmem:[#allocation20 + $0x258] ss:$20 sps:$4 sm:$0xff]  }
 0x69d   : > { %3242 = vmatpush1.bf16.msra.mxu0 %v4438_v45  ;;  %3324 = vmatpush1.bf16.msra.mxu1 %v4441_v46  ;;  %v4530_v45 = vld [vmem:[#allocation20 + $0x25c] ss:$20 sps:$4 sm:$0xff]   ;;  %v4533_v46 = vld [vmem:[#allocation20 + $0x264] ss:$20 sps:$4 sm:$0xff]  }
 0x69e   : > { %3243 = vmatprep.subr.bf16.mxu0 %v4446_v52  ;;  %3325 = vmatprep.subr.bf16.mxu1 %v4449_v53  ;;  %v4531_v52 = vld [vmem:[#allocation20 + $0x260] ss:$20 sps:$4 sm:$0xff]   ;;  %v4536_v53 = vld [vmem:[#allocation20 + $0x284] ss:$20 sps:$4 sm:$0xff]  }
 0x6a1   : > { %3244 = vmatpush1.bf16.msra.mxu0 %v4444_v54  ;;  %3326 = vmatpush1.bf16.msra.mxu1 %v4447_v55  ;;  %v4539_v54 = vld [vmem:[#allocation20 + $0x28c] ss:$20 sps:$4 sm:$0xff]  }
 0x6a2   : > { %3245 = vmatprep.subr.bf16.mxu0 %v4452_v56  ;;  %3327 = vmatprep.subr.bf16.mxu1 %v4455_v57  ;;  %v5779_v55 = vld [vmem:[%s5958_s25] sm:$0xf] }
 0x6a3   : > { %v1759_v56 = vrot.slane %v5779_v55, %v5588_v6  ;;  %v1763_v57 = vrot.slane %v5779_v55, %v5592_v9 }
 0x6a5   : > { %3246 = vmatpush1.bf16.msra.mxu0 %v4450_v0  ;;  %3328 = vmatpush1.bf16.msra.mxu1 %v4453_v58  ;;  %v1771_v0 = vrot.slane %v5779_v55, %v5606_v32 }
 0x6a6   : > { %3247 = vmatprep.subr.bf16.mxu0 %v4458_v59  ;;  %3329 = vmatprep.subr.bf16.mxu1 %v4461_v60 }
 0x6a9   : > { %3248 = vmatpush1.bf16.msra.mxu0 %v4456_v61  ;;  %3330 = vmatpush1.bf16.msra.mxu1 %v4459_v63 }
 0x6aa   : > { %3249 = vmatprep.subr.bf16.mxu0 %v4464_v2  ;;  %3331 = vmatprep.subr.bf16.mxu1 %v4467_v4 }
 0x6ad   : > { %3250 = vmatpush1.bf16.msra.mxu0 %v4462_v8  ;;  %3332 = vmatpush1.bf16.msra.mxu1 %v4465_v11 }
 0x6ae   : > { %3251 = vmatprep.subr.bf16.mxu0 %v4470_v12  ;;  %3333 = vmatprep.subr.bf16.mxu1 %v4473_v13 }
 0x6b1   : > { %3252 = vmatpush1.bf16.msra.mxu0 %v4468_v14  ;;  %3334 = vmatpush1.bf16.msra.mxu1 %v4471_v15 }
 0x6b2   : > { %3253 = vmatprep.subr.bf16.mxu0 %v4476_v16  ;;  %3335 = vmatprep.subr.bf16.mxu1 %v4479_v1 }
 0x6b5   : > { %3254 = vmatpush1.bf16.msra.mxu0 %v4474_v7  ;;  %3336 = vmatpush1.bf16.msra.mxu1 %v4477_v25 }
 0x6b6   : > { %3255 = vmatprep.subr.bf16.mxu0 %v4482_v47  ;;  %3337 = vmatprep.subr.bf16.mxu1 %v4485_v17  ;;  %v4534_v17 = vld [vmem:[#allocation20 + $0x280] ss:$20 sps:$4 sm:$0xff]  }
 0x6b9   : > { %3256 = vmatpush1.bf16.msra.mxu0 %v4480_v19  ;;  %3338 = vmatpush1.bf16.msra.mxu1 %v4483_v48  ;;  %v4537_v19 = vld [vmem:[#allocation20 + $0x288] ss:$20 sps:$4 sm:$0xff]  }
 0x6ba   : > { %3257 = vmatprep.subr.bf16.mxu0 %v4488_v49  ;;  %3339 = vmatprep.subr.bf16.mxu1 %v4491_v50  ;;  %v4542_v49 = vld [vmem:[#allocation20 + $0x2ac] ss:$20 sps:$4 sm:$0xff]   ;;  %v4545_v50 = vld [vmem:[#allocation20 + $0x2b4] ss:$20 sps:$4 sm:$0xff]  }
 0x6bd   : > { %3258 = vmatpush1.bf16.msra.mxu0 %v4486_v5  ;;  %3340 = vmatpush1.bf16.msra.mxu1 %v4489_v36  ;;  %v4540_v36 = vld [vmem:[#allocation20 + $0x2a8] ss:$20 sps:$4 sm:$0xff]  }
 0x6be   : > { %3259 = vmatprep.subr.bf16.mxu0 %v4494_v37  ;;  %3341 = vmatprep.subr.bf16.mxu1 %v4497_v38  ;;  %v4543_v37 = vld [vmem:[#allocation20 + $0x2b0] ss:$20 sps:$4 sm:$0xff]   ;;  %v4548_v38 = vld [vmem:[#allocation20 + $0x2d4] ss:$20 sps:$4 sm:$0xff]  }
 0x6c1   : > { %3260 = vmatpush1.bf16.msra.mxu0 %v4492_v39  ;;  %3342 = vmatpush1.bf16.msra.mxu1 %v4495_v40  ;;  %v4551_v39 = vld [vmem:[#allocation20 + $0x2dc] ss:$20 sps:$4 sm:$0xff]  }
 0x6c2   : > { %3261 = vmatprep.subr.bf16.mxu0 %v4500_v41  ;;  %3343 = vmatprep.subr.bf16.mxu1 %v4503_v42  ;;  %v4546_v40 = vld [vmem:[#allocation20 + $0x2d0] ss:$20 sps:$4 sm:$0xff]   ;;  %v4549_v41 = vld [vmem:[#allocation20 + $0x2d8] ss:$20 sps:$4 sm:$0xff]  }
 0x6c3   : > { %v4554_v42 = vld [vmem:[#allocation20 + $0x2fc] ss:$20 sps:$4 sm:$0xff]  }
 0x6c5   : > { %3262 = vmatpush1.bf16.msra.mxu0 %v4498_v18  ;;  %3344 = vmatpush1.bf16.msra.mxu1 %v4501_v20  ;;  %v4557_v18 = vld [vmem:[#allocation20 + $0x304] ss:$20 sps:$4 sm:$0xff]  }
 0x6c6   : > { %3263 = vmatprep.subr.bf16.mxu0 %v4506_v21  ;;  %3345 = vmatprep.subr.bf16.mxu1 %v4509_v22  ;;  %v4552_v20 = vld [vmem:[#allocation20 + $0x2f8] ss:$20 sps:$4 sm:$0xff]   ;;  %v4555_v21 = vld [vmem:[#allocation20 + $0x300] ss:$20 sps:$4 sm:$0xff]  }
 0x6c7   : > { %v4560_v22 = vld [vmem:[#allocation20 + $0x324] ss:$20 sps:$4 sm:$0xff]  }
 0x6c9   : > { %3264 = vmatpush1.bf16.msra.mxu0 %v4504_v23  ;;  %3346 = vmatpush1.bf16.msra.mxu1 %v4507_v24  ;;  %v4563_v23 = vld [vmem:[#allocation20 + $0x32c] ss:$20 sps:$4 sm:$0xff]  }
 0x6ca   : > { %3265 = vmatprep.subr.bf16.mxu0 %v4512_v26  ;;  %3347 = vmatprep.subr.bf16.mxu1 %v4515_v27  ;;  %v4558_v24 = vld [vmem:[#allocation20 + $0x320] ss:$20 sps:$4 sm:$0xff]   ;;  %v4561_v26 = vld [vmem:[#allocation20 + $0x328] ss:$20 sps:$4 sm:$0xff]  }
 0x6cb   : > { %v4566_v27 = vld [vmem:[#allocation20 + $0x34c] ss:$20 sps:$4 sm:$0xff]  }
 0x6cd   : > { %3266 = vmatpush1.bf16.msra.mxu0 %v4510_v28  ;;  %3348 = vmatpush1.bf16.msra.mxu1 %v4513_v29  ;;  %v4569_v28 = vld [vmem:[#allocation20 + $0x354] ss:$20 sps:$4 sm:$0xff]  }
 0x6ce   : > { %3267 = vmatprep.subr.bf16.mxu0 %v4518_v30  ;;  %3349 = vmatprep.subr.bf16.mxu1 %v4521_v31  ;;  %v4564_v29 = vld [vmem:[#allocation20 + $0x348] ss:$20 sps:$4 sm:$0xff]   ;;  %v4567_v30 = vld [vmem:[#allocation20 + $0x350] ss:$20 sps:$4 sm:$0xff]  }
 0x6cf   : > { %v4572_v31 = vld [vmem:[#allocation20 + $0x374] ss:$20 sps:$4 sm:$0xff]  }
 0x6d1   : > { %3268 = vmatpush1.bf16.msra.mxu0 %v4516_v33  ;;  %3350 = vmatpush1.bf16.msra.mxu1 %v4519_v34  ;;  %v4575_v33 = vld [vmem:[#allocation20 + $0x37c] ss:$20 sps:$4 sm:$0xff]  }
 0x6d2   : > { %3269 = vmatprep.subr.bf16.mxu0 %v4524_v35  ;;  %3351 = vmatprep.subr.bf16.mxu1 %v4527_v43  ;;  %v4570_v34 = vld [vmem:[#allocation20 + $0x370] ss:$20 sps:$4 sm:$0xff]   ;;  %v4573_v35 = vld [vmem:[#allocation20 + $0x378] ss:$20 sps:$4 sm:$0xff]  }
 0x6d3   : > { %v4578_v43 = vld [vmem:[#allocation20 + $0x39c] ss:$20 sps:$4 sm:$0xff]  }
 0x6d5   : > { %3270 = vmatpush1.bf16.msra.mxu0 %v4522_v3  ;;  %3352 = vmatpush1.bf16.msra.mxu1 %v4525_v44  ;;  %v4581_v3 = vld [vmem:[#allocation20 + $0x3a4] ss:$20 sps:$4 sm:$0xff]  }
 0x6d6   : > { %3271 = vmatprep.subr.bf16.mxu0 %v4530_v45  ;;  %3353 = vmatprep.subr.bf16.mxu1 %v4533_v46  ;;  %v4576_v44 = vld [vmem:[#allocation20 + $0x398] ss:$20 sps:$4 sm:$0xff]   ;;  %v4579_v45 = vld [vmem:[#allocation20 + $0x3a0] ss:$20 sps:$4 sm:$0xff]  }
 0x6d7   : > { %v4584_v46 = vld [vmem:[#allocation20 + $0x3c4] ss:$20 sps:$4 sm:$0xff]  }
 0x6d9   : > { %3272 = vmatpush1.bf16.msra.mxu0 %v4528_v51  ;;  %3354 = vmatpush1.bf16.msra.mxu1 %v4531_v52  ;;  %v4587_v51 = vld [vmem:[#allocation20 + $0x3cc] ss:$20 sps:$4 sm:$0xff]  }
 0x6da   : > { %3282 = vmatprep.subr.bf16.mxu0 %v4536_v53  ;;  %3364 = vmatprep.subr.bf16.mxu1 %v4539_v54  ;;  %v4582_v52 = vld [vmem:[#allocation20 + $0x3c0] ss:$20 sps:$4 sm:$0xff]   ;;  %v4585_v53 = vld [vmem:[#allocation20 + $0x3c8] ss:$20 sps:$4 sm:$0xff]  }
 0x6db   : > { %v4590_v54 = vld [vmem:[#allocation20 + $0x3ec] ss:$20 sps:$4 sm:$0xff]  }
 0x76f   : > { %v2130_v58 = vpop.f32.mrb[4].mxu0  ;;  %v5787_v59 = vpop.f32.mrb[4].mxu1 }
 0x770   : > { %v2131_v60 = vadd.f32 %v2130_v58, %v1759_v56  ;;  %v2132_v61 = vpop.f32.mrb[5].mxu0  ;;  %v2173_v63 = vpop.f32.mrb[5].mxu1  ;;  %v4593_v56 = vld [vmem:[#allocation20 + $0x3f4] ss:$20 sps:$4 sm:$0xff]  }
 0x771   : > { %v2133_v2 = vadd.f32 %v2132_v61, %v1763_v57  ;;  %v2174_v4 = vadd.f32 %v2173_v63, %v1771_v0  ;;  %v2134_v8 = vpop.f32.mrb[6].mxu0  ;;  %v2175_v11 = vpop.f32.mrb[6].mxu1  ;;  %v4588_v57 = vld [vmem:[#allocation20 + $0x3e8] ss:$20 sps:$4 sm:$0xff]   ;;  %v4591_v0 = vld [vmem:[#allocation20 + $0x3f0] ss:$20 sps:$4 sm:$0xff]  }
 0x772   : > { %v2178_v12 = vmul.f32 0.4, %v2131_v60  ;;  %v2135_v13 = vpop.f32.mrb[7].mxu0  ;;  %v2176_v14 = vpop.f32.mrb[7].mxu1  ;;  %v4596_v58 = vld [vmem:[#allocation20 + $0x414] ss:$20 sps:$4 sm:$0xff]  }
 0x773   : > { %v2179_v15 = vmul.f32 0.4, %v2133_v2  ;;  %v2181_v16 = vmul.f32 0.4, %v2174_v4  ;;  %v4594_v61 = vld [vmem:[#allocation20 + $0x410] ss:$20 sps:$4 sm:$0xff]  }
 0x774   : > { %v2182_v1 = vmax.f32 %v2131_v60, %v2178_v12  ;;  %v4599_v60 = vld [vmem:[#allocation20 + $0x41c] ss:$20 sps:$4 sm:$0xff]   ;;  %v4597_v63 = vld [vmem:[#allocation20 + $0x418] ss:$20 sps:$4 sm:$0xff]   ;;  %v4603_v11 = vld [vmem:[#allocation20 + $0x440] ss:$20 sps:$4 sm:$0xff]  }
 0x775   : > { %v2183_v7 = vmax.f32 %v2133_v2, %v2179_v15  ;;  %v2185_v25 = vmax.f32 %v2174_v4, %v2181_v16  ;;  %v4602_v2 = vld [vmem:[#allocation20 + $0x43c] ss:$20 sps:$4 sm:$0xff]   ;;  %v4605_v4 = vld [vmem:[#allocation20 + $0x444] ss:$20 sps:$4 sm:$0xff]   ;;  %v4611_v13 = vld [vmem:[#allocation20 + $0x46c] ss:$20 sps:$4 sm:$0xff]   ;;  %v1767_v16 = vrot.slane %v5779_v55, %v5595_v10 }
 0x776   : > { %v5791_v48 = vpack.c.bf16 %v2182_v1, %v2182_v1  ;;  %v4600_v8 = vld [vmem:[#allocation20 + $0x438] ss:$20 sps:$4 sm:$0xff]   ;;  %v4606_v14 = vld [vmem:[#allocation20 + $0x460] ss:$20 sps:$4 sm:$0xff]   ;;  %v4609_v15 = vld [vmem:[#allocation20 + $0x468] ss:$20 sps:$4 sm:$0xff]  }
 0x777   : > { %v5789_v47 = vpack.c.bf16 %v2183_v7, %v2183_v7  ;;  %v5795_v5 = vpack.c.bf16 %v2185_v25, %v2185_v25  ;;  %v4608_v12 = vld [vmem:[#allocation20 + $0x464] ss:$20 sps:$4 sm:$0xff]   ;;  %v4614_v1 = vld [vmem:[#allocation20 + $0x48c] ss:$20 sps:$4 sm:$0xff]   ;;  %v4617_v7 = vld [vmem:[#allocation20 + $0x494] ss:$20 sps:$4 sm:$0xff]  }
 0x778   : > { %v4612_v25 = vld [vmem:[#allocation20 + $0x488] ss:$20 sps:$4 sm:$0xff]  }
 0x779   : > { %3273 = vmatprep.mubr.bf16.mxu0 %v5789_v47  ;;  %3355 = vmatprep.mubr.bf16.mxu1 %v5789_v47  ;;  %v4626_v55 = vld [vmem:[#allocation20 + $0x4dc] ss:$20 sps:$4 sm:$0xff]  }
 0x77a   : > { %3274 = vmatmul.mubr.bf16.vlgmr.msra.gmra.mrb[8].mxu0 %v5791_v48  ;;  %3356 = vmatmul.mubr.bf16.vlgmr.msra.gmra.mrb[8].mxu1 %v5791_v48 }
 0x77b   : > { %3283 = vmatpush1.bf16.msra.mxu0 %v4534_v17  ;;  %3365 = vmatpush1.bf16.msra.mxu1 %v4537_v19  ;;  %v4615_v17 = vld [vmem:[#allocation20 + $0x490] ss:$20 sps:$4 sm:$0xff]   ;;  %v2172_v19 = vadd.f32 %v5787_v59, %v1767_v16 }
 0x77c   : > { %3314 = vmatprep.mubr.bf16.mxu0 %v5795_v5  ;;  %3396 = vmatprep.mubr.bf16.mxu1 %v5795_v5  ;;  %v4630_v59 = vld [vmem:[#allocation20 + $0x150] ss:$20 sps:$4 sm:$0xff]  }
 0x77d   : > { %3284 = vmatprep.subr.bf16.mxu0 %v4542_v49  ;;  %3366 = vmatprep.subr.bf16.mxu1 %v4545_v50  ;;  %v4620_v49 = vld [vmem:[#allocation20 + $0x4b4] ss:$20 sps:$4 sm:$0xff]   ;;  %v4623_v50 = vld [vmem:[#allocation20 + $0x4bc] ss:$20 sps:$4 sm:$0xff]  }
 0x77f   : > { %3285 = vmatpush1.bf16.msra.mxu0 %v4540_v36  ;;  %3367 = vmatpush1.bf16.msra.mxu1 %v4543_v37  ;;  %v4618_v36 = vld [vmem:[#allocation20 + $0x4b0] ss:$20 sps:$4 sm:$0xff]   ;;  %v4621_v37 = vld [vmem:[#allocation20 + $0x4b8] ss:$20 sps:$4 sm:$0xff]  }
 0x780   : > { %3286 = vmatprep.subr.bf16.mxu0 %v4548_v38  ;;  %3368 = vmatprep.subr.bf16.mxu1 %v4551_v39  ;;  %v2180_v38 = vmul.f32 0.4, %v2172_v19  ;;  %v4629_v39 = vld [vmem:[#allocation20 + $0x4e4] ss:$20 sps:$4 sm:$0xff]  }
 0x783   : > { %3287 = vmatpush1.bf16.msra.mxu0 %v4546_v40  ;;  %3369 = vmatpush1.bf16.msra.mxu1 %v4549_v41  ;;  %v4624_v40 = vld [vmem:[#allocation20 + $0x4d8] ss:$20 sps:$4 sm:$0xff]   ;;  %v4627_v41 = vld [vmem:[#allocation20 + $0x4e0] ss:$20 sps:$4 sm:$0xff]  }
 0x784   : > { %3288 = vmatprep.subr.bf16.mxu0 %v4554_v42  ;;  %3370 = vmatprep.subr.bf16.mxu1 %v4557_v18  ;;  %v2184_v42 = vmax.f32 %v2172_v19, %v2180_v38  ;;  %v4631_v18 = vld [vmem:[#allocation20 + $0x3d0] ss:$20 sps:$4 sm:$0xff]  }
 0x787   : > { %3289 = vmatpush1.bf16.msra.mxu0 %v4552_v20  ;;  %3371 = vmatpush1.bf16.msra.mxu1 %v4555_v21  ;;  %v4632_v20 = vld [vmem:[#allocation20 + $0x10] ss:$20 sps:$4 sm:$0xff]   ;;  %v5804_v21 = vpack.c.bf16 %v2184_v42, %v2184_v42 }
 0x788   : > { %3290 = vmatprep.subr.bf16.mxu0 %v4560_v22  ;;  %3372 = vmatprep.subr.bf16.mxu1 %v4563_v23  ;;  %v4633_v22 = vld [vmem:[#allocation20 + $0x290] ss:$20 sps:$4 sm:$0xff]   ;;  %v4634_v23 = vld [vmem:[#allocation20 + $0x178] ss:$20 sps:$4 sm:$0xff]  }
 0x78b   : > { %3291 = vmatpush1.bf16.msra.mxu0 %v4558_v24  ;;  %3373 = vmatpush1.bf16.msra.mxu1 %v4561_v26  ;;  %v4635_v24 = vld [vmem:[#allocation20 + $0x3f8] ss:$20 sps:$4 sm:$0xff]  }
 0x78c   : > { %3292 = vmatprep.subr.bf16.mxu0 %v4566_v27  ;;  %3374 = vmatprep.subr.bf16.mxu1 %v4569_v28  ;;  %v4636_v26 = vld [vmem:[#allocation20 + $0x38] ss:$20 sps:$4 sm:$0xff]   ;;  %v4638_v28 = vld [vmem:[#allocation20 + $0x1a0] ss:$20 sps:$4 sm:$0xff]  }
 0x78d   : > { %v4637_v27 = vld [vmem:[#allocation20 + $0x2b8] ss:$20 sps:$4 sm:$0xff]  }
 0x78f   : > { %3293 = vmatpush1.bf16.msra.mxu0 %v4564_v29  ;;  %3375 = vmatpush1.bf16.msra.mxu1 %v4567_v30  ;;  %v4639_v29 = vld [vmem:[#allocation20 + $0x420] ss:$20 sps:$4 sm:$0xff]  }
 0x790   : > { %3294 = vmatprep.subr.bf16.mxu0 %v4572_v31  ;;  %3376 = vmatprep.subr.bf16.mxu1 %v4575_v33  ;;  %v4640_v30 = vld [vmem:[#allocation20 + $0x60] ss:$20 sps:$4 sm:$0xff]   ;;  %v4642_v33 = vld [vmem:[#allocation20 + $0x1c8] ss:$20 sps:$4 sm:$0xff]  }
 0x791   : > { %v4641_v31 = vld [vmem:[#allocation20 + $0x2e0] ss:$20 sps:$4 sm:$0xff]  }
 0x793   : > { %3295 = vmatpush1.bf16.msra.mxu0 %v4570_v34  ;;  %3377 = vmatpush1.bf16.msra.mxu1 %v4573_v35  ;;  %v4643_v34 = vld [vmem:[#allocation20 + $0x448] ss:$20 sps:$4 sm:$0xff]  }
 0x794   : > { %3296 = vmatprep.subr.bf16.mxu0 %v4578_v43  ;;  %3378 = vmatprep.subr.bf16.mxu1 %v4581_v3  ;;  %v4644_v35 = vld [vmem:[#allocation20 + $0x88] ss:$20 sps:$4 sm:$0xff]   ;;  %v4646_v43 = vld [vmem:[#allocation20 + $0x1f0] ss:$20 sps:$4 sm:$0xff]  }
 0x795   : > { %v4648_v3 = vld [vmem:[#allocation20 + $0xb0] ss:$20 sps:$4 sm:$0xff]  }
 0x797   : > { %3297 = vmatpush1.bf16.msra.mxu0 %v4576_v44  ;;  %3379 = vmatpush1.bf16.msra.mxu1 %v4579_v45  ;;  %v4649_v44 = vld [vmem:[#allocation20 + $0x330] ss:$20 sps:$4 sm:$0xff]   ;;  %v4650_v45 = vld [vmem:[#allocation20 + $0x218] ss:$20 sps:$4 sm:$0xff]  }
 0x798   : > { %3298 = vmatprep.subr.bf16.mxu0 %v4584_v46  ;;  %3380 = vmatprep.subr.bf16.mxu1 %v4587_v51  ;;  %v4651_v46 = vld [vmem:[#allocation20 + $0x498] ss:$20 sps:$4 sm:$0xff]  }
 0x799   : > { %v4652_v51 = vld [vmem:[#allocation20 + $0xd8] ss:$20 sps:$4 sm:$0xff]  }
 0x79b   : > { %3299 = vmatpush1.bf16.msra.mxu0 %v4582_v52  ;;  %3381 = vmatpush1.bf16.msra.mxu1 %v4585_v53  ;;  %v4653_v52 = vld [vmem:[#allocation20 + $0x358] ss:$20 sps:$4 sm:$0xff]   ;;  %v4654_v53 = vld [vmem:[#allocation20 + $0x240] ss:$20 sps:$4 sm:$0xff]  }
 0x79c   : > { %3300 = vmatprep.subr.bf16.mxu0 %v4590_v54  ;;  %3382 = vmatprep.subr.bf16.mxu1 %v4593_v56  ;;  %v4655_v54 = vld [vmem:[#allocation20 + $0x4c0] ss:$20 sps:$4 sm:$0xff]  }
 0x79d   : > { %v4656_v56 = vld [vmem:[#allocation20 + $0x100] ss:$20 sps:$4 sm:$0xff]  }
 0x79f   : > { %3301 = vmatpush1.bf16.msra.mxu0 %v4588_v57  ;;  %3383 = vmatpush1.bf16.msra.mxu1 %v4591_v0  ;;  %v4657_v57 = vld [vmem:[#allocation20 + $0x380] ss:$20 sps:$4 sm:$0xff]   ;;  %v4658_v0 = vld [vmem:[#allocation20 + $0x268] ss:$20 sps:$4 sm:$0xff]  }
 0x7a0   : > { %3302 = vmatprep.subr.bf16.mxu0 %v4596_v58  ;;  %3384 = vmatprep.subr.bf16.mxu1 %v4599_v60  ;;  %v4659_v58 = vld [vmem:[#allocation20 + $0x4e8] ss:$20 sps:$4 sm:$0xff]  }
 0x7a1   : > { %v4660_v60 = vld [vmem:[#allocation20 + $0x128] ss:$20 sps:$4 sm:$0xff]  }
 0x7a3   : > { %3303 = vmatpush1.bf16.msra.mxu0 %v4594_v61  ;;  %3385 = vmatpush1.bf16.msra.mxu1 %v4597_v63  ;;  %v4661_v61 = vld [vmem:[#allocation20 + $0x3a8] ss:$20 sps:$4 sm:$0xff]   ;;  %v2382_v63 = vld [vmem:[%s5960_s18] sm:$0x1f] }
 0x7a4   : > { %3304 = vmatprep.subr.bf16.mxu0 %v4602_v2  ;;  %3386 = vmatprep.subr.bf16.mxu1 %v4605_v4  ;;  %v2387_v2 = vrot.slane %v2382_v63, %v5588_v6  ;;  %v2395_v4 = vrot.slane %v2382_v63, %v5595_v10 }
 0x7a7   : > { %3305 = vmatpush1.bf16.msra.mxu0 %v4600_v8  ;;  %3387 = vmatpush1.bf16.msra.mxu1 %v4603_v11  ;;  %v2391_v8 = vrot.slane %v2382_v63, %v5592_v9  ;;  %v2399_v11 = vrot.slane %v2382_v63, %v5606_v32 }
 0x7a8   : > { %3306 = vmatprep.subr.bf16.mxu0 %v4608_v12  ;;  %3388 = vmatprep.subr.bf16.mxu1 %v4611_v13 }
 0x7ab   : > { %3307 = vmatpush1.bf16.msra.mxu0 %v4606_v14  ;;  %3389 = vmatpush1.bf16.msra.mxu1 %v4609_v15 }
 0x7ac   : > { %3308 = vmatprep.subr.bf16.mxu0 %v4614_v1  ;;  %3390 = vmatprep.subr.bf16.mxu1 %v4617_v7 }
 0x7af   : > { %3309 = vmatpush1.bf16.msra.mxu0 %v4612_v25  ;;  %3391 = vmatpush1.bf16.msra.mxu1 %v4615_v17 }
 0x7b0   : > { %3310 = vmatprep.subr.bf16.mxu0 %v4620_v49  ;;  %3392 = vmatprep.subr.bf16.mxu1 %v4623_v50 }
 0x7b3   : > { %3311 = vmatpush1.bf16.msra.mxu0 %v4618_v36  ;;  %3393 = vmatpush1.bf16.msra.mxu1 %v4621_v37 }
 0x7b4   : > { %3312 = vmatprep.subr.bf16.mxu0 %v4626_v55  ;;  %3394 = vmatprep.subr.bf16.mxu1 %v4629_v39  ;;  %v2403_v39 = vrot.slane %v2382_v63, %v5622_v62 }
 0x7b7   : > { %3313 = vmatpush1.bf16.msra.mxu0 %v4624_v40  ;;  %3395 = vmatpush1.bf16.msra.mxu1 %v4627_v41 }
 0x7b8   : > { %3979 = vmatprep.subr.bf16.mxu0 %v4630_v59  ;;  %4001 = vmatprep.subr.bf16.mxu1 %v4631_v18 }
 0x7ba   : > { %3315 = vmatmul.mubr.bf16.vlgmr.msra.gmra.mrb[8].mxu0 %v5804_v21  ;;  %3397 = vmatmul.mubr.bf16.vlgmr.msra.gmra.mrb[8].mxu1 %v5804_v21 }
 0x7bb   : > { %3980 = vmatpush3.bf16.msra.mxu0 %v4632_v20  ;;  %3437 = vmatprep.mubr.bf16.mxu0 %v5789_v47  ;;  %v4645_v47 = vld [vmem:[#allocation20 + $0x308] ss:$20 sps:$4 sm:$0xff]  }
 0x7bc   : > { %4002 = vmatpush3.bf16.msra.mxu1 %v4633_v22  ;;  %3477 = vmatprep.mubr.bf16.mxu1 %v5795_v5  ;;  %v4647_v5 = vld [vmem:[#allocation20 + $0x470] ss:$20 sps:$4 sm:$0xff]  }
 0x7bd   : > { %3981 = vmatprep.subr.bf16.mxu0 %v4634_v23  ;;  %4003 = vmatprep.subr.bf16.mxu1 %v4635_v24 }
 0x7bf   : > { %3982 = vmatpush3.bf16.msra.mxu0 %v4636_v26 }
 0x7c0   : > { %4004 = vmatpush3.bf16.msra.mxu1 %v4637_v27  ;;  %3983 = vmatprep.subr.bf16.mxu0 %v4638_v28 }
 0x7c1   : > { %4005 = vmatprep.subr.bf16.mxu1 %v4639_v29 }
 0x7c3   : > { %3984 = vmatpush3.bf16.msra.mxu0 %v4640_v30 }
 0x7c4   : > { %4006 = vmatpush3.bf16.msra.mxu1 %v4641_v31  ;;  %3985 = vmatprep.subr.bf16.mxu0 %v4642_v33 }
 0x7c5   : > { %4007 = vmatprep.subr.bf16.mxu1 %v4643_v34 }
 0x7c7   : > { %3986 = vmatpush3.bf16.msra.mxu0 %v4644_v35 }
 0x7c8   : > { %4008 = vmatpush3.bf16.msra.mxu1 %v4645_v47  ;;  %3987 = vmatprep.subr.bf16.mxu0 %v4646_v43 }
 0x7c9   : > { %4009 = vmatprep.subr.bf16.mxu1 %v4647_v5 }
 0x7cb   : > { %3988 = vmatpush3.bf16.msra.mxu0 %v4648_v3 }
 0x7cc   : > { %4010 = vmatpush3.bf16.msra.mxu1 %v4649_v44  ;;  %3989 = vmatprep.subr.bf16.mxu0 %v4650_v45 }
 0x7cd   : > { %4011 = vmatprep.subr.bf16.mxu1 %v4651_v46 }
 0x7cf   : > { %3990 = vmatpush3.bf16.msra.mxu0 %v4652_v51 }
 0x7d0   : > { %4012 = vmatpush3.bf16.msra.mxu1 %v4653_v52  ;;  %3991 = vmatprep.subr.bf16.mxu0 %v4654_v53 }
 0x7d1   : > { %4013 = vmatprep.subr.bf16.mxu1 %v4655_v54 }
 0x7d3   : > { %3992 = vmatpush3.bf16.msra.mxu0 %v4656_v56 }
 0x7d4   : > { %4014 = vmatpush3.bf16.msra.mxu1 %v4657_v57  ;;  %3993 = vmatprep.subr.bf16.mxu0 %v4658_v0 }
 0x7d5   : > { %4015 = vmatprep.subr.bf16.mxu1 %v4659_v58 }
 0x7d7   : > { %3994 = vmatpush3.bf16.msra.mxu0 %v4660_v60 }
 0x7d8   : > { %4016 = vmatpush3.bf16.msra.mxu1 %v4661_v61 }
 0x7da   : > { %3438 = vmatmul.mubr.bf16.vlgmr.msra.gmra.mrb[12].mxu0 %v5791_v48 }
 0x7db   : > { %3478 = vmatmul.mubr.bf16.vlgmr.msra.gmra.mrb[12].mxu1 %v5804_v21 }
 0x88d   : > { %v3316_v12 = vpop.f32.mrb[8].mxu0  ;;  %v3398_v13 = vpop.f32.mrb[8].mxu1 }
 0x88e   : > { %v4035_v48 = vadd.f32 %v3316_v12, %v2387_v2  ;;  %v4037_v14 = vadd.f32 %v3398_v13, %v2395_v4  ;;  %v3318_v15 = vpop.f32.mrb[9].mxu0  ;;  %v3400_v16 = vpop.f32.mrb[9].mxu1 }
 0x88f   : > { %v4036_v1 = vadd.f32 %v3318_v15, %v2391_v8  ;;  %v4038_v7 = vadd.f32 %v3400_v16, %v2399_v11  ;;  %v3320_v25 = vpop.f32.mrb[10].mxu0  ;;  %v3402_v17 = vpop.f32.mrb[10].mxu1 }
 0x890   : > { %v3485_v19 = vmul.f32 0.4, %v4035_v48  ;;  %v3487_v6 = vmul.f32 0.4, %v4037_v14  ;;  %v3321_v49 = vpop.f32.mrb[11].mxu0  ;;  %v3403_v10 = vpop.f32.mrb[11].mxu1 }
 0x891   : > { %v3486_v50 = vmul.f32 0.4, %v4036_v1  ;;  %v3488_v9 = vmul.f32 0.4, %v4038_v7 }
 0x892   : > { %v3490_v36 = vmax.f32 %v4035_v48, %v3485_v19  ;;  %v3492_v32 = vmax.f32 %v4037_v14, %v3487_v6 }
 0x893   : > { %v3491_v37 = vmax.f32 %v4036_v1, %v3486_v50  ;;  %v3493_v38 = vmax.f32 %v4038_v7, %v3488_v9 }
 0x894   : > { %3495 = vst [vmem:[%s752_s20] sm:$0xff] %v3490_v36  ;;  %3497 = vst [vmem:[%s752_s20 + $0x10] sm:$0xff] %v3492_v32 }
 0x895   : > { %3496 = vst [vmem:[%s752_s20 + $0x8] sm:$0xff] %v3491_v37  ;;  %3498 = vst [vmem:[%s752_s20 + $0x18] sm:$0xff] %v3493_v38 }
 0x8ad   : > { %v3995_v55 = vpop.f32.mrb[12].mxu0 }
 0x8ae   : > { %v4017_v40 = vpop.f32.mrb[12].mxu1  ;;  %v3996_v41 = vpop.f32.mrb[13].mxu0 }
 0x8af   : > { %v3997_v42 = vadd.f32 %v3996_v41, %v3995_v55  ;;  %v4018_v59 = vpop.f32.mrb[13].mxu1  ;;  %v3998_v18 = vpop.f32.mrb[14].mxu0 }
 0x8b0   : > { %v4019_v20 = vadd.f32 %v4018_v59, %v4017_v40  ;;  %v4020_v21 = vpop.f32.mrb[14].mxu1  ;;  %v3999_v22 = vpop.f32.mrb[15].mxu0 }
 0x8b1   : > { %v3440_v23 = vadd.f32 %v3997_v42, %v2403_v39  ;;  %v4021_v24 = vpop.f32.mrb[15].mxu1 }
 0x8b3   : > { %v3480_v26 = vadd.f32 %v4019_v20, %v3440_v23 }
 0x8b5   : > { %v3489_v27 = vmul.f32 0.4, %v3480_v26 }
 0x8b7   : > { %v3494_v28 = vmax.f32 %v3480_v26, %v3489_v27 }
 0x8b9   : > { %3499 = vst [vmem:[%s752_s20 + $0x20] sm:$0xff] %v3494_v28 }
 0x8ba   : > { %5011 = shalt.err (!%p5008_p3)
}
 0x8bb   : > { %s5012_s25 = scalar_lea.hbm %s5827_s24, 640  ;;  %s5016_s23 = scalar_lea.hbm %s5962_s27, 1280 }
 0x8bc   : > { %p5013_p4 = scmp.ne.s32.totalorder %s5827_s24, %s5012_s25  ;;  %p5017_p11 = scmp.lt.u32.totalorder %s5827_s24, %s5962_s27 }
 0x8bd   : > { %p5018_p13 = scmp.lt.u32.totalorder %s5016_s23, %s5012_s25  ;;  %p5020_p0 = scmp.lt.u32.totalorder %s5012_s25, %s5827_s24 }
 0x8be   : > { %p5014_p7 = pnand %p5013_p4, %p5963_p6 }
 0x8bf   : > { %p5019_p1 = por %p5018_p13, %p5017_p11 }
 0x8c0   : > { %p5015_p8 = pneg %p5014_p7 }
 0x8c1   : > { %p5021_p5 = por %p5020_p0, %p5019_p1 }
 0x8c3   : > { %p5022_p9 = pnand %p5021_p5, %p5015_p8 }
 0x8c5   : > { %5025 = shalt.err (!%p5022_p9)
}
 0x8c6   : > { %4097 = dma.vmem_to_hbm [thread:$0]  (%p5963_p6), %s5829_s29, 640, %s5827_s24, %s3501_s22  }
 0x8c7 PF: > { %s5964_s30 = sld [smem:[#allocation34_spill]]  ;;  %s5965_s20 = sld [smem:[#allocation31_spill]] }
 0x8c8   : > { %s5966_s10 = sld [smem:[#allocation38_spill]] }
 0x8cd   : > { %p4164_p12 = scmp.ge.s32.totalorder %s5964_s30, 2  ;;  %s3527_s14 = sand.u32 1, %s5965_s20  }
 0x8ce   : > { %p5967_p10 = scmp.ne.s32.totalorder %s5966_s10, 0  ;;  %s3528_s28 = scalar_lea.sflag [#allocation4], %s3527_s14 }
 0x8d0   : > { %p4137_p2 = pnand %p4164_p12, %p5967_p10 }
 0x8d2   : > { %5071 = dma.done.wait (!%p4137_p2), %s3528_s28, 640  }
 0x8d3   : > { %5073 = vsyncadd (!%p4137_p2), %s3528_s28, 4294966656  ;;  %s5968_s21 = sld [smem:[#allocation35_spill]]  ;;  %s5969_s0 = sld [smem:[#allocation32_spill]] }
 0x8d4   : > { %s5970_s30 = sld [smem:[#allocation33_spill]]  ;;  %s5971_s20 = sld [smem:[#allocation36_spill]] }
 0x8d9   : > { %p36_p3 = scmp.ge.s32.totalorder %s5968_s21, 4  }
 0x8db   :  { %38 = sbr.rel (!%p36_p3) target bundleno = 22 (0x16), region = 180 }
 0x8e2   :  { %3533 = vsyncpa [#allocation3], 1 }
 0x8e3   :  { %3535 = vsyncpa [#allocation3 + $0x1], 1 }
 0x8e4   :  { %3536 = vsyncpa [#allocation6], 1 }
 0x8e5   :  { %3537 = vsyncpa [#allocation9], 1 }
 0x8e6   :  { %3538 = vsyncpa [#allocation12], 1 }
 0x8e7   :  { %3539 = vsyncpa [#allocation15], 1 }
 0x8e8   :  { %3540 = vsyncpa [#allocation18], 1 }
 0x8e9   :  { %3541 = vsyncpa [#allocation21], 1 }
 0x8ea   :  { %3542 = vsyncpa [#allocation4], 1 }
 0x8eb   :  { %3544 = vsyncpa [#allocation4 + $0x1], 1 }

</bundles_post_ra>
